<compile_context>
chip_gen: v7x
topology: tpu7x:2x2x1
jax: 0.10.0
libtpu: 0.0.40
codegen_flags: <defaults>
</compile_context>

<pallas_src>
import functools

import jax
import jax.numpy as jnp
from jax.experimental import pallas as pl
from jax.experimental.pallas import tpu as pltpu


# On v7x (2 TensorCores/chip) set True so the direction axis is CORE_PARALLEL
# (fwd on TC0, bwd on TC1).  Plain "parallel" is the portable 1-TC default.
DIRECTION_CORE_PARALLEL = False


# ----------------------------- Pallas kernel --------------------------------

def bilstm_layer_kernel(bs_ref, x_ref, wih_ref, whh_ref, b_ref,
                        hall_ref, hfin_ref,
                        xg_scr, h_scr, c_scr,
                        *, chunk_len, batch, hidden_dim, num_chunks):
    """One (direction, time-chunk) grid step of a bidirectional LSTM layer.

    Grid: (2, num_chunks); axis 0 = direction (0 fwd, 1 bwd, "parallel"),
    axis 1 = sequential time chunk ("arbitrary").  The backward direction's
    BlockSpecs fetch chunks in reverse order, so a single persistent (B,H)
    h/c carry per direction is all the state kept across grid steps.

    Refs (time-major, flattened rows = t*B + b within the chunk):
      bs_ref   SMEM (T,)        int32  active-batch count per timestep
      x_ref    VMEM (Tc*B, Din) bf16   chunk of input activations
      wih_ref  VMEM (Din, 4H)   bf16   W_ih^T for this direction
      whh_ref  VMEM (H, 4H)     bf16   W_hh^T for this direction
      b_ref    VMEM (1, 4H)     f32    b_ih + b_hh for this direction
      hall_ref VMEM (Tc*B, H)   bf16   this direction's slice of the output
      hfin_ref VMEM (B, H)      f32    final hidden state (written last chunk)
      xg_scr   VMEM (Tc*B, 4H)  f32    per-chunk input projection
      h_scr/c_scr VMEM (B, H)   f32    persistent h / c carries
    """
    Tc, B, H = chunk_len, batch, hidden_dim
    d = pl.program_id(0)                        # 0 = forward, 1 = backward
    k = pl.program_id(1)                        # sequential chunk counter
    chunk = d * (num_chunks - 1) + (1 - 2 * d) * k   # real time-chunk index
    t_base = chunk * Tc

    # Reset the carries at the first chunk of each direction.
    @pl.when(k == 0)
    def _():
        h_scr[...] = jnp.zeros_like(h_scr)
        c_scr[...] = jnp.zeros_like(c_scr)

    # Input projection for the whole chunk: one MXU matmul (bf16 in, f32 acc),
    # bias added once outside the recurrence.
    xg_scr[...] = (jnp.dot(x_ref[...], wih_ref[...],
                           preferred_element_type=jnp.float32) + b_ref[...])

    # Recurrent RHS is constant across all steps; relying on Mosaic to keep it
    # staged (explicit matmul_push_rhs/acc_lhs/pop would pin it on the MXU).
    whh = whh_ref[...]

    # (B,1) sublane iota for the validity mask, hoisted out of the loop
    # (broadcasts are not CSE'd by JAX).
    batch_iota = jax.lax.broadcasted_iota(jnp.int32, (B, 1), 0)

    t0 = d * (Tc - 1)                           # backward scans the chunk
    sign = 1 - 2 * d                            # in reverse.

    def step(s, carry):
        h_prev, c_prev = carry
        ss = t0 + sign * s                      # local timestep in the chunk
        row = ss * B
        if B % 8 == 0:                          # sublane-aligned slice hint
            row = pl.multiple_of(row, 8)
        rows = pl.ds(row, B)

        gates = xg_scr[rows, :] + jnp.dot(h_prev.astype(whh.dtype), whh,
                                          preferred_element_type=jnp.float32)

        # Gate slices are 128-lane dense when H % 128 == 0 (kept as a layout
        # invariant for real sizes).  Gate math stays f32 (v5e-safe).
        i_g = jax.nn.sigmoid(gates[:, 0 * H:1 * H])
        f_g = jax.nn.sigmoid(gates[:, 1 * H:2 * H])
        g_g = jnp.tanh(gates[:, 2 * H:3 * H])
        o_g = jax.nn.sigmoid(gates[:, 3 * H:4 * H])

        c_new = f_g * c_prev + i_g * g_g
        h_new = o_g * jnp.tanh(c_new)

        # Packed-sequence mask rebuilt in-kernel from SMEM batch_sizes:
        # row b is active at global timestep t iff b < batch_sizes[t]
        # (lengths sorted descending, as pack_padded_sequence enforces).
        n_active = bs_ref[t_base + ss]
        m = batch_iota < n_active               # (B, 1) bool

        c_nxt = jnp.where(m, c_new, c_prev)
        h_nxt = jnp.where(m, h_new, h_prev)

        # pad_packed_sequence yields zeros at padded positions.
        hall_ref[rows, :] = jnp.where(m, h_new, 0.0).astype(hall_ref.dtype)
        return h_nxt, c_nxt

    # Serially-dependent recurrence: partial unroll keeps LLO scheduling
    # visibility without blowing up code size / vreg live ranges.
    h_fin, c_fin = jax.lax.fori_loop(0, Tc, step, (h_scr[...], c_scr[...]),
                                     unroll=min(8, Tc))
    h_scr[...] = h_fin
    c_scr[...] = c_fin

    @pl.when(k == pl.num_programs(1) - 1)
    def _():
        hfin_ref[...] = h_fin.astype(hfin_ref.dtype)


# ------------------------------ helpers --------------------------------------

def _pick_time_chunk(seq_len, batch, max_chunk):
    """Largest divisor of T that is <= max_chunk and keeps (Tc*B) % 8 == 0."""
    tc = 1
    for cand in range(1, min(seq_len, max(1, max_chunk)) + 1):
        if seq_len % cand == 0:
            tc = cand
    if (tc * batch) % 8 != 0 and tc != seq_len:
        tc = seq_len          # full-length block always satisfies (8,128) rule
    return tc


def _vmem_limit_bytes(tc, batch, d_in, hidden, weight_buffers):
    wb = 2 if weight_buffers is None else weight_buffers
    est = (
        2 * tc * batch * d_in * 2          # x chunk, double-buffered, bf16
        + wb * d_in * 4 * hidden * 2       # W_ih^T
        + wb * hidden * 4 * hidden * 2     # W_hh^T
        + wb * 8 * 4 * hidden * 4          # bias (rows pad to 8 sublanes)
        + 2 * tc * batch * hidden * 2      # h_all out chunk, double-buffered
        + 2 * batch * hidden * 4           # h_fin out
        + tc * batch * 4 * hidden * 4      # xg scratch (f32)
        + 2 * batch * hidden * 4           # h / c carries
    )
    # Generous headroom for compiler temporaries / relayouts, capped under the
    # v7x per-TensorCore 64 MiB physical ceiling (v5e/v6e have 128 MiB).
    return int(min(max(4 * est, 16 * 2 ** 20), 64 * 2 ** 20))


# --------------------------- layer wrapper -----------------------------------

def run_bilstm_layer(x_flat, batch_sizes, w_ih, w_hh, b, *, seq_len, batch,
                     hidden_dim, time_chunk=64,
                     core_parallel=DIRECTION_CORE_PARALLEL):
    """Run one bidirectional LSTM layer with a single pallas_call.

    x_flat:      (T*B, Din) bf16, time-major flattened activations
    batch_sizes: (T,) int32, number of active sequences per timestep
    w_ih:        (2, Din, 4H) bf16  (W_ih^T per direction)
    w_hh:        (2, H,   4H) bf16  (W_hh^T per direction)
    b:           (2, 1,   4H) f32   (b_ih + b_hh per direction)

    Returns (h_all, h_fin, fused):
      if H % 128 == 0:  h_all is (T*B, 2H) bf16 with fwd in cols [0:H] and
                        bwd in cols [H:2H] (no XLA concatenate needed);
      else:             h_all is (2, T*B, H) bf16.
      h_fin is (2, B, H) f32.
    """
    TB, Din = x_flat.shape
    T, B, H = seq_len, batch, hidden_dim
    assert TB == T * B

    Tc = _pick_time_chunk(T, B, time_chunk)
    Kt = T // Tc
    fused = (H % 128 == 0)     # lane-dense fused (T*B, 2H) output possible

    kernel = functools.partial(bilstm_layer_kernel, chunk_len=Tc, batch=B,
                               hidden_dim=H, num_chunks=Kt)

    def chunk_idx(d, k):
        # forward visits chunks 0..Kt-1, backward visits Kt-1..0
        return d * (Kt - 1) + (1 - 2 * d) * k

    def make(weight_buffers):
        # Weights / bias only change with the direction axis -> no lookahead
        # needed; single-buffer them to halve their VMEM footprint.
        wkw = ({"pipeline_mode": pl.Buffered(weight_buffers)}
               if weight_buffers is not None else {})

        in_specs = [
            pl.BlockSpec((Tc * B, Din), lambda d, k, bs: (chunk_idx(d, k), 0)),
            pl.BlockSpec((None, Din, 4 * H), lambda d, k, bs: (d, 0, 0), **wkw),
            pl.BlockSpec((None, H, 4 * H), lambda d, k, bs: (d, 0, 0), **wkw),
            pl.BlockSpec((None, 1, 4 * H), lambda d, k, bs: (d, 0, 0), **wkw),
        ]
        if fused:
            hall_shape = jax.ShapeDtypeStruct((TB, 2 * H), jnp.bfloat16)
            hall_spec = pl.BlockSpec(
                (Tc * B, H), lambda d, k, bs: (chunk_idx(d, k), d))
        else:
            hall_shape = jax.ShapeDtypeStruct((2, TB, H), jnp.bfloat16)
            hall_spec = pl.BlockSpec(
                (None, Tc * B, H), lambda d, k, bs: (d, chunk_idx(d, k), 0))
        out_specs = [hall_spec,
                     pl.BlockSpec((None, B, H), lambda d, k, bs: (d, 0, 0))]
        out_shape = (hall_shape, jax.ShapeDtypeStruct((2, B, H), jnp.float32))

        direction_sem = (pltpu.CORE_PARALLEL if core_parallel else "parallel")
        return pl.pallas_call(
            kernel,
            out_shape=out_shape,
            grid_spec=pltpu.PrefetchScalarGridSpec(
                num_scalar_prefetch=1,                       # batch_sizes->SMEM
                grid=(2, Kt),                                # direction x chunk
                in_specs=in_specs,
                out_specs=out_specs,
                scratch_shapes=[
                    pltpu.VMEM((Tc * B, 4 * H), jnp.float32),  # xg per chunk
                    pltpu.VMEM((B, H), jnp.float32),           # h carry
                    pltpu.VMEM((B, H), jnp.float32),           # c carry
                ]),
            compiler_params=pltpu.CompilerParams(
                dimension_semantics=(direction_sem, "arbitrary"),
                vmem_limit_bytes=_vmem_limit_bytes(Tc, B, Din, H,
                                                   weight_buffers)),
        )(batch_sizes, x_flat, w_ih, w_hh, b)

    try:
        h_all, h_fin = make(1)
    except Exception:
        # Fallback if this JAX build rejects pipeline_mode=pl.Buffered(1).
        h_all, h_fin = make(None)
    return h_all, h_fin, fused


# --------------------------- model forward (glue) ----------------------------

def bilstm_forward(params, text, text_lengths, *, n_layers, hidden_dim,
                   time_chunk=64, core_parallel=DIRECTION_CORE_PARALLEL):
    # Embedding lookup (XLA gather); dropout = identity (eval-mode forward).
    # TODO(synk): training-mode dropout not implemented (eval forward only).
    emb = params["embedding"][text]                       # (B, T, E) f32
    B, T, _ = emb.shape
    lengths = text_lengths.astype(jnp.int32)

    # pack_padded_sequence (enforce_sorted=True) semantics: lengths sorted
    # descending, so the active batch at timestep t is the prefix of size
    # batch_sizes[t] = #{b : lengths[b] > t}.  (T,) int32 -> SMEM prefetch.
    batch_sizes = jnp.sum(
        (jnp.arange(T)[None, :] < lengths[:, None]).astype(jnp.int32), axis=0)

    # time-major flattened activations, bf16 for the MXU (f32 accumulate).
    x = jnp.transpose(emb, (1, 0, 2)).reshape(T * B, -1).astype(jnp.bfloat16)

    h_fwd_fin = h_bwd_fin = None
    for l in range(n_layers):
        p = params["lstm"][l]
        h_all, h_fin, fused = run_bilstm_layer(
            x, batch_sizes, p["w_ih"], p["w_hh"], p["b"], seq_len=T, batch=B,
            hidden_dim=hidden_dim, time_chunk=time_chunk,
            core_parallel=core_parallel)
        # Next-layer input: concat(fwd, bwd) per timestep.  In the fused path
        # the kernel already wrote the lane-disjoint halves of one (T*B, 2H)
        # array, so no XLA concatenate is needed.
        x = h_all if fused else jnp.concatenate([h_all[0], h_all[1]], axis=-1)
        h_fwd_fin, h_bwd_fin = h_fin[0], h_fin[1]

    # hidden = dropout(cat(hidden[-2], hidden[-1])) -> fc   (dropout = identity)
    hidden_cat = jnp.concatenate([h_fwd_fin, h_bwd_fin], axis=-1)  # (B, 2H) f32
    # FC is (B,2H)x(2H,O) with tiny O: plain XLA beats a kernel launch here.
    return hidden_cat @ params["fc_w"] + params["fc_b"]


# ------------------------------ param init -----------------------------------

def init_params(key, vocab_size, embedding_dim, hidden_dim, output_dim,
                n_layers, pad_idx):
    keys = jax.random.split(key, 1 + 4 * n_layers + 2)
    ki = iter(keys)

    emb = jax.random.normal(next(ki), (vocab_size, embedding_dim), jnp.float32)
    emb = emb.at[pad_idx].set(0.0)                        # padding_idx row = 0

    k_lstm = 1.0 / jnp.sqrt(hidden_dim)

    def u(k, shape):
        return jax.random.uniform(k, shape, jnp.float32, -k_lstm, k_lstm)

    lstm_params = []
    for l in range(n_layers):
        d_in = embedding_dim if l == 0 else 2 * hidden_dim
        # direction-stacked weights: [0] = forward, [1] = backward
        w_ih = u(next(ki), (2, d_in, 4 * hidden_dim))            # W_ih^T
        w_hh = u(next(ki), (2, hidden_dim, 4 * hidden_dim))      # W_hh^T
        b = (u(next(ki), (2, 1, 4 * hidden_dim))
             + u(next(ki), (2, 1, 4 * hidden_dim)))              # b_ih + b_hh
        lstm_params.append({
            "w_ih": w_ih.astype(jnp.bfloat16),
            "w_hh": w_hh.astype(jnp.bfloat16),
            "b": b,                                              # f32
        })

    k_fc = 1.0 / jnp.sqrt(2 * hidden_dim)
    fc_w = jax.random.uniform(next(ki), (2 * hidden_dim, output_dim),
                              jnp.float32, -k_fc, k_fc)
    fc_b = jax.random.uniform(next(ki), (1, output_dim), jnp.float32,
                              -k_fc, k_fc)

    return {"embedding": emb, "lstm": lstm_params, "fc_w": fc_w, "fc_b": fc_b}


# ---------------------------------- main --------------------------------------

if __name__ == "__main__":
    # H is a multiple of 128 -> lane-dense gate slices / h stores and the fused
    # (T*B, 2H) output path (the perf-review layout invariant).
    VOCAB, EMB, HID, OUT = 50, 32, 128, 3
    N_LAYERS, PAD_IDX = 2, 0
    B, T = 8, 8

    key = jax.random.PRNGKey(0)
    k_param, k_text = jax.random.split(key)

    params = init_params(k_param, VOCAB, EMB, HID, OUT, N_LAYERS, PAD_IDX)

    # lengths sorted descending (pack_padded_sequence enforce_sorted=True)
    text_lengths = jnp.array([8, 7, 6, 5, 5, 4, 3, 2], dtype=jnp.int32)
    text = jax.random.randint(k_text, (B, T), 1, VOCAB, dtype=jnp.int32)
    pad_mask = jnp.arange(T)[None, :] < text_lengths[:, None]
    text = jnp.where(pad_mask, text, PAD_IDX)

    # time_chunk=4 -> 2 chunks of 4 timesteps: exercises the streamed-chunk
    # pipeline and the reversed chunk order of the backward direction.
    logits = bilstm_forward(params, text, text_lengths,
                            n_layers=N_LAYERS, hidden_dim=HID, time_chunk=4)
    logits = jax.block_until_ready(logits)
    assert logits.shape == (B, OUT)
    assert bool(jnp.all(jnp.isfinite(logits)))
    print("KERNEL_OK")
</pallas_src>

<mosaic_0001>
module attributes {stable_mosaic.version = 11 : i64} {
  func.func @bilstm_layer_kernel(%arg0: i32, %arg1: i32, %arg2: memref<8xi32, #tpu.memory_space<smem>>, %arg3: memref<32x32xbf16, #tpu.memory_space<vmem>>, %arg4: memref<1x32x512xbf16, #tpu.memory_space<vmem>>, %arg5: memref<1x128x512xbf16, #tpu.memory_space<vmem>>, %arg6: memref<1x1x512xf32, #tpu.memory_space<vmem>>, %arg7: memref<32x128xbf16, #tpu.memory_space<vmem>>, %arg8: memref<1x8x128xf32, #tpu.memory_space<vmem>>, %arg9: memref<32x512xf32, #tpu.memory_space<vmem>>, %arg10: memref<8x128xf32, #tpu.memory_space<vmem>>, %arg11: memref<8x128xf32, #tpu.memory_space<vmem>>) attributes {dimension_semantics = [#tpu.dimension_semantics<parallel>, #tpu.dimension_semantics<arbitrary>], iteration_bounds = array<i64: 2, 2>, scalar_prefetch = 1 : i64, scratch_operands = 3 : i64, tpu.core_type = #tpu.core_type<tc>, window_params = [{transform_indices = @transform_0, window_bounds = array<i64: 32, 32>}, {pipeline_mode = #tpu.pipeline_mode<synchronous>, transform_indices = @transform_1, window_bounds = array<i64: 1, 32, 512>}, {pipeline_mode = #tpu.pipeline_mode<synchronous>, transform_indices = @transform_2, window_bounds = array<i64: 1, 128, 512>}, {pipeline_mode = #tpu.pipeline_mode<synchronous>, transform_indices = @transform_3, window_bounds = array<i64: 1, 1, 512>}, {transform_indices = @transform_4, window_bounds = array<i64: 32, 128>}, {transform_indices = @transform_5, window_bounds = array<i64: 1, 8, 128>}]} {
    %c1_i32 = arith.constant 1 : i32
    %0 = arith.muli %arg0, %c1_i32 : i32
    %c2_i32 = arith.constant 2 : i32
    %1 = arith.muli %c2_i32, %arg0 : i32
    %c1_i32_0 = arith.constant 1 : i32
    %2 = arith.subi %c1_i32_0, %1 : i32
    %3 = arith.muli %2, %arg1 : i32
    %4 = arith.addi %0, %3 : i32
    %c4_i32 = arith.constant 4 : i32
    %5 = arith.muli %4, %c4_i32 : i32
    %c0_i32 = arith.constant 0 : i32
    %6 = arith.cmpi eq, %arg1, %c0_i32 : i32
    %7 = arith.extui %6 : i1 to i32
    %c0_i32_1 = arith.constant 0 : i32
    %8 = arith.cmpi ne, %7, %c0_i32_1 : i32
    scf.if %8 {
      %cst_62 = arith.constant 0.000000e+00 : f32
      %239 = vector.broadcast %cst_62 : f32 to vector<8x128xf32>
      %c0_63 = arith.constant 0 : index
      %c0_64 = arith.constant 0 : index
      %240 = vector.load %arg10[%c0_63, %c0_64] : memref<8x128xf32, #tpu.memory_space<vmem>>, vector<8x128xf32>
      tpu.vector_store %arg10[%c0_63, %c0_64], %239 {strides = array<i32>} : memref<8x128xf32, #tpu.memory_space<vmem>>, vector<8x128xf32>,
      %cst_65 = arith.constant 0.000000e+00 : f32
      %241 = vector.broadcast %cst_65 : f32 to vector<8x128xf32>
      %c0_66 = arith.constant 0 : index
      %c0_67 = arith.constant 0 : index
      %242 = vector.load %arg11[%c0_66, %c0_67] : memref<8x128xf32, #tpu.memory_space<vmem>>, vector<8x128xf32>
      tpu.vector_store %arg11[%c0_66, %c0_67], %241 {strides = array<i32>} : memref<8x128xf32, #tpu.memory_space<vmem>>, vector<8x128xf32>,
    } else {
    }
    %c0 = arith.constant 0 : index
    %c0_2 = arith.constant 0 : index
    %9 = vector.load %arg3[%c0, %c0_2] : memref<32x32xbf16, #tpu.memory_space<vmem>>, vector<32x32xbf16>
    %c0_3 = arith.constant 0 : index
    %c0_4 = arith.constant 0 : index
    %c0_5 = arith.constant 0 : index
    %10 = vector.load %arg4[%c0_3, %c0_4, %c0_5] : memref<1x32x512xbf16, #tpu.memory_space<vmem>>, vector<1x32x512xbf16>
    %11 = vector.shape_cast %10 : vector<1x32x512xbf16> to vector<32x512xbf16>
    %cst = arith.constant dense<0.000000e+00> : vector<32x512xf32>
    %12 = tpu.matmul %9, %11, %cst {dimension_numbers = #tpu.dot_dimension_numbers<[1], [0], [0], [1], [0, 0, 1, 1], [], []>} : vector<32x32xbf16>, vector<32x512xbf16>, vector<32x512xf32> -> vector<32x512xf32>
    %c0_6 = arith.constant 0 : index
    %c0_7 = arith.constant 0 : index
    %c0_8 = arith.constant 0 : index
    %13 = vector.load %arg6[%c0_6, %c0_7, %c0_8] : memref<1x1x512xf32, #tpu.memory_space<vmem>>, vector<1x1x512xf32>
    %14 = vector.shape_cast %13 : vector<1x1x512xf32> to vector<1x512xf32>
    %15 = vector.broadcast %14 : vector<1x512xf32> to vector<32x512xf32>
    %16 = arith.addf %12, %15 : vector<32x512xf32>
    %c0_9 = arith.constant 0 : index
    %c0_10 = arith.constant 0 : index
    %17 = vector.load %arg9[%c0_9, %c0_10] : memref<32x512xf32, #tpu.memory_space<vmem>>, vector<32x512xf32>
    tpu.vector_store %arg9[%c0_9, %c0_10], %16 {strides = array<i32>} : memref<32x512xf32, #tpu.memory_space<vmem>>, vector<32x512xf32>,
    %c0_11 = arith.constant 0 : index
    %c0_12 = arith.constant 0 : index
    %c0_13 = arith.constant 0 : index
    %18 = vector.load %arg5[%c0_11, %c0_12, %c0_13] : memref<1x128x512xbf16, #tpu.memory_space<vmem>>, vector<1x128x512xbf16>
    %19 = vector.shape_cast %18 : vector<1x128x512xbf16> to vector<128x512xbf16>
    %20 = tpu.iota {dimensions = array<i32: 0>} : vector<8x1xi32>
    %c3_i32 = arith.constant 3 : i32
    %21 = arith.muli %arg0, %c3_i32 : i32
    %c2_i32_14 = arith.constant 2 : i32
    %22 = arith.muli %c2_i32_14, %arg0 : i32
    %c1_i32_15 = arith.constant 1 : i32
    %23 = arith.subi %c1_i32_15, %22 : i32
    %c0_16 = arith.constant 0 : index
    %c0_17 = arith.constant 0 : index
    %24 = vector.load %arg10[%c0_16, %c0_17] : memref<8x128xf32, #tpu.memory_space<vmem>>, vector<8x128xf32>
    %c0_18 = arith.constant 0 : index
    %c0_19 = arith.constant 0 : index
    %25 = vector.load %arg11[%c0_18, %c0_19] : memref<8x128xf32, #tpu.memory_space<vmem>>, vector<8x128xf32>
    %c0_i32_20 = arith.constant 0 : i32
    %26 = arith.muli %23, %c0_i32_20 : i32
    %27 = arith.addi %21, %26 : i32
    %c8_i32 = arith.constant 8 : i32
    %28 = arith.muli %27, %c8_i32 : i32
    %29 = tpu.assume_multiple %28, 8 : i32
    %30 = arith.index_cast %29 : i32 to index
    %c0_21 = arith.constant 0 : index
    %31 = vector.load %arg9[%30, %c0_21] : memref<32x512xf32, #tpu.memory_space<vmem>>, vector<8x512xf32>
    %32 = arith.truncf %24 : vector<8x128xf32> to vector<8x128xbf16>
    %cst_22 = arith.constant dense<0.000000e+00> : vector<8x512xf32>
    %33 = tpu.matmul %32, %19, %cst_22 {dimension_numbers = #tpu.dot_dimension_numbers<[1], [0], [0], [1], [0, 0, 1, 1], [], []>} : vector<8x128xbf16>, vector<128x512xbf16>, vector<8x512xf32> -> vector<8x512xf32>
    %34 = arith.addf %31, %33 : vector<8x512xf32>
    %35 = vector.extract_strided_slice %34 {offsets = [0, 0], sizes = [8, 128], strides = [1, 1]} : vector<8x512xf32> to vector<8x128xf32>
    %36 = arith.negf %35 : vector<8x128xf32>
    %37 = math.exp %36 : vector<8x128xf32>
    %cst_23 = arith.constant 1.000000e+00 : f32
    %38 = vector.broadcast %cst_23 : f32 to vector<8x128xf32>
    %39 = arith.addf %38, %37 : vector<8x128xf32>
    %40 = arith.divf %38, %39 : vector<8x128xf32>
    %41 = vector.extract_strided_slice %34 {offsets = [0, 128], sizes = [8, 128], strides = [1, 1]} : vector<8x512xf32> to vector<8x128xf32>
    %42 = arith.negf %41 : vector<8x128xf32>
    %43 = math.exp %42 : vector<8x128xf32>
    %cst_24 = arith.constant 1.000000e+00 : f32
    %44 = vector.broadcast %cst_24 : f32 to vector<8x128xf32>
    %45 = arith.addf %44, %43 : vector<8x128xf32>
    %46 = arith.divf %44, %45 : vector<8x128xf32>
    %47 = vector.extract_strided_slice %34 {offsets = [0, 256], sizes = [8, 128], strides = [1, 1]} : vector<8x512xf32> to vector<8x128xf32>
    %48 = math.tanh %47 : vector<8x128xf32>
    %49 = vector.extract_strided_slice %34 {offsets = [0, 384], sizes = [8, 128], strides = [1, 1]} : vector<8x512xf32> to vector<8x128xf32>
    %50 = arith.negf %49 : vector<8x128xf32>
    %51 = math.exp %50 : vector<8x128xf32>
    %cst_25 = arith.constant 1.000000e+00 : f32
    %52 = vector.broadcast %cst_25 : f32 to vector<8x128xf32>
    %53 = arith.addf %52, %51 : vector<8x128xf32>
    %54 = arith.divf %52, %53 : vector<8x128xf32>
    %55 = arith.mulf %46, %25 : vector<8x128xf32>
    %56 = arith.mulf %40, %48 : vector<8x128xf32>
    %57 = arith.addf %55, %56 : vector<8x128xf32>
    %58 = math.tanh %57 : vector<8x128xf32>
    %59 = arith.mulf %54, %58 : vector<8x128xf32>
    %60 = arith.addi %5, %27 : i32
    %61 = arith.index_cast %60 : i32 to index
    %62 = memref.load %arg2[%61] : memref<8xi32, #tpu.memory_space<smem>>
    %63 = vector.broadcast %62 : i32 to vector<8x1xi32>
    %64 = arith.cmpi slt, %20, %63 : vector<8x1xi32>
    %65 = vector.shape_cast %64 : vector<8x1xi1> to vector<8x1xi1>
    %66 = vector.broadcast %65 : vector<8x1xi1> to vector<8x128xi1>
    %67 = arith.select %66, %57, %25 : vector<8x128xi1>, vector<8x128xf32>
    %68 = vector.shape_cast %64 : vector<8x1xi1> to vector<8x1xi1>
    %69 = vector.broadcast %68 : vector<8x1xi1> to vector<8x128xi1>
    %70 = arith.select %69, %59, %24 : vector<8x128xi1>, vector<8x128xf32>
    %cst_26 = arith.constant 0.000000e+00 : f32
    %71 = vector.shape_cast %64 : vector<8x1xi1> to vector<8x1xi1>
    %72 = vector.broadcast %71 : vector<8x1xi1> to vector<8x128xi1>
    %73 = vector.broadcast %cst_26 : f32 to vector<8x128xf32>
    %74 = arith.select %72, %59, %73 : vector<8x128xi1>, vector<8x128xf32>
    %75 = arith.truncf %74 : vector<8x128xf32> to vector<8x128xbf16>
    %76 = arith.index_cast %29 : i32 to index
    %c0_27 = arith.constant 0 : index
    %77 = vector.load %arg7[%76, %c0_27] : memref<32x128xbf16, #tpu.memory_space<vmem>>, vector<8x128xbf16>
    tpu.vector_store %arg7[%76, %c0_27], %75 {strides = array<i32>} : memref<32x128xbf16, #tpu.memory_space<vmem>>, vector<8x128xbf16>,
    %c1_i32_28 = arith.constant 1 : i32
    %78 = arith.muli %23, %c1_i32_28 : i32
    %79 = arith.addi %21, %78 : i32
    %c8_i32_29 = arith.constant 8 : i32
    %80 = arith.muli %79, %c8_i32_29 : i32
    %81 = tpu.assume_multiple %80, 8 : i32
    %82 = arith.index_cast %81 : i32 to index
    %c0_30 = arith.constant 0 : index
    %83 = vector.load %arg9[%82, %c0_30] : memref<32x512xf32, #tpu.memory_space<vmem>>, vector<8x512xf32>
    %84 = arith.truncf %70 : vector<8x128xf32> to vector<8x128xbf16>
    %cst_31 = arith.constant dense<0.000000e+00> : vector<8x512xf32>
    %85 = tpu.matmul %84, %19, %cst_31 {dimension_numbers = #tpu.dot_dimension_numbers<[1], [0], [0], [1], [0, 0, 1, 1], [], []>} : vector<8x128xbf16>, vector<128x512xbf16>, vector<8x512xf32> -> vector<8x512xf32>
    %86 = arith.addf %83, %85 : vector<8x512xf32>
    %87 = vector.extract_strided_slice %86 {offsets = [0, 0], sizes = [8, 128], strides = [1, 1]} : vector<8x512xf32> to vector<8x128xf32>
    %88 = arith.negf %87 : vector<8x128xf32>
    %89 = math.exp %88 : vector<8x128xf32>
    %cst_32 = arith.constant 1.000000e+00 : f32
    %90 = vector.broadcast %cst_32 : f32 to vector<8x128xf32>
    %91 = arith.addf %90, %89 : vector<8x128xf32>
    %92 = arith.divf %90, %91 : vector<8x128xf32>
    %93 = vector.extract_strided_slice %86 {offsets = [0, 128], sizes = [8, 128], strides = [1, 1]} : vector<8x512xf32> to vector<8x128xf32>
    %94 = arith.negf %93 : vector<8x128xf32>
    %95 = math.exp %94 : vector<8x128xf32>
    %cst_33 = arith.constant 1.000000e+00 : f32
    %96 = vector.broadcast %cst_33 : f32 to vector<8x128xf32>
    %97 = arith.addf %96, %95 : vector<8x128xf32>
    %98 = arith.divf %96, %97 : vector<8x128xf32>
    %99 = vector.extract_strided_slice %86 {offsets = [0, 256], sizes = [8, 128], strides = [1, 1]} : vector<8x512xf32> to vector<8x128xf32>
    %100 = math.tanh %99 : vector<8x128xf32>
    %101 = vector.extract_strided_slice %86 {offsets = [0, 384], sizes = [8, 128], strides = [1, 1]} : vector<8x512xf32> to vector<8x128xf32>
    %102 = arith.negf %101 : vector<8x128xf32>
    %103 = math.exp %102 : vector<8x128xf32>
    %cst_34 = arith.constant 1.000000e+00 : f32
    %104 = vector.broadcast %cst_34 : f32 to vector<8x128xf32>
    %105 = arith.addf %104, %103 : vector<8x128xf32>
    %106 = arith.divf %104, %105 : vector<8x128xf32>
    %107 = arith.mulf %98, %67 : vector<8x128xf32>
    %108 = arith.mulf %92, %100 : vector<8x128xf32>
    %109 = arith.addf %107, %108 : vector<8x128xf32>
    %110 = math.tanh %109 : vector<8x128xf32>
    %111 = arith.mulf %106, %110 : vector<8x128xf32>
    %112 = arith.addi %5, %79 : i32
    %113 = arith.index_cast %112 : i32 to index
    %114 = memref.load %arg2[%113] : memref<8xi32, #tpu.memory_space<smem>>
    %115 = vector.broadcast %114 : i32 to vector<8x1xi32>
    %116 = arith.cmpi slt, %20, %115 : vector<8x1xi32>
    %117 = vector.shape_cast %116 : vector<8x1xi1> to vector<8x1xi1>
    %118 = vector.broadcast %117 : vector<8x1xi1> to vector<8x128xi1>
    %119 = arith.select %118, %109, %67 : vector<8x128xi1>, vector<8x128xf32>
    %120 = vector.shape_cast %116 : vector<8x1xi1> to vector<8x1xi1>
    %121 = vector.broadcast %120 : vector<8x1xi1> to vector<8x128xi1>
    %122 = arith.select %121, %111, %70 : vector<8x128xi1>, vector<8x128xf32>
    %cst_35 = arith.constant 0.000000e+00 : f32
    %123 = vector.shape_cast %116 : vector<8x1xi1> to vector<8x1xi1>
    %124 = vector.broadcast %123 : vector<8x1xi1> to vector<8x128xi1>
    %125 = vector.broadcast %cst_35 : f32 to vector<8x128xf32>
    %126 = arith.select %124, %111, %125 : vector<8x128xi1>, vector<8x128xf32>
    %127 = arith.truncf %126 : vector<8x128xf32> to vector<8x128xbf16>
    %128 = arith.index_cast %81 : i32 to index
    %c0_36 = arith.constant 0 : index
    %129 = vector.load %arg7[%128, %c0_36] : memref<32x128xbf16, #tpu.memory_space<vmem>>, vector<8x128xbf16>
    tpu.vector_store %arg7[%128, %c0_36], %127 {strides = array<i32>} : memref<32x128xbf16, #tpu.memory_space<vmem>>, vector<8x128xbf16>,
    %c2_i32_37 = arith.constant 2 : i32
    %130 = arith.muli %23, %c2_i32_37 : i32
    %131 = arith.addi %21, %130 : i32
    %c8_i32_38 = arith.constant 8 : i32
    %132 = arith.muli %131, %c8_i32_38 : i32
    %133 = tpu.assume_multiple %132, 8 : i32
    %134 = arith.index_cast %133 : i32 to index
    %c0_39 = arith.constant 0 : index
    %135 = vector.load %arg9[%134, %c0_39] : memref<32x512xf32, #tpu.memory_space<vmem>>, vector<8x512xf32>
    %136 = arith.truncf %122 : vector<8x128xf32> to vector<8x128xbf16>
    %cst_40 = arith.constant dense<0.000000e+00> : vector<8x512xf32>
    %137 = tpu.matmul %136, %19, %cst_40 {dimension_numbers = #tpu.dot_dimension_numbers<[1], [0], [0], [1], [0, 0, 1, 1], [], []>} : vector<8x128xbf16>, vector<128x512xbf16>, vector<8x512xf32> -> vector<8x512xf32>
    %138 = arith.addf %135, %137 : vector<8x512xf32>
    %139 = vector.extract_strided_slice %138 {offsets = [0, 0], sizes = [8, 128], strides = [1, 1]} : vector<8x512xf32> to vector<8x128xf32>
    %140 = arith.negf %139 : vector<8x128xf32>
    %141 = math.exp %140 : vector<8x128xf32>
    %cst_41 = arith.constant 1.000000e+00 : f32
    %142 = vector.broadcast %cst_41 : f32 to vector<8x128xf32>
    %143 = arith.addf %142, %141 : vector<8x128xf32>
    %144 = arith.divf %142, %143 : vector<8x128xf32>
    %145 = vector.extract_strided_slice %138 {offsets = [0, 128], sizes = [8, 128], strides = [1, 1]} : vector<8x512xf32> to vector<8x128xf32>
    %146 = arith.negf %145 : vector<8x128xf32>
    %147 = math.exp %146 : vector<8x128xf32>
    %cst_42 = arith.constant 1.000000e+00 : f32
    %148 = vector.broadcast %cst_42 : f32 to vector<8x128xf32>
    %149 = arith.addf %148, %147 : vector<8x128xf32>
    %150 = arith.divf %148, %149 : vector<8x128xf32>
    %151 = vector.extract_strided_slice %138 {offsets = [0, 256], sizes = [8, 128], strides = [1, 1]} : vector<8x512xf32> to vector<8x128xf32>
    %152 = math.tanh %151 : vector<8x128xf32>
    %153 = vector.extract_strided_slice %138 {offsets = [0, 384], sizes = [8, 128], strides = [1, 1]} : vector<8x512xf32> to vector<8x128xf32>
    %154 = arith.negf %153 : vector<8x128xf32>
    %155 = math.exp %154 : vector<8x128xf32>
    %cst_43 = arith.constant 1.000000e+00 : f32
    %156 = vector.broadcast %cst_43 : f32 to vector<8x128xf32>
    %157 = arith.addf %156, %155 : vector<8x128xf32>
    %158 = arith.divf %156, %157 : vector<8x128xf32>
    %159 = arith.mulf %150, %119 : vector<8x128xf32>
    %160 = arith.mulf %144, %152 : vector<8x128xf32>
    %161 = arith.addf %159, %160 : vector<8x128xf32>
    %162 = math.tanh %161 : vector<8x128xf32>
    %163 = arith.mulf %158, %162 : vector<8x128xf32>
    %164 = arith.addi %5, %131 : i32
    %165 = arith.index_cast %164 : i32 to index
    %166 = memref.load %arg2[%165] : memref<8xi32, #tpu.memory_space<smem>>
    %167 = vector.broadcast %166 : i32 to vector<8x1xi32>
    %168 = arith.cmpi slt, %20, %167 : vector<8x1xi32>
    %169 = vector.shape_cast %168 : vector<8x1xi1> to vector<8x1xi1>
    %170 = vector.broadcast %169 : vector<8x1xi1> to vector<8x128xi1>
    %171 = arith.select %170, %161, %119 : vector<8x128xi1>, vector<8x128xf32>
    %172 = vector.shape_cast %168 : vector<8x1xi1> to vector<8x1xi1>
    %173 = vector.broadcast %172 : vector<8x1xi1> to vector<8x128xi1>
    %174 = arith.select %173, %163, %122 : vector<8x128xi1>, vector<8x128xf32>
    %cst_44 = arith.constant 0.000000e+00 : f32
    %175 = vector.shape_cast %168 : vector<8x1xi1> to vector<8x1xi1>
    %176 = vector.broadcast %175 : vector<8x1xi1> to vector<8x128xi1>
    %177 = vector.broadcast %cst_44 : f32 to vector<8x128xf32>
    %178 = arith.select %176, %163, %177 : vector<8x128xi1>, vector<8x128xf32>
    %179 = arith.truncf %178 : vector<8x128xf32> to vector<8x128xbf16>
    %180 = arith.index_cast %133 : i32 to index
    %c0_45 = arith.constant 0 : index
    %181 = vector.load %arg7[%180, %c0_45] : memref<32x128xbf16, #tpu.memory_space<vmem>>, vector<8x128xbf16>
    tpu.vector_store %arg7[%180, %c0_45], %179 {strides = array<i32>} : memref<32x128xbf16, #tpu.memory_space<vmem>>, vector<8x128xbf16>,
    %c3_i32_46 = arith.constant 3 : i32
    %182 = arith.muli %23, %c3_i32_46 : i32
    %183 = arith.addi %21, %182 : i32
    %c8_i32_47 = arith.constant 8 : i32
    %184 = arith.muli %183, %c8_i32_47 : i32
    %185 = tpu.assume_multiple %184, 8 : i32
    %186 = arith.index_cast %185 : i32 to index
    %c0_48 = arith.constant 0 : index
    %187 = vector.load %arg9[%186, %c0_48] : memref<32x512xf32, #tpu.memory_space<vmem>>, vector<8x512xf32>
    %188 = arith.truncf %174 : vector<8x128xf32> to vector<8x128xbf16>
    %cst_49 = arith.constant dense<0.000000e+00> : vector<8x512xf32>
    %189 = tpu.matmul %188, %19, %cst_49 {dimension_numbers = #tpu.dot_dimension_numbers<[1], [0], [0], [1], [0, 0, 1, 1], [], []>} : vector<8x128xbf16>, vector<128x512xbf16>, vector<8x512xf32> -> vector<8x512xf32>
    %190 = arith.addf %187, %189 : vector<8x512xf32>
    %191 = vector.extract_strided_slice %190 {offsets = [0, 0], sizes = [8, 128], strides = [1, 1]} : vector<8x512xf32> to vector<8x128xf32>
    %192 = arith.negf %191 : vector<8x128xf32>
    %193 = math.exp %192 : vector<8x128xf32>
    %cst_50 = arith.constant 1.000000e+00 : f32
    %194 = vector.broadcast %cst_50 : f32 to vector<8x128xf32>
    %195 = arith.addf %194, %193 : vector<8x128xf32>
    %196 = arith.divf %194, %195 : vector<8x128xf32>
    %197 = vector.extract_strided_slice %190 {offsets = [0, 128], sizes = [8, 128], strides = [1, 1]} : vector<8x512xf32> to vector<8x128xf32>
    %198 = arith.negf %197 : vector<8x128xf32>
    %199 = math.exp %198 : vector<8x128xf32>
    %cst_51 = arith.constant 1.000000e+00 : f32
    %200 = vector.broadcast %cst_51 : f32 to vector<8x128xf32>
    %201 = arith.addf %200, %199 : vector<8x128xf32>
    %202 = arith.divf %200, %201 : vector<8x128xf32>
    %203 = vector.extract_strided_slice %190 {offsets = [0, 256], sizes = [8, 128], strides = [1, 1]} : vector<8x512xf32> to vector<8x128xf32>
    %204 = math.tanh %203 : vector<8x128xf32>
    %205 = vector.extract_strided_slice %190 {offsets = [0, 384], sizes = [8, 128], strides = [1, 1]} : vector<8x512xf32> to vector<8x128xf32>
    %206 = arith.negf %205 : vector<8x128xf32>
    %207 = math.exp %206 : vector<8x128xf32>
    %cst_52 = arith.constant 1.000000e+00 : f32
    %208 = vector.broadcast %cst_52 : f32 to vector<8x128xf32>
    %209 = arith.addf %208, %207 : vector<8x128xf32>
    %210 = arith.divf %208, %209 : vector<8x128xf32>
    %211 = arith.mulf %202, %171 : vector<8x128xf32>
    %212 = arith.mulf %196, %204 : vector<8x128xf32>
    %213 = arith.addf %211, %212 : vector<8x128xf32>
    %214 = math.tanh %213 : vector<8x128xf32>
    %215 = arith.mulf %210, %214 : vector<8x128xf32>
    %216 = arith.addi %5, %183 : i32
    %217 = arith.index_cast %216 : i32 to index
    %218 = memref.load %arg2[%217] : memref<8xi32, #tpu.memory_space<smem>>
    %219 = vector.broadcast %218 : i32 to vector<8x1xi32>
    %220 = arith.cmpi slt, %20, %219 : vector<8x1xi32>
    %221 = vector.shape_cast %220 : vector<8x1xi1> to vector<8x1xi1>
    %222 = vector.broadcast %221 : vector<8x1xi1> to vector<8x128xi1>
    %223 = arith.select %222, %213, %171 : vector<8x128xi1>, vector<8x128xf32>
    %224 = vector.shape_cast %220 : vector<8x1xi1> to vector<8x1xi1>
    %225 = vector.broadcast %224 : vector<8x1xi1> to vector<8x128xi1>
    %226 = arith.select %225, %215, %174 : vector<8x128xi1>, vector<8x128xf32>
    %cst_53 = arith.constant 0.000000e+00 : f32
    %227 = vector.shape_cast %220 : vector<8x1xi1> to vector<8x1xi1>
    %228 = vector.broadcast %227 : vector<8x1xi1> to vector<8x128xi1>
    %229 = vector.broadcast %cst_53 : f32 to vector<8x128xf32>
    %230 = arith.select %228, %215, %229 : vector<8x128xi1>, vector<8x128xf32>
    %231 = arith.truncf %230 : vector<8x128xf32> to vector<8x128xbf16>
    %232 = arith.index_cast %185 : i32 to index
    %c0_54 = arith.constant 0 : index
    %233 = vector.load %arg7[%232, %c0_54] : memref<32x128xbf16, #tpu.memory_space<vmem>>, vector<8x128xbf16>
    tpu.vector_store %arg7[%232, %c0_54], %231 {strides = array<i32>} : memref<32x128xbf16, #tpu.memory_space<vmem>>, vector<8x128xbf16>,
    %c4_i32_55 = arith.constant 4 : i32
    %c0_56 = arith.constant 0 : index
    %c0_57 = arith.constant 0 : index
    %234 = vector.load %arg10[%c0_56, %c0_57] : memref<8x128xf32, #tpu.memory_space<vmem>>, vector<8x128xf32>
    tpu.vector_store %arg10[%c0_56, %c0_57], %226 {strides = array<i32>} : memref<8x128xf32, #tpu.memory_space<vmem>>, vector<8x128xf32>,
    %c0_58 = arith.constant 0 : index
    %c0_59 = arith.constant 0 : index
    %235 = vector.load %arg11[%c0_58, %c0_59] : memref<8x128xf32, #tpu.memory_space<vmem>>, vector<8x128xf32>
    tpu.vector_store %arg11[%c0_58, %c0_59], %223 {strides = array<i32>} : memref<8x128xf32, #tpu.memory_space<vmem>>, vector<8x128xf32>,
    %c1_i32_60 = arith.constant 1 : i32
    %236 = arith.cmpi eq, %arg1, %c1_i32_60 : i32
    %237 = arith.extui %236 : i1 to i32
    %c0_i32_61 = arith.constant 0 : i32
    %238 = arith.cmpi ne, %237, %c0_i32_61 : i32
    scf.if %238 {
      %c0_62 = arith.constant 0 : index
      %c0_63 = arith.constant 0 : index
      %c0_64 = arith.constant 0 : index
      %239 = vector.load %arg8[%c0_62, %c0_63, %c0_64] : memref<1x8x128xf32, #tpu.memory_space<vmem>>, vector<1x8x128xf32>
      %240 = vector.shape_cast %239 : vector<1x8x128xf32> to vector<8x128xf32>
      %241 = vector.shape_cast %226 : vector<8x128xf32> to vector<1x8x128xf32>
      tpu.vector_store %arg8[%c0_62, %c0_63, %c0_64], %241 {strides = array<i32>} : memref<1x8x128xf32, #tpu.memory_space<vmem>>, vector<1x8x128xf32>,
    } else {
    }
    return
  }
  func.func @transform_0(%arg0: i32, %arg1: i32, %arg2: memref<8xi32, #tpu.memory_space<smem>>) -> (i32, i32) {
    %c1_i32 = arith.constant 1 : i32
    %0 = arith.muli %arg0, %c1_i32 : i32
    %c2_i32 = arith.constant 2 : i32
    %1 = arith.muli %c2_i32, %arg0 : i32
    %c1_i32_0 = arith.constant 1 : i32
    %2 = arith.subi %c1_i32_0, %1 : i32
    %3 = arith.muli %2, %arg1 : i32
    %4 = arith.addi %0, %3 : i32
    %c0_i32 = arith.constant 0 : i32
    %c0_i32_1 = arith.constant 0 : i32
    return %4, %c0_i32 : i32, i32
  }
  func.func @transform_1(%arg0: i32, %arg1: i32, %arg2: memref<8xi32, #tpu.memory_space<smem>>) -> (i32, i32, i32) {
    %c0_i32 = arith.constant 0 : i32
    %c0_i32_0 = arith.constant 0 : i32
    %c0_i32_1 = arith.constant 0 : i32
    return %arg0, %c0_i32, %c0_i32_0 : i32, i32, i32
  }
  func.func @transform_2(%arg0: i32, %arg1: i32, %arg2: memref<8xi32, #tpu.memory_space<smem>>) -> (i32, i32, i32) {
    %c0_i32 = arith.constant 0 : i32
    %c0_i32_0 = arith.constant 0 : i32
    %c0_i32_1 = arith.constant 0 : i32
    return %arg0, %c0_i32, %c0_i32_0 : i32, i32, i32
  }
  func.func @transform_3(%arg0: i32, %arg1: i32, %arg2: memref<8xi32, #tpu.memory_space<smem>>) -> (i32, i32, i32) {
    %c0_i32 = arith.constant 0 : i32
    %c0_i32_0 = arith.constant 0 : i32
    %c0_i32_1 = arith.constant 0 : i32
    return %arg0, %c0_i32, %c0_i32_0 : i32, i32, i32
  }
  func.func @transform_4(%arg0: i32, %arg1: i32, %arg2: memref<8xi32, #tpu.memory_space<smem>>) -> (i32, i32) {
    %c1_i32 = arith.constant 1 : i32
    %0 = arith.muli %arg0, %c1_i32 : i32
    %c2_i32 = arith.constant 2 : i32
    %1 = arith.muli %c2_i32, %arg0 : i32
    %c1_i32_0 = arith.constant 1 : i32
    %2 = arith.subi %c1_i32_0, %1 : i32
    %3 = arith.muli %2, %arg1 : i32
    %4 = arith.addi %0, %3 : i32
    %c0_i32 = arith.constant 0 : i32
    return %4, %arg0 : i32, i32
  }
  func.func @transform_5(%arg0: i32, %arg1: i32, %arg2: memref<8xi32, #tpu.memory_space<smem>>) -> (i32, i32, i32) {
    %c0_i32 = arith.constant 0 : i32
    %c0_i32_0 = arith.constant 0 : i32
    %c0_i32_1 = arith.constant 0 : i32
    return %arg0, %c0_i32, %c0_i32_0 : i32, i32, i32
  }
}

module attributes {stable_mosaic.version = 11 : i64} {
  func.func @bilstm_layer_kernel(%arg0: i32, %arg1: i32, %arg2: memref<8xi32, #tpu.memory_space<smem>>, %arg3: memref<32x32xbf16, #tpu.memory_space<vmem>>, %arg4: memref<1x32x512xbf16, #tpu.memory_space<vmem>>, %arg5: memref<1x128x512xbf16, #tpu.memory_space<vmem>>, %arg6: memref<1x1x512xf32, #tpu.memory_space<vmem>>, %arg7: memref<32x128xbf16, #tpu.memory_space<vmem>>, %arg8: memref<1x8x128xf32, #tpu.memory_space<vmem>>, %arg9: memref<32x512xf32, #tpu.memory_space<vmem>>, %arg10: memref<8x128xf32, #tpu.memory_space<vmem>>, %arg11: memref<8x128xf32, #tpu.memory_space<vmem>>) attributes {dimension_semantics = [#tpu.dimension_semantics<parallel>, #tpu.dimension_semantics<arbitrary>], iteration_bounds = array<i64: 2, 2>, scalar_prefetch = 1 : i64, scratch_operands = 3 : i64, tpu.core_type = #tpu.core_type<tc>, window_params = [{transform_indices = @transform_0, window_bounds = array<i64: 32, 32>}, {transform_indices = @transform_1, window_bounds = array<i64: 1, 32, 512>}, {transform_indices = @transform_2, window_bounds = array<i64: 1, 128, 512>}, {transform_indices = @transform_3, window_bounds = array<i64: 1, 1, 512>}, {transform_indices = @transform_4, window_bounds = array<i64: 32, 128>}, {transform_indices = @transform_5, window_bounds = array<i64: 1, 8, 128>}]} {
    %c1_i32 = arith.constant 1 : i32
    %0 = arith.muli %arg0, %c1_i32 : i32
    %c2_i32 = arith.constant 2 : i32
    %1 = arith.muli %c2_i32, %arg0 : i32
    %c1_i32_0 = arith.constant 1 : i32
    %2 = arith.subi %c1_i32_0, %1 : i32
    %3 = arith.muli %2, %arg1 : i32
    %4 = arith.addi %0, %3 : i32
    %c4_i32 = arith.constant 4 : i32
    %5 = arith.muli %4, %c4_i32 : i32
    %c0_i32 = arith.constant 0 : i32
    %6 = arith.cmpi eq, %arg1, %c0_i32 : i32
    %7 = arith.extui %6 : i1 to i32
    %c0_i32_1 = arith.constant 0 : i32
    %8 = arith.cmpi ne, %7, %c0_i32_1 : i32
    scf.if %8 {
      %cst_62 = arith.constant 0.000000e+00 : f32
      %239 = vector.broadcast %cst_62 : f32 to vector<8x128xf32>
      %c0_63 = arith.constant 0 : index
      %c0_64 = arith.constant 0 : index
      %240 = vector.load %arg10[%c0_63, %c0_64] : memref<8x128xf32, #tpu.memory_space<vmem>>, vector<8x128xf32>
      tpu.vector_store %arg10[%c0_63, %c0_64], %239 {strides = array<i32>} : memref<8x128xf32, #tpu.memory_space<vmem>>, vector<8x128xf32>,
      %cst_65 = arith.constant 0.000000e+00 : f32
      %241 = vector.broadcast %cst_65 : f32 to vector<8x128xf32>
      %c0_66 = arith.constant 0 : index
      %c0_67 = arith.constant 0 : index
      %242 = vector.load %arg11[%c0_66, %c0_67] : memref<8x128xf32, #tpu.memory_space<vmem>>, vector<8x128xf32>
      tpu.vector_store %arg11[%c0_66, %c0_67], %241 {strides = array<i32>} : memref<8x128xf32, #tpu.memory_space<vmem>>, vector<8x128xf32>,
    } else {
    }
    %c0 = arith.constant 0 : index
    %c0_2 = arith.constant 0 : index
    %9 = vector.load %arg3[%c0, %c0_2] : memref<32x32xbf16, #tpu.memory_space<vmem>>, vector<32x32xbf16>
    %c0_3 = arith.constant 0 : index
    %c0_4 = arith.constant 0 : index
    %c0_5 = arith.constant 0 : index
    %10 = vector.load %arg4[%c0_3, %c0_4, %c0_5] : memref<1x32x512xbf16, #tpu.memory_space<vmem>>, vector<1x32x512xbf16>
    %11 = vector.shape_cast %10 : vector<1x32x512xbf16> to vector<32x512xbf16>
    %cst = arith.constant dense<0.000000e+00> : vector<32x512xf32>
    %12 = tpu.matmul %9, %11, %cst {dimension_numbers = #tpu.dot_dimension_numbers<[1], [0], [0], [1], [0, 0, 1, 1], [], []>} : vector<32x32xbf16>, vector<32x512xbf16>, vector<32x512xf32> -> vector<32x512xf32>
    %c0_6 = arith.constant 0 : index
    %c0_7 = arith.constant 0 : index
    %c0_8 = arith.constant 0 : index
    %13 = vector.load %arg6[%c0_6, %c0_7, %c0_8] : memref<1x1x512xf32, #tpu.memory_space<vmem>>, vector<1x1x512xf32>
    %14 = vector.shape_cast %13 : vector<1x1x512xf32> to vector<1x512xf32>
    %15 = vector.broadcast %14 : vector<1x512xf32> to vector<32x512xf32>
    %16 = arith.addf %12, %15 : vector<32x512xf32>
    %c0_9 = arith.constant 0 : index
    %c0_10 = arith.constant 0 : index
    %17 = vector.load %arg9[%c0_9, %c0_10] : memref<32x512xf32, #tpu.memory_space<vmem>>, vector<32x512xf32>
    tpu.vector_store %arg9[%c0_9, %c0_10], %16 {strides = array<i32>} : memref<32x512xf32, #tpu.memory_space<vmem>>, vector<32x512xf32>,
    %c0_11 = arith.constant 0 : index
    %c0_12 = arith.constant 0 : index
    %c0_13 = arith.constant 0 : index
    %18 = vector.load %arg5[%c0_11, %c0_12, %c0_13] : memref<1x128x512xbf16, #tpu.memory_space<vmem>>, vector<1x128x512xbf16>
    %19 = vector.shape_cast %18 : vector<1x128x512xbf16> to vector<128x512xbf16>
    %20 = tpu.iota {dimensions = array<i32: 0>} : vector<8x1xi32>
    %c3_i32 = arith.constant 3 : i32
    %21 = arith.muli %arg0, %c3_i32 : i32
    %c2_i32_14 = arith.constant 2 : i32
    %22 = arith.muli %c2_i32_14, %arg0 : i32
    %c1_i32_15 = arith.constant 1 : i32
    %23 = arith.subi %c1_i32_15, %22 : i32
    %c0_16 = arith.constant 0 : index
    %c0_17 = arith.constant 0 : index
    %24 = vector.load %arg10[%c0_16, %c0_17] : memref<8x128xf32, #tpu.memory_space<vmem>>, vector<8x128xf32>
    %c0_18 = arith.constant 0 : index
    %c0_19 = arith.constant 0 : index
    %25 = vector.load %arg11[%c0_18, %c0_19] : memref<8x128xf32, #tpu.memory_space<vmem>>, vector<8x128xf32>
    %c0_i32_20 = arith.constant 0 : i32
    %26 = arith.muli %23, %c0_i32_20 : i32
    %27 = arith.addi %21, %26 : i32
    %c8_i32 = arith.constant 8 : i32
    %28 = arith.muli %27, %c8_i32 : i32
    %29 = tpu.assume_multiple %28, 8 : i32
    %30 = arith.index_cast %29 : i32 to index
    %c0_21 = arith.constant 0 : index
    %31 = vector.load %arg9[%30, %c0_21] : memref<32x512xf32, #tpu.memory_space<vmem>>, vector<8x512xf32>
    %32 = arith.truncf %24 : vector<8x128xf32> to vector<8x128xbf16>
    %cst_22 = arith.constant dense<0.000000e+00> : vector<8x512xf32>
    %33 = tpu.matmul %32, %19, %cst_22 {dimension_numbers = #tpu.dot_dimension_numbers<[1], [0], [0], [1], [0, 0, 1, 1], [], []>} : vector<8x128xbf16>, vector<128x512xbf16>, vector<8x512xf32> -> vector<8x512xf32>
    %34 = arith.addf %31, %33 : vector<8x512xf32>
    %35 = vector.extract_strided_slice %34 {offsets = [0, 0], sizes = [8, 128], strides = [1, 1]} : vector<8x512xf32> to vector<8x128xf32>
    %36 = arith.negf %35 : vector<8x128xf32>
    %37 = math.exp %36 : vector<8x128xf32>
    %cst_23 = arith.constant 1.000000e+00 : f32
    %38 = vector.broadcast %cst_23 : f32 to vector<8x128xf32>
    %39 = arith.addf %38, %37 : vector<8x128xf32>
    %40 = arith.divf %38, %39 : vector<8x128xf32>
    %41 = vector.extract_strided_slice %34 {offsets = [0, 128], sizes = [8, 128], strides = [1, 1]} : vector<8x512xf32> to vector<8x128xf32>
    %42 = arith.negf %41 : vector<8x128xf32>
    %43 = math.exp %42 : vector<8x128xf32>
    %cst_24 = arith.constant 1.000000e+00 : f32
    %44 = vector.broadcast %cst_24 : f32 to vector<8x128xf32>
    %45 = arith.addf %44, %43 : vector<8x128xf32>
    %46 = arith.divf %44, %45 : vector<8x128xf32>
    %47 = vector.extract_strided_slice %34 {offsets = [0, 256], sizes = [8, 128], strides = [1, 1]} : vector<8x512xf32> to vector<8x128xf32>
    %48 = math.tanh %47 : vector<8x128xf32>
    %49 = vector.extract_strided_slice %34 {offsets = [0, 384], sizes = [8, 128], strides = [1, 1]} : vector<8x512xf32> to vector<8x128xf32>
    %50 = arith.negf %49 : vector<8x128xf32>
    %51 = math.exp %50 : vector<8x128xf32>
    %cst_25 = arith.constant 1.000000e+00 : f32
    %52 = vector.broadcast %cst_25 : f32 to vector<8x128xf32>
    %53 = arith.addf %52, %51 : vector<8x128xf32>
    %54 = arith.divf %52, %53 : vector<8x128xf32>
    %55 = arith.mulf %46, %25 : vector<8x128xf32>
    %56 = arith.mulf %40, %48 : vector<8x128xf32>
    %57 = arith.addf %55, %56 : vector<8x128xf32>
    %58 = math.tanh %57 : vector<8x128xf32>
    %59 = arith.mulf %54, %58 : vector<8x128xf32>
    %60 = arith.addi %5, %27 : i32
    %61 = arith.index_cast %60 : i32 to index
    %62 = memref.load %arg2[%61] : memref<8xi32, #tpu.memory_space<smem>>
    %63 = vector.broadcast %62 : i32 to vector<8x1xi32>
    %64 = arith.cmpi slt, %20, %63 : vector<8x1xi32>
    %65 = vector.shape_cast %64 : vector<8x1xi1> to vector<8x1xi1>
    %66 = vector.broadcast %65 : vector<8x1xi1> to vector<8x128xi1>
    %67 = arith.select %66, %57, %25 : vector<8x128xi1>, vector<8x128xf32>
    %68 = vector.shape_cast %64 : vector<8x1xi1> to vector<8x1xi1>
    %69 = vector.broadcast %68 : vector<8x1xi1> to vector<8x128xi1>
    %70 = arith.select %69, %59, %24 : vector<8x128xi1>, vector<8x128xf32>
    %cst_26 = arith.constant 0.000000e+00 : f32
    %71 = vector.shape_cast %64 : vector<8x1xi1> to vector<8x1xi1>
    %72 = vector.broadcast %71 : vector<8x1xi1> to vector<8x128xi1>
    %73 = vector.broadcast %cst_26 : f32 to vector<8x128xf32>
    %74 = arith.select %72, %59, %73 : vector<8x128xi1>, vector<8x128xf32>
    %75 = arith.truncf %74 : vector<8x128xf32> to vector<8x128xbf16>
    %76 = arith.index_cast %29 : i32 to index
    %c0_27 = arith.constant 0 : index
    %77 = vector.load %arg7[%76, %c0_27] : memref<32x128xbf16, #tpu.memory_space<vmem>>, vector<8x128xbf16>
    tpu.vector_store %arg7[%76, %c0_27], %75 {strides = array<i32>} : memref<32x128xbf16, #tpu.memory_space<vmem>>, vector<8x128xbf16>,
    %c1_i32_28 = arith.constant 1 : i32
    %78 = arith.muli %23, %c1_i32_28 : i32
    %79 = arith.addi %21, %78 : i32
    %c8_i32_29 = arith.constant 8 : i32
    %80 = arith.muli %79, %c8_i32_29 : i32
    %81 = tpu.assume_multiple %80, 8 : i32
    %82 = arith.index_cast %81 : i32 to index
    %c0_30 = arith.constant 0 : index
    %83 = vector.load %arg9[%82, %c0_30] : memref<32x512xf32, #tpu.memory_space<vmem>>, vector<8x512xf32>
    %84 = arith.truncf %70 : vector<8x128xf32> to vector<8x128xbf16>
    %cst_31 = arith.constant dense<0.000000e+00> : vector<8x512xf32>
    %85 = tpu.matmul %84, %19, %cst_31 {dimension_numbers = #tpu.dot_dimension_numbers<[1], [0], [0], [1], [0, 0, 1, 1], [], []>} : vector<8x128xbf16>, vector<128x512xbf16>, vector<8x512xf32> -> vector<8x512xf32>
    %86 = arith.addf %83, %85 : vector<8x512xf32>
    %87 = vector.extract_strided_slice %86 {offsets = [0, 0], sizes = [8, 128], strides = [1, 1]} : vector<8x512xf32> to vector<8x128xf32>
    %88 = arith.negf %87 : vector<8x128xf32>
    %89 = math.exp %88 : vector<8x128xf32>
    %cst_32 = arith.constant 1.000000e+00 : f32
    %90 = vector.broadcast %cst_32 : f32 to vector<8x128xf32>
    %91 = arith.addf %90, %89 : vector<8x128xf32>
    %92 = arith.divf %90, %91 : vector<8x128xf32>
    %93 = vector.extract_strided_slice %86 {offsets = [0, 128], sizes = [8, 128], strides = [1, 1]} : vector<8x512xf32> to vector<8x128xf32>
    %94 = arith.negf %93 : vector<8x128xf32>
    %95 = math.exp %94 : vector<8x128xf32>
    %cst_33 = arith.constant 1.000000e+00 : f32
    %96 = vector.broadcast %cst_33 : f32 to vector<8x128xf32>
    %97 = arith.addf %96, %95 : vector<8x128xf32>
    %98 = arith.divf %96, %97 : vector<8x128xf32>
    %99 = vector.extract_strided_slice %86 {offsets = [0, 256], sizes = [8, 128], strides = [1, 1]} : vector<8x512xf32> to vector<8x128xf32>
    %100 = math.tanh %99 : vector<8x128xf32>
    %101 = vector.extract_strided_slice %86 {offsets = [0, 384], sizes = [8, 128], strides = [1, 1]} : vector<8x512xf32> to vector<8x128xf32>
    %102 = arith.negf %101 : vector<8x128xf32>
    %103 = math.exp %102 : vector<8x128xf32>
    %cst_34 = arith.constant 1.000000e+00 : f32
    %104 = vector.broadcast %cst_34 : f32 to vector<8x128xf32>
    %105 = arith.addf %104, %103 : vector<8x128xf32>
    %106 = arith.divf %104, %105 : vector<8x128xf32>
    %107 = arith.mulf %98, %67 : vector<8x128xf32>
    %108 = arith.mulf %92, %100 : vector<8x128xf32>
    %109 = arith.addf %107, %108 : vector<8x128xf32>
    %110 = math.tanh %109 : vector<8x128xf32>
    %111 = arith.mulf %106, %110 : vector<8x128xf32>
    %112 = arith.addi %5, %79 : i32
    %113 = arith.index_cast %112 : i32 to index
    %114 = memref.load %arg2[%113] : memref<8xi32, #tpu.memory_space<smem>>
    %115 = vector.broadcast %114 : i32 to vector<8x1xi32>
    %116 = arith.cmpi slt, %20, %115 : vector<8x1xi32>
    %117 = vector.shape_cast %116 : vector<8x1xi1> to vector<8x1xi1>
    %118 = vector.broadcast %117 : vector<8x1xi1> to vector<8x128xi1>
    %119 = arith.select %118, %109, %67 : vector<8x128xi1>, vector<8x128xf32>
    %120 = vector.shape_cast %116 : vector<8x1xi1> to vector<8x1xi1>
    %121 = vector.broadcast %120 : vector<8x1xi1> to vector<8x128xi1>
    %122 = arith.select %121, %111, %70 : vector<8x128xi1>, vector<8x128xf32>
    %cst_35 = arith.constant 0.000000e+00 : f32
    %123 = vector.shape_cast %116 : vector<8x1xi1> to vector<8x1xi1>
    %124 = vector.broadcast %123 : vector<8x1xi1> to vector<8x128xi1>
    %125 = vector.broadcast %cst_35 : f32 to vector<8x128xf32>
    %126 = arith.select %124, %111, %125 : vector<8x128xi1>, vector<8x128xf32>
    %127 = arith.truncf %126 : vector<8x128xf32> to vector<8x128xbf16>
    %128 = arith.index_cast %81 : i32 to index
    %c0_36 = arith.constant 0 : index
    %129 = vector.load %arg7[%128, %c0_36] : memref<32x128xbf16, #tpu.memory_space<vmem>>, vector<8x128xbf16>
    tpu.vector_store %arg7[%128, %c0_36], %127 {strides = array<i32>} : memref<32x128xbf16, #tpu.memory_space<vmem>>, vector<8x128xbf16>,
    %c2_i32_37 = arith.constant 2 : i32
    %130 = arith.muli %23, %c2_i32_37 : i32
    %131 = arith.addi %21, %130 : i32
    %c8_i32_38 = arith.constant 8 : i32
    %132 = arith.muli %131, %c8_i32_38 : i32
    %133 = tpu.assume_multiple %132, 8 : i32
    %134 = arith.index_cast %133 : i32 to index
    %c0_39 = arith.constant 0 : index
    %135 = vector.load %arg9[%134, %c0_39] : memref<32x512xf32, #tpu.memory_space<vmem>>, vector<8x512xf32>
    %136 = arith.truncf %122 : vector<8x128xf32> to vector<8x128xbf16>
    %cst_40 = arith.constant dense<0.000000e+00> : vector<8x512xf32>
    %137 = tpu.matmul %136, %19, %cst_40 {dimension_numbers = #tpu.dot_dimension_numbers<[1], [0], [0], [1], [0, 0, 1, 1], [], []>} : vector<8x128xbf16>, vector<128x512xbf16>, vector<8x512xf32> -> vector<8x512xf32>
    %138 = arith.addf %135, %137 : vector<8x512xf32>
    %139 = vector.extract_strided_slice %138 {offsets = [0, 0], sizes = [8, 128], strides = [1, 1]} : vector<8x512xf32> to vector<8x128xf32>
    %140 = arith.negf %139 : vector<8x128xf32>
    %141 = math.exp %140 : vector<8x128xf32>
    %cst_41 = arith.constant 1.000000e+00 : f32
    %142 = vector.broadcast %cst_41 : f32 to vector<8x128xf32>
    %143 = arith.addf %142, %141 : vector<8x128xf32>
    %144 = arith.divf %142, %143 : vector<8x128xf32>
    %145 = vector.extract_strided_slice %138 {offsets = [0, 128], sizes = [8, 128], strides = [1, 1]} : vector<8x512xf32> to vector<8x128xf32>
    %146 = arith.negf %145 : vector<8x128xf32>
    %147 = math.exp %146 : vector<8x128xf32>
    %cst_42 = arith.constant 1.000000e+00 : f32
    %148 = vector.broadcast %cst_42 : f32 to vector<8x128xf32>
    %149 = arith.addf %148, %147 : vector<8x128xf32>
    %150 = arith.divf %148, %149 : vector<8x128xf32>
    %151 = vector.extract_strided_slice %138 {offsets = [0, 256], sizes = [8, 128], strides = [1, 1]} : vector<8x512xf32> to vector<8x128xf32>
    %152 = math.tanh %151 : vector<8x128xf32>
    %153 = vector.extract_strided_slice %138 {offsets = [0, 384], sizes = [8, 128], strides = [1, 1]} : vector<8x512xf32> to vector<8x128xf32>
    %154 = arith.negf %153 : vector<8x128xf32>
    %155 = math.exp %154 : vector<8x128xf32>
    %cst_43 = arith.constant 1.000000e+00 : f32
    %156 = vector.broadcast %cst_43 : f32 to vector<8x128xf32>
    %157 = arith.addf %156, %155 : vector<8x128xf32>
    %158 = arith.divf %156, %157 : vector<8x128xf32>
    %159 = arith.mulf %150, %119 : vector<8x128xf32>
    %160 = arith.mulf %144, %152 : vector<8x128xf32>
    %161 = arith.addf %159, %160 : vector<8x128xf32>
    %162 = math.tanh %161 : vector<8x128xf32>
    %163 = arith.mulf %158, %162 : vector<8x128xf32>
    %164 = arith.addi %5, %131 : i32
    %165 = arith.index_cast %164 : i32 to index
    %166 = memref.load %arg2[%165] : memref<8xi32, #tpu.memory_space<smem>>
    %167 = vector.broadcast %166 : i32 to vector<8x1xi32>
    %168 = arith.cmpi slt, %20, %167 : vector<8x1xi32>
    %169 = vector.shape_cast %168 : vector<8x1xi1> to vector<8x1xi1>
    %170 = vector.broadcast %169 : vector<8x1xi1> to vector<8x128xi1>
    %171 = arith.select %170, %161, %119 : vector<8x128xi1>, vector<8x128xf32>
    %172 = vector.shape_cast %168 : vector<8x1xi1> to vector<8x1xi1>
    %173 = vector.broadcast %172 : vector<8x1xi1> to vector<8x128xi1>
    %174 = arith.select %173, %163, %122 : vector<8x128xi1>, vector<8x128xf32>
    %cst_44 = arith.constant 0.000000e+00 : f32
    %175 = vector.shape_cast %168 : vector<8x1xi1> to vector<8x1xi1>
    %176 = vector.broadcast %175 : vector<8x1xi1> to vector<8x128xi1>
    %177 = vector.broadcast %cst_44 : f32 to vector<8x128xf32>
    %178 = arith.select %176, %163, %177 : vector<8x128xi1>, vector<8x128xf32>
    %179 = arith.truncf %178 : vector<8x128xf32> to vector<8x128xbf16>
    %180 = arith.index_cast %133 : i32 to index
    %c0_45 = arith.constant 0 : index
    %181 = vector.load %arg7[%180, %c0_45] : memref<32x128xbf16, #tpu.memory_space<vmem>>, vector<8x128xbf16>
    tpu.vector_store %arg7[%180, %c0_45], %179 {strides = array<i32>} : memref<32x128xbf16, #tpu.memory_space<vmem>>, vector<8x128xbf16>,
    %c3_i32_46 = arith.constant 3 : i32
    %182 = arith.muli %23, %c3_i32_46 : i32
    %183 = arith.addi %21, %182 : i32
    %c8_i32_47 = arith.constant 8 : i32
    %184 = arith.muli %183, %c8_i32_47 : i32
    %185 = tpu.assume_multiple %184, 8 : i32
    %186 = arith.index_cast %185 : i32 to index
    %c0_48 = arith.constant 0 : index
    %187 = vector.load %arg9[%186, %c0_48] : memref<32x512xf32, #tpu.memory_space<vmem>>, vector<8x512xf32>
    %188 = arith.truncf %174 : vector<8x128xf32> to vector<8x128xbf16>
    %cst_49 = arith.constant dense<0.000000e+00> : vector<8x512xf32>
    %189 = tpu.matmul %188, %19, %cst_49 {dimension_numbers = #tpu.dot_dimension_numbers<[1], [0], [0], [1], [0, 0, 1, 1], [], []>} : vector<8x128xbf16>, vector<128x512xbf16>, vector<8x512xf32> -> vector<8x512xf32>
    %190 = arith.addf %187, %189 : vector<8x512xf32>
    %191 = vector.extract_strided_slice %190 {offsets = [0, 0], sizes = [8, 128], strides = [1, 1]} : vector<8x512xf32> to vector<8x128xf32>
    %192 = arith.negf %191 : vector<8x128xf32>
    %193 = math.exp %192 : vector<8x128xf32>
    %cst_50 = arith.constant 1.000000e+00 : f32
    %194 = vector.broadcast %cst_50 : f32 to vector<8x128xf32>
    %195 = arith.addf %194, %193 : vector<8x128xf32>
    %196 = arith.divf %194, %195 : vector<8x128xf32>
    %197 = vector.extract_strided_slice %190 {offsets = [0, 128], sizes = [8, 128], strides = [1, 1]} : vector<8x512xf32> to vector<8x128xf32>
    %198 = arith.negf %197 : vector<8x128xf32>
    %199 = math.exp %198 : vector<8x128xf32>
    %cst_51 = arith.constant 1.000000e+00 : f32
    %200 = vector.broadcast %cst_51 : f32 to vector<8x128xf32>
    %201 = arith.addf %200, %199 : vector<8x128xf32>
    %202 = arith.divf %200, %201 : vector<8x128xf32>
    %203 = vector.extract_strided_slice %190 {offsets = [0, 256], sizes = [8, 128], strides = [1, 1]} : vector<8x512xf32> to vector<8x128xf32>
    %204 = math.tanh %203 : vector<8x128xf32>
    %205 = vector.extract_strided_slice %190 {offsets = [0, 384], sizes = [8, 128], strides = [1, 1]} : vector<8x512xf32> to vector<8x128xf32>
    %206 = arith.negf %205 : vector<8x128xf32>
    %207 = math.exp %206 : vector<8x128xf32>
    %cst_52 = arith.constant 1.000000e+00 : f32
    %208 = vector.broadcast %cst_52 : f32 to vector<8x128xf32>
    %209 = arith.addf %208, %207 : vector<8x128xf32>
    %210 = arith.divf %208, %209 : vector<8x128xf32>
    %211 = arith.mulf %202, %171 : vector<8x128xf32>
    %212 = arith.mulf %196, %204 : vector<8x128xf32>
    %213 = arith.addf %211, %212 : vector<8x128xf32>
    %214 = math.tanh %213 : vector<8x128xf32>
    %215 = arith.mulf %210, %214 : vector<8x128xf32>
    %216 = arith.addi %5, %183 : i32
    %217 = arith.index_cast %216 : i32 to index
    %218 = memref.load %arg2[%217] : memref<8xi32, #tpu.memory_space<smem>>
    %219 = vector.broadcast %218 : i32 to vector<8x1xi32>
    %220 = arith.cmpi slt, %20, %219 : vector<8x1xi32>
    %221 = vector.shape_cast %220 : vector<8x1xi1> to vector<8x1xi1>
    %222 = vector.broadcast %221 : vector<8x1xi1> to vector<8x128xi1>
    %223 = arith.select %222, %213, %171 : vector<8x128xi1>, vector<8x128xf32>
    %224 = vector.shape_cast %220 : vector<8x1xi1> to vector<8x1xi1>
    %225 = vector.broadcast %224 : vector<8x1xi1> to vector<8x128xi1>
    %226 = arith.select %225, %215, %174 : vector<8x128xi1>, vector<8x128xf32>
    %cst_53 = arith.constant 0.000000e+00 : f32
    %227 = vector.shape_cast %220 : vector<8x1xi1> to vector<8x1xi1>
    %228 = vector.broadcast %227 : vector<8x1xi1> to vector<8x128xi1>
    %229 = vector.broadcast %cst_53 : f32 to vector<8x128xf32>
    %230 = arith.select %228, %215, %229 : vector<8x128xi1>, vector<8x128xf32>
    %231 = arith.truncf %230 : vector<8x128xf32> to vector<8x128xbf16>
    %232 = arith.index_cast %185 : i32 to index
    %c0_54 = arith.constant 0 : index
    %233 = vector.load %arg7[%232, %c0_54] : memref<32x128xbf16, #tpu.memory_space<vmem>>, vector<8x128xbf16>
    tpu.vector_store %arg7[%232, %c0_54], %231 {strides = array<i32>} : memref<32x128xbf16, #tpu.memory_space<vmem>>, vector<8x128xbf16>,
    %c4_i32_55 = arith.constant 4 : i32
    %c0_56 = arith.constant 0 : index
    %c0_57 = arith.constant 0 : index
    %234 = vector.load %arg10[%c0_56, %c0_57] : memref<8x128xf32, #tpu.memory_space<vmem>>, vector<8x128xf32>
    tpu.vector_store %arg10[%c0_56, %c0_57], %226 {strides = array<i32>} : memref<8x128xf32, #tpu.memory_space<vmem>>, vector<8x128xf32>,
    %c0_58 = arith.constant 0 : index
    %c0_59 = arith.constant 0 : index
    %235 = vector.load %arg11[%c0_58, %c0_59] : memref<8x128xf32, #tpu.memory_space<vmem>>, vector<8x128xf32>
    tpu.vector_store %arg11[%c0_58, %c0_59], %223 {strides = array<i32>} : memref<8x128xf32, #tpu.memory_space<vmem>>, vector<8x128xf32>,
    %c1_i32_60 = arith.constant 1 : i32
    %236 = arith.cmpi eq, %arg1, %c1_i32_60 : i32
    %237 = arith.extui %236 : i1 to i32
    %c0_i32_61 = arith.constant 0 : i32
    %238 = arith.cmpi ne, %237, %c0_i32_61 : i32
    scf.if %238 {
      %c0_62 = arith.constant 0 : index
      %c0_63 = arith.constant 0 : index
      %c0_64 = arith.constant 0 : index
      %239 = vector.load %arg8[%c0_62, %c0_63, %c0_64] : memref<1x8x128xf32, #tpu.memory_space<vmem>>, vector<1x8x128xf32>
      %240 = vector.shape_cast %239 : vector<1x8x128xf32> to vector<8x128xf32>
      %241 = vector.shape_cast %226 : vector<8x128xf32> to vector<1x8x128xf32>
      tpu.vector_store %arg8[%c0_62, %c0_63, %c0_64], %241 {strides = array<i32>} : memref<1x8x128xf32, #tpu.memory_space<vmem>>, vector<1x8x128xf32>,
    } else {
    }
    return
  }
  func.func @transform_0(%arg0: i32, %arg1: i32, %arg2: memref<8xi32, #tpu.memory_space<smem>>) -> (i32, i32) {
    %c1_i32 = arith.constant 1 : i32
    %0 = arith.muli %arg0, %c1_i32 : i32
    %c2_i32 = arith.constant 2 : i32
    %1 = arith.muli %c2_i32, %arg0 : i32
    %c1_i32_0 = arith.constant 1 : i32
    %2 = arith.subi %c1_i32_0, %1 : i32
    %3 = arith.muli %2, %arg1 : i32
    %4 = arith.addi %0, %3 : i32
    %c0_i32 = arith.constant 0 : i32
    %c0_i32_1 = arith.constant 0 : i32
    return %4, %c0_i32 : i32, i32
  }
  func.func @transform_1(%arg0: i32, %arg1: i32, %arg2: memref<8xi32, #tpu.memory_space<smem>>) -> (i32, i32, i32) {
    %c0_i32 = arith.constant 0 : i32
    %c0_i32_0 = arith.constant 0 : i32
    %c0_i32_1 = arith.constant 0 : i32
    return %arg0, %c0_i32, %c0_i32_0 : i32, i32, i32
  }
  func.func @transform_2(%arg0: i32, %arg1: i32, %arg2: memref<8xi32, #tpu.memory_space<smem>>) -> (i32, i32, i32) {
    %c0_i32 = arith.constant 0 : i32
    %c0_i32_0 = arith.constant 0 : i32
    %c0_i32_1 = arith.constant 0 : i32
    return %arg0, %c0_i32, %c0_i32_0 : i32, i32, i32
  }
  func.func @transform_3(%arg0: i32, %arg1: i32, %arg2: memref<8xi32, #tpu.memory_space<smem>>) -> (i32, i32, i32) {
    %c0_i32 = arith.constant 0 : i32
    %c0_i32_0 = arith.constant 0 : i32
    %c0_i32_1 = arith.constant 0 : i32
    return %arg0, %c0_i32, %c0_i32_0 : i32, i32, i32
  }
  func.func @transform_4(%arg0: i32, %arg1: i32, %arg2: memref<8xi32, #tpu.memory_space<smem>>) -> (i32, i32) {
    %c1_i32 = arith.constant 1 : i32
    %0 = arith.muli %arg0, %c1_i32 : i32
    %c2_i32 = arith.constant 2 : i32
    %1 = arith.muli %c2_i32, %arg0 : i32
    %c1_i32_0 = arith.constant 1 : i32
    %2 = arith.subi %c1_i32_0, %1 : i32
    %3 = arith.muli %2, %arg1 : i32
    %4 = arith.addi %0, %3 : i32
    %c0_i32 = arith.constant 0 : i32
    return %4, %arg0 : i32, i32
  }
  func.func @transform_5(%arg0: i32, %arg1: i32, %arg2: memref<8xi32, #tpu.memory_space<smem>>) -> (i32, i32, i32) {
    %c0_i32 = arith.constant 0 : i32
    %c0_i32_0 = arith.constant 0 : i32
    %c0_i32_1 = arith.constant 0 : i32
    return %arg0, %c0_i32, %c0_i32_0 : i32, i32, i32
  }
}

</mosaic_0001>

<bundles_post_ra>
// kernel: tpu_custom_call.1
= control target key start
LH: loop header
LB: loop body
LE: loop exit
PB: predicated region body
PF: predicated region fallthrough
CT: control target
= control target key end

     0   :  { %s2841_s0 = inlined_call_operand.vmem [shape: s32[8], index: 0, kind: input, shape index: {}]   ;;  %s2842_s1 = inlined_call_operand.vmem [shape: bf16[64,32], index: 1, kind: input, shape index: {}]   ;;  %s2843_s2 = inlined_call_operand.hbm [shape: bf16[2,32,512], index: 2, kind: input, shape index: {}]   ;;  %s2844_s3 = inlined_call_operand.hbm [shape: bf16[2,128,512], index: 3, kind: input, shape index: {}]   ;;  %s2845_s4 = inlined_call_operand.vmem [shape: f32[2,1,512], index: 4, kind: input, shape index: {}]   ;;  %s2846_s5 = inlined_call_operand.hbm [shape: bf16[64,256], index: 5, kind: output, shape index: {0}]   ;;  %s2847_s6 = inlined_call_operand.hbm [shape: f32[2,8,128], index: 6, kind: output, shape index: {1}]  }
   0x1   :  { %2862 = sst [smem:[#allocation29_spill]] %s2843_s2  ;;  %s12_s23 = sshll.u32 %s2841_s0, 4  ;;  %s13_s23 = int_to_ptr.vmem [resolvable:$true] %s12_s23 }
   0x2   :  { %2863 = sst [smem:[#allocation30_spill]] %s2844_s3  ;;  %s1894_s24 = scalar_lea.vmem %s13_s23, 16 }
   0x3   :  { %p1895_p0 = scmp.ne.s32.totalorder %s13_s23, %s1894_s24  ;;  %p1899_p1 = scmp.lt.s32.totalorder %s13_s23, %s13_s23 }
   0x4   :  { %p1900_p2 = scmp.lt.s32.totalorder %s1894_s24, %s1894_s24 }
   0x6   :  { %p1901_p3 = por %p1900_p2, %p1899_p1 }
   0x8   :  { %p1902_p4 = pnand %p1901_p3, %p1895_p0 }
   0xa   :  { %1905 = shalt.err (!%p1902_p4)  }
   0xb   :  { %s2128_s25 = smov [#allocation6]  }
   0xc   :  { %15 = dma.vmem_to_smem %s13_s23, 16, %s2128_s25, [#allocation5] }
   0xd   :  { %2066 = dma.done.wait [#allocation5], 16 }
   0xe   :  { %2067 = vsyncadd [#allocation5], 4294967280 }
   0xf   :  { %17 = sfence }
  0x10   :  { %18 = vsyncpa [#allocation8], 0 }
  0x11   :  { %19 = vsyncpa [#allocation11], 0 }
  0x12   :  { %20 = vsyncpa [#allocation9], 0 }
  0x13   :  { %22 = vsyncpa [#allocation9 + $0x1], 0 }
  0x14   :  { %23 = vsyncpa [#allocation14], 0 }
  0x15   :  { %25 = vsyncpa [#allocation14 + $0x1], 0  ;;  %s2178_s0 = smov 0   ;;  %s2180_s26 = smov 0  }
  0x16   :  { %s2182_s27 = smov 0   ;;  %s2184_s28 = smov 0  }
  0x17   :  { %s2186_s29 = smov 0   ;;  %s2188_s30 = smov 0  }
  0x18   :  { %s2190_s7 = smov 0   ;;  %s2192_s8 = smov 0  }
  0x19   :  { %s2194_s9 = smov 0   ;;  %s2196_s10 = smov 0  }
  0x1a   :  { %s2198_s11 = smov 0  }
  0x1b LB: > { %2864 = sst [smem:[#allocation20_spill]] %s2094_s27  ;;  %s1534_s12 = sadd.s32 4294967295, %s2126_s11   ;;  %s2126_s11 = sphi %s2198_s11, %s31_s11   ;;  %s2122_s10 = sphi %s2196_s10, %s2901_s10   ;;  %s2118_s9 = sphi %s2194_s9, %s2900_s9   ;;  %s2114_s8 = sphi %s2192_s8, %s2899_s8   ;;  %s2110_s7 = sphi %s2190_s7, %s2898_s7   ;;  %s2106_s30 = sphi %s2188_s30, %s2897_s30   ;;  %s2102_s29 = sphi %s2186_s29, %s2905_s29   ;;  %s2098_s28 = sphi %s2184_s28, %s2904_s28   ;;  %s2094_s27 = sphi %s2182_s27, %s2895_s27   ;;  %s2090_s26 = sphi %s2180_s26, %s2903_s26   ;;  %s2086_s0 = sphi %s2178_s0, %s2902_s0  }
  0x1c   : > { %2865 = sst [smem:[#allocation21_spill]] %s2106_s30  ;;  %s40_s14 = sadd.s32 1, %s2118_s9 }
  0x1d   : > { %2866 = sst [smem:[#allocation22_spill]] %s2118_s9  ;;  %p41_p5 = scmp.ge.s32.totalorder %s40_s14, 2 }
  0x1e   : > { %2867 = sst [smem:[#allocation23_spill]] %s2122_s10  ;;  %s43_s15 = sadd.s32 1, %s2122_s10 }
  0x1f   : > { %s84_s16 = sadd.s32 1, %s2106_s30  ;;  %p97_p6 = scmp.ne.s32.totalorder %s2102_s29, %s2098_s28 }
  0x20   : > { %s2907_s14 = smov (%p41_p5, %s40_s14), 0  ;;  %s2909_s15 = smov (!%p41_p5, %s43_s15), %s2122_s10 }
  0x21   : > { %2868 = sst [smem:[#allocation24_spill]] %s2907_s14  ;;  %p2243_p7 = scmp.eq.s32.totalorder %s1534_s12, 0 }
  0x22   : > { %s1538_s18 = sshll.u32 %s2122_s10, 1  ;;  %p45_p8 = scmp.ge.s32.totalorder %s2909_s15, 2 }
  0x23   : > { %s160_s19 = ssub.s32 1, %s1538_s18  ;;  %s172_s21 = sadd.s32 1, %s2094_s27 }
  0x24   : > { %s161_s20 = smul.u32 %s2118_s9, %s160_s19  ;;  %s2911_s15 = smov (%p45_p8, %s2909_s15), 0 }
  0x25   : > { %2870 = sst [smem:[#allocation25_spill]] %s2911_s15  ;;  %p182_p9 = scmp.ne.s32.totalorder %s2094_s27, %s2090_s26 }
  0x26   : > { %s162_s22 = sadd.s32 %s2122_s10, %s161_s20  ;;  %s81_s23 = ssub.s32 %s2122_s10, %s2911_s15 }
  0x27   : > { %s1539_s24 = sshll.u32 %s2911_s15, 1  ;;  %p82_p10 = scmp.eq.s32.totalorder %s81_s23, 0 }
  0x28   : > { %s164_s25 = ssub.s32 1, %s1539_s24  ;;  %p2259_p11 = scmp.eq.s32.totalorder %s1534_s12, 3 }
  0x29   : > { %s165_s18 = smul.u32 %s164_s25, %s2907_s14  ;;  %p188_p13 = scmp.ne.s32.totalorder %s2090_s26, %s2086_s0 }
  0x2a   : > { %s2264_s20 = scalar_select %p82_p10, %s2106_s30, %s84_s16  }
  0x2b   : > { %s166_s13 = sadd.s32 %s165_s18, %s2911_s15  ;;  %p2269_p12 = por %p2259_p11, %p182_p9 }
  0x2c   : > { %2872 = sst [smem:[#allocation26_spill]] %s2264_s20  ;;  %s167_s24 = ssub.s32 %s162_s22, %s166_s13 }
  0x2d   : > { %s2873_s10 = scalar_select %p2269_p12, 1, 0 }
  0x2e   : > { %s169_s12 = sor.u32 %s167_s24, %s81_s23  ;;  %s2874_s25 = sadd.s32 4294967294, %s2126_s11  }
  0x2f   : > { %p189_p0 = scmp.eq.s32.totalorder %s2874_s25, 3  ;;  %p170_p1 = scmp.eq.s32.totalorder %s169_s12, 0 }
  0x30   : > { %p208_p2 = scmp.ne.s32.totalorder %s2106_s30, %s2102_s29  ;;  %p1540_p8 = scmp.ge.s32.totalorder %s2126_s11, 1 }
  0x31   : > { %p2279_p3 = por %p189_p0, %p188_p13  ;;  %p2286_p4 = por %p189_p0, %p97_p6 }
  0x32   : > { %s2291_s15 = scalar_select %p170_p1, %s2094_s27, %s172_s21  }
  0x33   : > { %s2875_s16 = scalar_select %p2279_p3, 1, 0 }
  0x34   : > { %s2876_s18 = scalar_select %p2286_p4, 1, 0 }
  0x35   : > { %2878 = sst [smem:[#allocation28_spill]] %s2291_s15  ;;  %p2295_p5 = por %p208_p2, %p2259_p11 }
  0x36   : > { %2877 = sst [smem:[#allocation27_spill]] %s2876_s18  ;;  %p222_p9 = scmp.lt.s32.totalorder %s2126_s11, 5 }
  0x37   : > { %s2879_s13 = scalar_select %p2295_p5, 1, 0 }
  0x38   : > { %s1640_s22 = sshll.u32 %s2114_s8, 10  ;;  %p2307_p10 = por %p2243_p7, %p97_p6 }
  0x39   : > { %p2311_p13 = pnand %p1540_p8, %p222_p9  ;;  %s2129_s21 = smov [#allocation7]  }
  0x3a   : > { %s2880_s23 = scalar_select %p2307_p10, 1, 0 }
  0x3b   : > { %s2881_s24 = scalar_select %p2311_p13, 1, 0 }
  0x3c   : > { %s237_s19 = sshll.u32 %s2129_s21, 4  ;;  %s2882_s2 = sld [smem:[#allocation29_spill]]  ;;  %s2320_s19 = int_to_ptr.vmem [resolvable:$true] %s237_s19 }
  0x3d   : > { %p1655_p6 = pneg %p2311_p13  ;;  %s1641_s17 = sshll.u32 %s2114_s8, 12 }
  0x3e   : > { %s2884_s3 = sld [smem:[#allocation30_spill]]  ;;  %s2130_s12 = smov [#allocation10]  }
  0x3f   : > { %p2327_p7 = pnand %p1655_p6, %p2307_p10  ;;  %s253_s25 = sshll.u32 %s2130_s12, 4  ;;  %s2336_s25 = int_to_ptr.vmem [resolvable:$true] %s253_s25 }
  0x41   : > { %p1908_p0 = pneg %p2327_p7 }
  0x42   : > { %s2318_s14 = scalar_lea.hbm %s2882_s2, %s1640_s22  ;;  %s1911_s20 = scalar_lea.hbm %s2882_s2, 2048 }
  0x43   : > { %s1906_s30 = scalar_lea.hbm %s2318_s14, 1024  ;;  %p1912_p8 = scmp.lt.u32.totalorder %s2318_s14, %s2882_s2 }
  0x44   : > { %s2334_s22 = scalar_lea.hbm %s2884_s3, %s1641_s17  ;;  %p1907_p11 = scmp.ne.s32.totalorder %s2318_s14, %s1906_s30 }
  0x45   : > { %p1913_p9 = scmp.lt.u32.totalorder %s1911_s20, %s1906_s30  ;;  %p1915_p4 = scmp.lt.u32.totalorder %s1906_s30, %s2318_s14 }
  0x46   : > { %p1909_p1 = pnand %p1908_p0, %p1907_p11 }
  0x47   : > { %p1914_p6 = por %p1913_p9, %p1912_p8 }
  0x48   : > { %p1910_p2 = pneg %p1909_p1 }
  0x49   : > { %p1916_p3 = por %p1915_p4, %p1914_p6 }
  0x4b   : > { %p1917_p5 = pnand %p1916_p3, %p1910_p2 }
  0x4d   : > { %1920 = shalt.err (!%p1917_p5)
}
  0x4e   : > { %s1921_s17 = scalar_lea.vmem %s2320_s19, 1024  ;;  %p1929_p10 = scmp.lt.s32.totalorder %s2320_s19, %s2320_s19 }
  0x4f   : > { %p1922_p11 = scmp.ne.s32.totalorder %s2320_s19, %s1921_s17  ;;  %p1930_p13 = scmp.lt.s32.totalorder %s1921_s17, %s1921_s17 }
  0x51   : > { %p1924_p1 = pnand %p1922_p11, %p1908_p0  ;;  %p1931_p8 = por %p1930_p13, %p1929_p10 }
  0x53   : > { %p1925_p12 = pneg %p1924_p1 }
  0x55   : > { %p1932_p9 = pnand %p1931_p8, %p1925_p12 }
  0x57   : > { %1935 = shalt.err (!%p1932_p9)
}
  0x58   : > { %s2131_s27 = smov 256   ;;  %s2132_s30 = smov 16  }
  0x59   : > { %1658 = dma.hbm_to_vmem [thread:$0]  (!%p2327_p7), %s2318_s14, 1024, %s2320_s19, [#allocation8], %s2131_s27, %s2131_s27, %s2132_s30  }
  0x5a   : > { %s1936_s15 = scalar_lea.hbm %s2334_s22, 4096  ;;  %s1941_s20 = scalar_lea.hbm %s2884_s3, 8192 }
  0x5b   : > { %p1937_p3 = scmp.ne.s32.totalorder %s2334_s22, %s1936_s15  ;;  %p1942_p12 = scmp.lt.u32.totalorder %s2334_s22, %s2884_s3 }
  0x5c   : > { %p1943_p10 = scmp.lt.u32.totalorder %s1941_s20, %s1936_s15  ;;  %p1945_p2 = scmp.lt.u32.totalorder %s1936_s15, %s2334_s22 }
  0x5d   : > { %p1939_p4 = pnand %p1937_p3, %p1908_p0 }
  0x5e   : > { %p1944_p13 = por %p1943_p10, %p1942_p12 }
  0x5f   : > { %p1940_p5 = pneg %p1939_p4 }
  0x60   : > { %p1946_p6 = por %p1945_p2, %p1944_p13 }
  0x62   : > { %p1947_p11 = pnand %p1946_p6, %p1940_p5 }
  0x64   : > { %1950 = shalt.err (!%p1947_p11)
}
  0x65   : > { %s1951_s14 = scalar_lea.vmem %s2336_s25, 4096  ;;  %p1959_p3 = scmp.lt.s32.totalorder %s2336_s25, %s2336_s25 }
  0x66   : > { %p1952_p1 = scmp.ne.s32.totalorder %s2336_s25, %s1951_s14  ;;  %p1960_p4 = scmp.lt.s32.totalorder %s1951_s14, %s1951_s14 }
  0x68   : > { %p1954_p8 = pnand %p1952_p1, %p1908_p0  ;;  %p1961_p10 = por %p1960_p4, %p1959_p3 }
  0x6a   : > { %p1955_p9 = pneg %p1954_p8 }
  0x6c   : > { %p1962_p12 = pnand %p1961_p10, %p1955_p9 }
  0x6e   : > { %1965 = shalt.err (!%p1962_p12)
}
  0x6f   : > { %1661 = dma.hbm_to_vmem [thread:$0]  (!%p2327_p7), %s2334_s22, 4096, %s2336_s25, [#allocation11], %s2131_s27, %s2131_s27, %s2132_s30  }
  0x70   : > { %p2885_p5 = scmp.ne.s32.totalorder %s2881_s24, 0 }
  0x71   : > { %p2886_p13 = scmp.ne.s32.totalorder (!%p2885_p5), %s2880_s23, 0 }
  0x72   : > { %293 = sbr.rel (%p2885_p5) target bundleno = 1281 (0x501), region = 36 }
  0x79   : > { %2069 = dma.done.wait (%p2886_p13), [#allocation8], 1024  }
  0x7a   : > { %2071 = vsyncadd (%p2886_p13), [#allocation8], 4294966272 }
  0x7b   : > { %2073 = dma.done.wait (%p2886_p13), [#allocation11], 4096  }
  0x7c   : > { %2075 = vsyncadd (%p2886_p13), [#allocation11], 4294963200  ;;  %s2861_s9 = sand.u32 1, %s2090_s26   ;;  %s2860_s24 = sand.u32 1, %s2102_s29  }
  0x7d   : > { %s1547_s19 = sshll.u32 %s2861_s9, 4  ;;  %s2404_s22 = sshll.u32 %s2860_s24, 3 }
  0x7e   : > { %s1549_s25 = sshll.u32 %s2114_s8, 1  ;;  %p352_p7 = scmp.lt.s32.totalorder %s2114_s8, 1 }
  0x7f   : > { %s2408_s23 = ssub.s32 1, %s1549_s25  ;;  %s337_s3 = scalar_lea.vmem [#allocation13], %s2404_s22 }
  0x80   : > { %s340_s27 = smul.u32 %s2110_s7, %s2408_s23  ;;  %p1555_p2 = scmp.ne.s32.totalorder %s2110_s7, 0 }
  0x81   : > { %s353_s30 = scalar_select %p352_p7, %s2114_s8, 1 }
  0x82   : > { %s2414_s15 = sadd.s32 %s2114_s8, %s340_s27  ;;  %s2431_s27 = scalar_lea.vmem [#allocation12], %s1547_s19  ;;  %v2133_v0 = vmov (!%p1555_p2), 0.0  }
  0x83   : > { %s2417_s18 = sshll.u32 %s2414_s15, 2  ;;  %s1552_s12 = sshll.u32 %s353_s30, 2  ;;  %371 = vst [vmem:[#allocation3] sm:$0xff] (!%p1555_p2), %v2133_v0  ;;  %372 = vst [vmem:[#allocation4] sm:$0xff] (!%p1555_p2), %v2133_v0 }
  0x84   : > { %p343_p0 = scmp.lt.s32.totalorder %s2417_s18, 7  ;;  %s2423_s17 = scalar_lea.vmem %s2845_s4, %s1552_s12 }
  0x85   : > { %370 = sbr.rel (%p1555_p2) target bundleno = 140 (0x8c), region = 48 }
  0x86   : > { %s344_s14 = scalar_select %p343_p0, %s2417_s18, 7 }
  0x88   : > { %s1551_s25 = sshll.u32 %s344_s14, 2 }
  0x89   : > { %s2429_s2 = scalar_lea.vmem %s2842_s1, %s1551_s25 }
  0x8c PF: > { %v1768_v1 = vld [vmem:[#allocation7 + $0x4] ss:$16 sps:$4 sm:$0xff]   ;;  %v1770_v2 = vld [vmem:[#allocation7 + $0xc] ss:$16 sps:$4 sm:$0xff]   ;;  %v2134_v3 = vmov 0   ;;  %vm457_vm0 = vcmask 261120   ;;  %v387_v46 = vlaneseq }
  0x8d   : > { %496 = vmatprep.mubr.bf16.mxu0 %v2134_v3  ;;  %549 = vmatprep.mubr.bf16.mxu1 %v2134_v3  ;;  %v1772_v4 = vld [vmem:[#allocation7] ss:$16 sps:$4 sm:$0xff]   ;;  %v1773_v5 = vld [vmem:[#allocation7 + $0x8] ss:$16 sps:$4 sm:$0xff]   ;;  %v1774_v6 = vld [vmem:[#allocation7 + $0x24] ss:$16 sps:$4 sm:$0xff]  }
  0x8e   : > { %464 = vmatprep.subr.bf16.mxu0 %v1768_v1  ;;  %517 = vmatprep.subr.bf16.mxu1 %v1770_v2  ;;  %v1776_v7 = vld [vmem:[#allocation7 + $0x2c] ss:$16 sps:$4 sm:$0xff]   ;;  %v1778_v8 = vld [vmem:[#allocation7 + $0x20] ss:$16 sps:$4 sm:$0xff]   ;;  %v1779_v9 = vld [vmem:[#allocation7 + $0x28] ss:$16 sps:$4 sm:$0xff]  }
  0x8f   : > { %465 = vmatpush1.bf16.msra.mxu0 %v1772_v4  ;;  %518 = vmatpush1.bf16.msra.mxu1 %v1773_v5  ;;  %v1780_v10 = vld [vmem:[%s2429_s2] sm:$0xff]   ;;  %v2440_v12 = vld [vmem:[#allocation10 + $0xc] ss:$16 sps:$4 sm:$0xff]   ;;  %v2444_v14 = vld [vmem:[#allocation10 + $0x8] ss:$16 sps:$4 sm:$0xff]   ;;  %v2583_v47 = vshrl.u32 %v387_v46, 7 }
  0x90   : > { %466 = vmatprep.subr.bf16.mxu0 %v1774_v6  ;;  %519 = vmatprep.subr.bf16.mxu1 %v1776_v7  ;;  %v2438_v11 = vld [vmem:[#allocation10 + $0x4] ss:$16 sps:$4 sm:$0xff]   ;;  %v2442_v13 = vld [vmem:[#allocation10] ss:$16 sps:$4 sm:$0xff]   ;;  %v2450_v16 = vld [vmem:[#allocation10 + $0x2c] ss:$16 sps:$4 sm:$0xff]  }
  0x91   : > { %v2447_v15 = vld [vmem:[#allocation10 + $0x24] ss:$16 sps:$4 sm:$0xff]   ;;  %v2454_v17 = vld [vmem:[#allocation10 + $0x20] ss:$16 sps:$4 sm:$0xff]   ;;  %v2458_v18 = vld [vmem:[#allocation10 + $0x28] ss:$16 sps:$4 sm:$0xff]  }
  0x92   : > { %v2462_v19 = vld [vmem:[#allocation10 + $0x44] ss:$16 sps:$4 sm:$0xff]   ;;  %v1793_v20 = vld [vmem:[%s2429_s2 + $0x8] sm:$0xff]   ;;  %v2469_v22 = vld [vmem:[#allocation10 + $0x40] ss:$16 sps:$4 sm:$0xff]   ;;  %v389_v48 = vsub.s32 0, %v2583_v47 }
  0x93   : > { %467 = vmatpush1.bf16.msra.mxu0 %v1778_v8  ;;  %520 = vmatpush1.bf16.msra.mxu1 %v1779_v9  ;;  %v2467_v21 = vld [vmem:[#allocation10 + $0x4c] ss:$16 sps:$4 sm:$0xff]   ;;  %v2473_v23 = vld [vmem:[#allocation10 + $0x48] ss:$16 sps:$4 sm:$0xff]   ;;  %v2477_v24 = vld [vmem:[#allocation10 + $0x64] ss:$16 sps:$4 sm:$0xff]  }
  0x94   : > { %794 = vmatprep.subr.bf16.mxu0 %v2438_v11  ;;  %835 = vmatprep.subr.bf16.mxu1 %v2440_v12  ;;  %v2479_v25 = vld [vmem:[#allocation10 + $0x6c] ss:$16 sps:$4 sm:$0xff]   ;;  %v2483_v26 = vld [vmem:[#allocation10 + $0x60] ss:$16 sps:$4 sm:$0xff]   ;;  %v2487_v27 = vld [vmem:[#allocation10 + $0x68] ss:$16 sps:$4 sm:$0xff]  }
  0x95   : > { %v2489_v28 = vld [vmem:[#allocation10 + $0x84] ss:$16 sps:$4 sm:$0xff]   ;;  %v2493_v29 = vld [vmem:[#allocation10 + $0x8c] ss:$16 sps:$4 sm:$0xff]   ;;  %v2497_v30 = vld [vmem:[#allocation10 + $0x80] ss:$16 sps:$4 sm:$0xff]  }
  0x96   : > { %1566 = vmatmul.mubr.msk.bf16.vlgmr.msra.gmra.mrb[0].mxu0 %vm457_vm0, %v1780_v10  ;;  %1568 = vmatmul.mubr.msk.bf16.vlgmr.msra.gmra.mrb[0].mxu1 %vm457_vm0, %v1780_v10  ;;  %v2501_v31 = vld [vmem:[#allocation10 + $0x88] ss:$16 sps:$4 sm:$0xff]   ;;  %v2505_v32 = vld [vmem:[#allocation10 + $0xa4] ss:$16 sps:$4 sm:$0xff]   ;;  %v2507_v33 = vld [vmem:[#allocation10 + $0xac] ss:$16 sps:$4 sm:$0xff]  }
  0x97   : > { %795 = vmatpush1.bf16.msra.mxu0 %v2442_v13  ;;  %836 = vmatpush1.bf16.msra.mxu1 %v2444_v14  ;;  %v2511_v34 = vld [vmem:[#allocation10 + $0xa0] ss:$16 sps:$4 sm:$0xff]   ;;  %v2513_v35 = vld [vmem:[#allocation10 + $0xa8] ss:$16 sps:$4 sm:$0xff]   ;;  %v2517_v36 = vld [vmem:[#allocation10 + $0xc4] ss:$16 sps:$4 sm:$0xff]  }
  0x98   : > { %796 = vmatprep.subr.bf16.mxu0 %v2447_v15  ;;  %837 = vmatprep.subr.bf16.mxu1 %v2450_v16  ;;  %v2519_v37 = vld [vmem:[#allocation10 + $0xcc] ss:$16 sps:$4 sm:$0xff]   ;;  %v2523_v38 = vld [vmem:[#allocation10 + $0xc0] ss:$16 sps:$4 sm:$0xff]   ;;  %v2525_v39 = vld [vmem:[#allocation10 + $0xc8] ss:$16 sps:$4 sm:$0xff]  }
  0x99   : > { %506 = vmatprep.mubr.bf16.mxu0 %v2134_v3  ;;  %559 = vmatprep.mubr.bf16.mxu1 %v2134_v3  ;;  %v2529_v40 = vld [vmem:[#allocation10 + $0xe4] ss:$16 sps:$4 sm:$0xff]   ;;  %v2531_v41 = vld [vmem:[#allocation10 + $0xec] ss:$16 sps:$4 sm:$0xff]   ;;  %v2535_v42 = vld [vmem:[#allocation10 + $0xe0] ss:$16 sps:$4 sm:$0xff]  }
  0x9a   : > { %v2537_v43 = vld [vmem:[#allocation10 + $0xe8] ss:$16 sps:$4 sm:$0xff]   ;;  %v2539_v44 = vld [vmem:[#allocation3] sm:$0xff]  ;;  %v397_v49 = vsub.s32 2, %v2583_v47  ;;  %v393_v51 = vsub.s32 1, %v2583_v47  ;;  %v401_v52 = vsub.s32 3, %v2583_v47 }
  0x9b   : > { %797 = vmatpush1.bf16.msra.mxu0 %v2454_v17  ;;  %838 = vmatpush1.bf16.msra.mxu1 %v2458_v18  ;;  %v633_v45 = vpack.c.bf16 %v2539_v44, %v2539_v44  ;;  %v385_v50 = vld [vmem:[%s2423_s17] sm:$0xf]  ;;  %s623_s2 = smul.u32 24, %s2114_s8  ;;  %p1630_p6 = scmp.ne.s32.totalorder %s2110_s7, 1 }
  0x9c   : > { %798 = vmatprep.subr.bf16.mxu0 %v2462_v19  ;;  %839 = vmatprep.subr.bf16.mxu1 %v2467_v21  ;;  %v390_v53 = vrot.slane %v385_v50, %v389_v48  ;;  %v398_v54 = vrot.slane %v385_v50, %v397_v49  ;;  %v394_v55 = vrot.slane %v385_v50, %v393_v51  ;;  %s2595_s30 = smul.u32 3, %s2114_s8 }
  0x9d   : > { %v402_v56 = vrot.slane %v385_v50, %v401_v52  ;;  %s2591_s9 = sshra.s32 %s623_s2, 3 }
  0x9e   : > { %1567 = vmatmul.mubr.msk.bf16.gmra.mrb[4].mxu0 %vm457_vm0, %v1793_v20  ;;  %1569 = vmatmul.mubr.msk.bf16.gmra.mrb[4].mxu1 %vm457_vm0, %v1793_v20  ;;  %s1642_s24 = sshll.u32 %s2591_s9, 5  ;;  %s904_s12 = sadd.s32 %s2417_s18, %s2595_s30 }
  0x9f   : > { %799 = vmatpush1.bf16.msra.mxu0 %v2469_v22  ;;  %840 = vmatpush1.bf16.msra.mxu1 %v2473_v23  ;;  %s628_s19 = scalar_lea.vmem [#allocation2], %s1642_s24  ;;  %s905_s20 = sld [smem:[#allocation6 + %s904_s12]] }
  0xa0   : > { %800 = vmatprep.subr.bf16.mxu0 %v2477_v24  ;;  %841 = vmatprep.subr.bf16.mxu1 %v2479_v25  ;;  %s1607_s21 = sshll.u32 %s2591_s9, 2  ;;  %s2645_s14 = sadd.s32 %s2595_s30, %s2408_s23 }
  0xa1   : > { %826 = vmatprep.mubr.bf16.mxu0 %v2134_v3  ;;  %867 = vmatprep.mubr.bf16.mxu1 %v2134_v3  ;;  %s915_s17 = scalar_lea.vmem %s2431_s27, %s1607_s21 [#allocation12]  ;;  %s1608_s25 = sshll.u32 %s2645_s14, 3 }
  0xa2   : > { %s2648_s2 = sshra.s32 %s1608_s25, 3 }
  0xa3   : > { %801 = vmatpush1.bf16.msra.mxu0 %v2483_v26  ;;  %842 = vmatpush1.bf16.msra.mxu1 %v2487_v27  ;;  %s1643_s9 = sshll.u32 %s2648_s2, 5 }
  0xa4   : > { %802 = vmatprep.subr.bf16.mxu0 %v2489_v28  ;;  %843 = vmatprep.subr.bf16.mxu1 %v2493_v29  ;;  %s923_s24 = scalar_lea.vmem [#allocation2], %s1643_s9 }
  0xa7   : > { %803 = vmatpush1.bf16.msra.mxu0 %v2497_v30  ;;  %844 = vmatpush1.bf16.msra.mxu1 %v2501_v31 }
  0xa8   : > { %804 = vmatprep.subr.bf16.mxu0 %v2505_v32  ;;  %845 = vmatprep.subr.bf16.mxu1 %v2507_v33 }
  0xab   : > { %805 = vmatpush1.bf16.msra.mxu0 %v2511_v34  ;;  %846 = vmatpush1.bf16.msra.mxu1 %v2513_v35 }
  0xac   : > { %806 = vmatprep.subr.bf16.mxu0 %v2517_v36  ;;  %847 = vmatprep.subr.bf16.mxu1 %v2519_v37 }
  0xaf   : > { %807 = vmatpush1.bf16.msra.mxu0 %v2523_v38  ;;  %848 = vmatpush1.bf16.msra.mxu1 %v2525_v39 }
  0xb0   : > { %808 = vmatprep.subr.bf16.mxu0 %v2529_v40  ;;  %849 = vmatprep.subr.bf16.mxu1 %v2531_v41 }
  0xb3   : > { %809 = vmatpush1.bf16.msra.mxu0 %v2535_v42  ;;  %850 = vmatpush1.bf16.msra.mxu1 %v2537_v43 }
  0xb4   : > { %929 = vmatprep.subr.bf16.mxu0 %v2438_v11  ;;  %970 = vmatprep.subr.bf16.mxu1 %v2440_v12 }
  0xb6   : > { %827 = vmatmul.mubr.bf16.vlgmr.msra.gmra.mrb[8].mxu0 %v633_v45  ;;  %868 = vmatmul.mubr.bf16.vlgmr.msra.gmra.mrb[8].mxu1 %v633_v45 }
  0xb7   : > { %930 = vmatpush1.bf16.msra.mxu0 %v2442_v13  ;;  %971 = vmatpush1.bf16.msra.mxu1 %v2444_v14 }
  0xb8   : > { %931 = vmatprep.subr.bf16.mxu0 %v2447_v15  ;;  %972 = vmatprep.subr.bf16.mxu1 %v2450_v16 }
  0xb9   : > { %961 = vmatprep.mubr.bf16.mxu0 %v2134_v3  ;;  %1002 = vmatprep.mubr.bf16.mxu1 %v2134_v3 }
  0xbb   : > { %932 = vmatpush1.bf16.msra.mxu0 %v2454_v17  ;;  %973 = vmatpush1.bf16.msra.mxu1 %v2458_v18 }
  0xbc   : > { %933 = vmatprep.subr.bf16.mxu0 %v2462_v19  ;;  %974 = vmatprep.subr.bf16.mxu1 %v2467_v21 }
  0xbf   : > { %934 = vmatpush1.bf16.msra.mxu0 %v2469_v22  ;;  %975 = vmatpush1.bf16.msra.mxu1 %v2473_v23 }
  0xc0   : > { %935 = vmatprep.subr.bf16.mxu0 %v2477_v24  ;;  %976 = vmatprep.subr.bf16.mxu1 %v2479_v25 }
  0xc3   : > { %936 = vmatpush1.bf16.msra.mxu0 %v2483_v26  ;;  %977 = vmatpush1.bf16.msra.mxu1 %v2487_v27 }
  0xc4   : > { %937 = vmatprep.subr.bf16.mxu0 %v2489_v28  ;;  %978 = vmatprep.subr.bf16.mxu1 %v2493_v29 }
  0xc7   : > { %938 = vmatpush1.bf16.msra.mxu0 %v2497_v30  ;;  %979 = vmatpush1.bf16.msra.mxu1 %v2501_v31 }
  0xc8   : > { %939 = vmatprep.subr.bf16.mxu0 %v2505_v32  ;;  %980 = vmatprep.subr.bf16.mxu1 %v2507_v33 }
  0xcb   : > { %940 = vmatpush1.bf16.msra.mxu0 %v2511_v34  ;;  %981 = vmatpush1.bf16.msra.mxu1 %v2513_v35 }
  0xcc   : > { %941 = vmatprep.subr.bf16.mxu0 %v2517_v36  ;;  %982 = vmatprep.subr.bf16.mxu1 %v2519_v37 }
  0xcf   : > { %942 = vmatpush1.bf16.msra.mxu0 %v2523_v38  ;;  %983 = vmatpush1.bf16.msra.mxu1 %v2525_v39 }
  0xd0   : > { %943 = vmatprep.subr.bf16.mxu0 %v2529_v40  ;;  %984 = vmatprep.subr.bf16.mxu1 %v2531_v41 }
  0xd3   : > { %944 = vmatpush1.bf16.msra.mxu0 %v2535_v42  ;;  %985 = vmatpush1.bf16.msra.mxu1 %v2537_v43 }
  0xd4   : > { %1065 = vmatprep.subr.bf16.mxu0 %v2438_v11  ;;  %1106 = vmatprep.subr.bf16.mxu1 %v2440_v12 }
 0x169   : > { %v498_v57 = vpop.f32.mrb[0].mxu0  ;;  %v551_v58 = vpop.f32.mrb[0].mxu1 }
 0x16a   : > { %v499_v59 = vadd.f32 %v498_v57, %v390_v53  ;;  %v500_v60 = vpop.f32.mrb[1].mxu0  ;;  %v552_v61 = vadd.f32 %v551_v58, %v398_v54  ;;  %v553_v62 = vpop.f32.mrb[1].mxu1 }
 0x16b   : > { %v501_v63 = vadd.f32 %v500_v60, %v394_v55  ;;  %v502_v0 = vpop.f32.mrb[2].mxu0  ;;  %v554_v1 = vadd.f32 %v553_v62, %v402_v56  ;;  %v555_v2 = vpop.f32.mrb[2].mxu1 }
 0x16c   : > { %570 = vst [vmem:[#allocation2] sm:$0xff] %v499_v59  ;;  %v503_v4 = vadd.f32 %v502_v0, %v390_v53  ;;  %v504_v5 = vpop.f32.mrb[3].mxu0  ;;  %572 = vst [vmem:[#allocation2 + $0x10] sm:$0xff] %v552_v61  ;;  %v556_v6 = vadd.f32 %v555_v2, %v398_v54  ;;  %v557_v7 = vpop.f32.mrb[3].mxu1 }
 0x16d   : > { %571 = vst [vmem:[#allocation2 + $0x8] sm:$0xff] %v501_v63  ;;  %v505_v8 = vadd.f32 %v504_v5, %v394_v55  ;;  %573 = vst [vmem:[#allocation2 + $0x18] sm:$0xff] %v554_v1  ;;  %v558_v9 = vadd.f32 %v557_v7, %v402_v56 }
 0x16e   : > { %574 = vst [vmem:[#allocation2 + $0x20] sm:$0xff] %v503_v4  ;;  %576 = vst [vmem:[#allocation2 + $0x30] sm:$0xff] %v556_v6 }
 0x16f   : > { %575 = vst [vmem:[#allocation2 + $0x28] sm:$0xff] %v505_v8  ;;  %577 = vst [vmem:[#allocation2 + $0x38] sm:$0xff] %v558_v9 }
 0x171   : > { %v508_v10 = vpop.f32.mrb[4].mxu0  ;;  %v561_v20 = vpop.f32.mrb[4].mxu1 }
 0x172   : > { %v509_v45 = vadd.f32 %v508_v10, %v390_v53  ;;  %v562_v46 = vadd.f32 %v561_v20, %v398_v54  ;;  %v510_v48 = vpop.f32.mrb[5].mxu0  ;;  %v563_v49 = vpop.f32.mrb[5].mxu1 }
 0x173   : > { %v511_v50 = vadd.f32 %v510_v48, %v394_v55  ;;  %v564_v51 = vadd.f32 %v563_v49, %v402_v56  ;;  %v512_v52 = vpop.f32.mrb[6].mxu0  ;;  %v565_v57 = vpop.f32.mrb[6].mxu1 }
 0x174   : > { %578 = vst [vmem:[#allocation2 + $0x40] sm:$0xff] %v509_v45  ;;  %580 = vst [vmem:[#allocation2 + $0x50] sm:$0xff] %v562_v46  ;;  %v513_v58 = vadd.f32 %v512_v52, %v390_v53  ;;  %v566_v59 = vadd.f32 %v565_v57, %v398_v54  ;;  %v514_v60 = vpop.f32.mrb[7].mxu0  ;;  %v567_v61 = vpop.f32.mrb[7].mxu1 }
 0x175   : > { %579 = vst [vmem:[#allocation2 + $0x48] sm:$0xff] %v511_v50  ;;  %581 = vst [vmem:[#allocation2 + $0x58] sm:$0xff] %v564_v51  ;;  %v515_v62 = vadd.f32 %v514_v60, %v394_v55  ;;  %v568_v63 = vadd.f32 %v567_v61, %v402_v56  ;;  %v622_v60 = vld [vmem:[#allocation4] sm:$0xff] }
 0x176   : > { %582 = vst [vmem:[#allocation2 + $0x60] sm:$0xff] %v513_v58  ;;  %584 = vst [vmem:[#allocation2 + $0x70] sm:$0xff] %v566_v59 }
 0x177   : > { %583 = vst [vmem:[#allocation2 + $0x68] sm:$0xff] %v515_v62  ;;  %585 = vst [vmem:[#allocation2 + $0x78] sm:$0xff] %v568_v63  ;;  %v906_v62 = vstv %s905_s20  ;;  %s1614_s20 = sshll.u32 %s2648_s2, 2 }
 0x178   : > { %vm907_vm1 = vcmp.lt.s32.totalorder %v2583_v47, %v906_v62  ;;  %s1050_s21 = scalar_lea.vmem %s2431_s27, %s1614_s20 [#allocation12] }
 0x17e   : > { %v629_v0 = vld [vmem:[%s628_s19] sm:$0xff]  ;;  %v630_v2 = vld [vmem:[%s628_s19 + $0x8] sm:$0xff]  ;;  %v632_v20 = vld [vmem:[%s628_s19 + $0x18] sm:$0xff] }
 0x17f   : > { %v631_v46 = vld [vmem:[%s628_s19 + $0x10] sm:$0xff]  ;;  %s1039_s19 = sadd.s32 %s2417_s18, %s2645_s14 }
 0x180   : > { %s1040_s12 = sld [smem:[#allocation6 + %s1039_s19]] }
 0x189   : > { %v828_v1 = vpop.f32.mrb[8].mxu0  ;;  %v869_v53 = vpop.f32.mrb[8].mxu1 }
 0x18a   : > { %v876_v54 = vadd.f32 %v828_v1, %v629_v0  ;;  %v830_v4 = vpop.f32.mrb[9].mxu0  ;;  %v871_v5 = vpop.f32.mrb[9].mxu1  ;;  %v878_v49 = vadd.f32 %v869_v53, %v631_v46 }
 0x18b   : > { %v877_v55 = vadd.f32 %v830_v4, %v630_v2  ;;  %v832_v56 = vpop.f32.mrb[10].mxu0  ;;  %v873_v6 = vpop.f32.mrb[10].mxu1  ;;  %v879_v45 = vadd.f32 %v871_v5, %v632_v20 }
 0x18c   : > { %v1604_v7 = vmul.f32 -1.442695, %v876_v54  ;;  %v833_v8 = vpop.f32.mrb[11].mxu0  ;;  %v874_v9 = vpop.f32.mrb[11].mxu1 }
 0x18d   : > { %v1605_v10 = vmul.f32 -1.442695, %v877_v55  ;;  %v1606_v48 = vmul.f32 -1.442695, %v879_v45 }
 0x18e   : > { %1830 = vpow2.f32 %v1604_v7 }
 0x18f   : > { %1832 = vpow2.f32 %v1605_v10  ;;  %v926_v10 = vld [vmem:[%s923_s24 + $0x10] sm:$0xff] }
 0x190   : > { %1834 = vpow2.f32 %v1606_v48  ;;  %v925_v48 = vld [vmem:[%s923_s24 + $0x8] sm:$0xff] }
 0x191   : > { %1836 = vtanh.f32 %v878_v49 }
 0x198   : > { %v1831_v50 = vpop.eup %1830 }
 0x199   : > { %v1833_v51 = vpop.eup %1832  ;;  %v883_v52 = vadd.f32 1.0, %v1831_v50 }
 0x19a   : > { %v889_v57 = vadd.f32 1.0, %v1833_v51  ;;  %v1835_v58 = vpop.eup %1834 }
 0x19b   : > { %1838 = vrcp.f32 %v883_v52  ;;  %v1837_v59 = vpop.eup %1836  ;;  %v896_v1 = vadd.f32 1.0, %v1835_v58 }
 0x19c   : > { %1840 = vrcp.f32 %v889_v57 }
 0x19d   : > { %1842 = vrcp.f32 %v896_v1 }
 0x1a5   : > { %v1839_v61 = vpop.eup %1838 }
 0x1a6   : > { %v1841_v63 = vpop.eup %1840  ;;  %v900_v0 = vmul.f32 %v1839_v61, %v1837_v59 }
 0x1a7   : > { %v899_v53 = vmul.f32 %v1841_v63, %v622_v60  ;;  %v1843_v4 = vpop.eup %1842 }
 0x1a9   : > { %v901_v54 = vadd.f32 %v900_v0, %v899_v53 }
 0x1ab   : > { %1844 = vtanh.f32 %v901_v54  ;;  %v2600_v2 = vsel %vm907_vm1, %v901_v54, %v622_v60 }
 0x1b5   : > { %v1845_v5 = vpop.eup %1844 }
 0x1b6   : > { %v903_v55 = vmul.f32 %v1845_v5, %v1843_v4 }
 0x1b8   : > { %v2604_v56 = vsel %vm907_vm1, %v903_v55, %v2539_v44  ;;  %v912_v6 = vsel %vm907_vm1, %v903_v55, 0.0  ;;  %v924_v44 = vld [vmem:[%s923_s24] sm:$0xff]  ;;  %v1041_v55 = vstv %s1040_s12 }
 0x1b9   : > { %v913_v7 = vpack.c.bf16 %v912_v6, %v912_v6  ;;  %v928_v8 = vpack.c.bf16 %v2604_v56, %v2604_v56  ;;  %vm1042_vm2 = vcmp.lt.s32.totalorder %v2583_v47, %v1041_v55 }
 0x1bb   : > { %916 = vst [vmem:[%s915_s17] sm:$0xf] %v913_v7  ;;  %962 = vmatmul.mubr.bf16.vlgmr.msra.gmra.mrb[12].mxu0 %v928_v8  ;;  %1003 = vmatmul.mubr.bf16.vlgmr.msra.gmra.mrb[12].mxu1 %v928_v8  ;;  %s1615_s17 = sshll.u32 %s2408_s23, 1 }
 0x1bc   : > { %1066 = vmatpush1.bf16.msra.mxu0 %v2442_v13  ;;  %1107 = vmatpush1.bf16.msra.mxu1 %v2444_v14  ;;  %s2699_s14 = sadd.s32 %s1615_s17, %s2595_s30  ;;  %s1188_s17 = smul.u32 3, %s2408_s23 }
 0x1bd   : > { %1067 = vmatprep.subr.bf16.mxu0 %v2447_v15  ;;  %1108 = vmatprep.subr.bf16.mxu1 %v2450_v16  ;;  %s1616_s25 = sshll.u32 %s2699_s14, 3  ;;  %s1175_s19 = sadd.s32 %s2417_s18, %s2699_s14 }
 0x1be   : > { %1097 = vmatprep.mubr.bf16.mxu0 %v2134_v3  ;;  %1138 = vmatprep.mubr.bf16.mxu1 %v2134_v3  ;;  %s2702_s2 = sshra.s32 %s1616_s25, 3  ;;  %s1176_s12 = sld [smem:[#allocation6 + %s1175_s19]] }
 0x1bf   : > { %s1644_s9 = sshll.u32 %s2702_s2, 5  ;;  %s1622_s20 = sshll.u32 %s2702_s2, 2 }
 0x1c0   : > { %1068 = vmatpush1.bf16.msra.mxu0 %v2454_v17  ;;  %1109 = vmatpush1.bf16.msra.mxu1 %v2458_v18  ;;  %s2721_s14 = sadd.s32 %s1188_s17, %s2595_s30 }
 0x1c1   : > { %1069 = vmatprep.subr.bf16.mxu0 %v2462_v19  ;;  %1110 = vmatprep.subr.bf16.mxu1 %v2467_v21  ;;  %s1623_s25 = sshll.u32 %s2721_s14, 3  ;;  %s1311_s23 = sadd.s32 %s2417_s18, %s2721_s14 }
 0x1c2   : > { %s1312_s30 = sld [smem:[#allocation6 + %s1311_s23]] }
 0x1c4   : > { %1070 = vmatpush1.bf16.msra.mxu0 %v2469_v22  ;;  %1111 = vmatpush1.bf16.msra.mxu1 %v2473_v23 }
 0x1c5   : > { %1071 = vmatprep.subr.bf16.mxu0 %v2477_v24  ;;  %1112 = vmatprep.subr.bf16.mxu1 %v2479_v25 }
 0x1c8   : > { %1072 = vmatpush1.bf16.msra.mxu0 %v2483_v26  ;;  %1113 = vmatpush1.bf16.msra.mxu1 %v2487_v27 }
 0x1c9   : > { %1073 = vmatprep.subr.bf16.mxu0 %v2489_v28  ;;  %1114 = vmatprep.subr.bf16.mxu1 %v2493_v29 }
 0x1cc   : > { %1074 = vmatpush1.bf16.msra.mxu0 %v2497_v30  ;;  %1115 = vmatpush1.bf16.msra.mxu1 %v2501_v31 }
 0x1cd   : > { %1075 = vmatprep.subr.bf16.mxu0 %v2505_v32  ;;  %1116 = vmatprep.subr.bf16.mxu1 %v2507_v33 }
 0x1d0   : > { %1076 = vmatpush1.bf16.msra.mxu0 %v2511_v34  ;;  %1117 = vmatpush1.bf16.msra.mxu1 %v2513_v35 }
 0x1d1   : > { %1077 = vmatprep.subr.bf16.mxu0 %v2517_v36  ;;  %1118 = vmatprep.subr.bf16.mxu1 %v2519_v37 }
 0x1d4   : > { %1078 = vmatpush1.bf16.msra.mxu0 %v2523_v38  ;;  %1119 = vmatpush1.bf16.msra.mxu1 %v2525_v39 }
 0x1d5   : > { %1079 = vmatprep.subr.bf16.mxu0 %v2529_v40  ;;  %1120 = vmatprep.subr.bf16.mxu1 %v2531_v41 }
 0x1d8   : > { %1080 = vmatpush1.bf16.msra.mxu0 %v2535_v42  ;;  %1121 = vmatpush1.bf16.msra.mxu1 %v2537_v43 }
 0x1d9   : > { %1201 = vmatprep.subr.bf16.mxu0 %v2438_v11  ;;  %1242 = vmatprep.subr.bf16.mxu1 %v2440_v12  ;;  %v927_v11 = vld [vmem:[%s923_s24 + $0x18] sm:$0xff]  ;;  %s1059_s24 = scalar_lea.vmem [#allocation2], %s1644_s9  ;;  %s2724_s9 = sshra.s32 %s1623_s25, 3 }
 0x1da   : > { %s1645_s2 = sshll.u32 %s2724_s9, 5  ;;  %s1629_s18 = sshll.u32 %s2724_s9, 2 }
 0x1db   : > { %s1322_s19 = scalar_lea.vmem %s2431_s27, %s1629_s18 [#allocation12] }
 0x28e   : > { %v963_v9 = vpop.f32.mrb[12].mxu0  ;;  %v1004_v20 = vpop.f32.mrb[12].mxu1 }
 0x28f   : > { %v1011_v45 = vadd.f32 %v963_v9, %v924_v44  ;;  %v1013_v46 = vadd.f32 %v1004_v20, %v926_v10  ;;  %v965_v49 = vpop.f32.mrb[13].mxu0  ;;  %v1006_v50 = vpop.f32.mrb[13].mxu1 }
 0x290   : > { %v1012_v12 = vadd.f32 %v965_v49, %v925_v48  ;;  %v1014_v51 = vadd.f32 %v1006_v50, %v927_v11  ;;  %v967_v52 = vpop.f32.mrb[14].mxu0  ;;  %v1008_v57 = vpop.f32.mrb[14].mxu1 }
 0x291   : > { %v1611_v58 = vmul.f32 -1.442695, %v1011_v45  ;;  %v968_v59 = vpop.f32.mrb[15].mxu0  ;;  %v1009_v60 = vpop.f32.mrb[15].mxu1 }
 0x292   : > { %v1612_v61 = vmul.f32 -1.442695, %v1012_v12  ;;  %v1613_v62 = vmul.f32 -1.442695, %v1014_v51 }
 0x293   : > { %1846 = vpow2.f32 %v1611_v58 }
 0x294   : > { %1848 = vpow2.f32 %v1612_v61 }
 0x295   : > { %1850 = vpow2.f32 %v1613_v62 }
 0x296   : > { %1852 = vtanh.f32 %v1013_v46 }
 0x29d   : > { %v1847_v63 = vpop.eup %1846 }
 0x29e   : > { %v1849_v0 = vpop.eup %1848  ;;  %v1018_v1 = vadd.f32 1.0, %v1847_v63 }
 0x29f   : > { %v1024_v53 = vadd.f32 1.0, %v1849_v0  ;;  %v1851_v54 = vpop.eup %1850 }
 0x2a0   : > { %1854 = vrcp.f32 %v1018_v1  ;;  %v1853_v4 = vpop.eup %1852  ;;  %v1031_v8 = vadd.f32 1.0, %v1851_v54 }
 0x2a1   : > { %1856 = vrcp.f32 %v1024_v53 }
 0x2a2   : > { %1858 = vrcp.f32 %v1031_v8 }
 0x2aa   : > { %v1855_v5 = vpop.eup %1854 }
 0x2ab   : > { %v1857_v6 = vpop.eup %1856  ;;  %v1035_v7 = vmul.f32 %v1855_v5, %v1853_v4 }
 0x2ac   : > { %v1034_v44 = vmul.f32 %v1857_v6, %v2600_v2  ;;  %v1859_v20 = vpop.eup %1858 }
 0x2ae   : > { %v1036_v9 = vadd.f32 %v1035_v7, %v1034_v44 }
 0x2b0   : > { %1860 = vtanh.f32 %v1036_v9  ;;  %v2656_v10 = vsel %vm1042_vm2, %v1036_v9, %v2600_v2 }
 0x2ba   : > { %v1861_v45 = vpop.eup %1860 }
 0x2bb   : > { %v1038_v46 = vmul.f32 %v1861_v45, %v1859_v20 }
 0x2bd   : > { %v2660_v48 = vsel %vm1042_vm2, %v1038_v46, %v2604_v56  ;;  %v1047_v49 = vsel %vm1042_vm2, %v1038_v46, 0.0 }
 0x2be   : > { %v1048_v11 = vpack.c.bf16 %v1047_v49, %v1047_v49  ;;  %v1064_v50 = vpack.c.bf16 %v2660_v48, %v2660_v48 }
 0x2c0   : > { %1051 = vst [vmem:[%s1050_s21] sm:$0xf] %v1048_v11  ;;  %1098 = vmatmul.mubr.bf16.vlgmr.msra.gmra.mrb[16].mxu0 %v1064_v50  ;;  %1139 = vmatmul.mubr.bf16.vlgmr.msra.gmra.mrb[16].mxu1 %v1064_v50  ;;  %s1186_s21 = scalar_lea.vmem %s2431_s27, %s1622_s20 [#allocation12] }
 0x2c1   : > { %1202 = vmatpush1.bf16.msra.mxu0 %v2442_v13  ;;  %1243 = vmatpush1.bf16.msra.mxu1 %v2444_v14  ;;  %v1062_v14 = vld [vmem:[%s1059_s24 + $0x10] sm:$0xff] }
 0x2c2   : > { %1203 = vmatprep.subr.bf16.mxu0 %v2447_v15  ;;  %1244 = vmatprep.subr.bf16.mxu1 %v2450_v16 }
 0x2c3   : > { %1233 = vmatprep.mubr.bf16.mxu0 %v2134_v3  ;;  %1274 = vmatprep.mubr.bf16.mxu1 %v2134_v3  ;;  %v1060_v3 = vld [vmem:[%s1059_s24] sm:$0xff] }
 0x2c5   : > { %1204 = vmatpush1.bf16.msra.mxu0 %v2454_v17  ;;  %1245 = vmatpush1.bf16.msra.mxu1 %v2458_v18  ;;  %v1061_v18 = vld [vmem:[%s1059_s24 + $0x8] sm:$0xff] }
 0x2c6   : > { %1205 = vmatprep.subr.bf16.mxu0 %v2462_v19  ;;  %1246 = vmatprep.subr.bf16.mxu1 %v2467_v21  ;;  %v1063_v21 = vld [vmem:[%s1059_s24 + $0x18] sm:$0xff]  ;;  %s1195_s24 = scalar_lea.vmem [#allocation2], %s1645_s2 }
 0x2c7   : > { %v1196_v61 = vld [vmem:[%s1195_s24] sm:$0xff]  ;;  %v1198_v63 = vld [vmem:[%s1195_s24 + $0x10] sm:$0xff]  ;;  %v1197_v54 = vld [vmem:[%s1195_s24 + $0x8] sm:$0xff] }
 0x2c8   : > { %v1199_v5 = vld [vmem:[%s1195_s24 + $0x18] sm:$0xff] }
 0x2c9   : > { %1206 = vmatpush1.bf16.msra.mxu0 %v2469_v22  ;;  %1247 = vmatpush1.bf16.msra.mxu1 %v2473_v23 }
 0x2ca   : > { %1207 = vmatprep.subr.bf16.mxu0 %v2477_v24  ;;  %1248 = vmatprep.subr.bf16.mxu1 %v2479_v25 }
 0x2cd   : > { %1208 = vmatpush1.bf16.msra.mxu0 %v2483_v26  ;;  %1249 = vmatpush1.bf16.msra.mxu1 %v2487_v27 }
 0x2ce   : > { %1209 = vmatprep.subr.bf16.mxu0 %v2489_v28  ;;  %1250 = vmatprep.subr.bf16.mxu1 %v2493_v29 }
 0x2d1   : > { %1210 = vmatpush1.bf16.msra.mxu0 %v2497_v30  ;;  %1251 = vmatpush1.bf16.msra.mxu1 %v2501_v31 }
 0x2d2   : > { %1211 = vmatprep.subr.bf16.mxu0 %v2505_v32  ;;  %1252 = vmatprep.subr.bf16.mxu1 %v2507_v33 }
 0x2d5   : > { %1212 = vmatpush1.bf16.msra.mxu0 %v2511_v34  ;;  %1253 = vmatpush1.bf16.msra.mxu1 %v2513_v35 }
 0x2d6   : > { %1213 = vmatprep.subr.bf16.mxu0 %v2517_v36  ;;  %1254 = vmatprep.subr.bf16.mxu1 %v2519_v37 }
 0x2d9   : > { %1214 = vmatpush1.bf16.msra.mxu0 %v2523_v38  ;;  %1255 = vmatpush1.bf16.msra.mxu1 %v2525_v39  ;;  %v1177_v39 = vstv %s1176_s12 }
 0x2da   : > { %1215 = vmatprep.subr.bf16.mxu0 %v2529_v40  ;;  %1256 = vmatprep.subr.bf16.mxu1 %v2531_v41  ;;  %vm1178_vm3 = vcmp.lt.s32.totalorder %v2583_v47, %v1177_v39 }
 0x2dd   : > { %1216 = vmatpush1.bf16.msra.mxu0 %v2535_v42  ;;  %1257 = vmatpush1.bf16.msra.mxu1 %v2537_v43 }
 0x393   : > { %v1099_v13 = vpop.f32.mrb[16].mxu0  ;;  %v1140_v15 = vpop.f32.mrb[16].mxu1 }
 0x394   : > { %v1147_v16 = vadd.f32 %v1099_v13, %v1060_v3  ;;  %v1149_v17 = vadd.f32 %v1140_v15, %v1062_v14  ;;  %v1101_v19 = vpop.f32.mrb[17].mxu0  ;;  %v1142_v22 = vpop.f32.mrb[17].mxu1  ;;  %v1313_v15 = vstv %s1312_s30 }
 0x395   : > { %v1148_v23 = vadd.f32 %v1101_v19, %v1061_v18  ;;  %v1150_v24 = vadd.f32 %v1142_v22, %v1063_v21  ;;  %v1103_v25 = vpop.f32.mrb[18].mxu0  ;;  %v1144_v26 = vpop.f32.mrb[18].mxu1  ;;  %vm1314_vm4 = vcmp.lt.s32.totalorder %v2583_v47, %v1313_v15 }
 0x396   : > { %v1619_v27 = vmul.f32 -1.442695, %v1147_v16  ;;  %v1104_v28 = vpop.f32.mrb[19].mxu0  ;;  %v1145_v29 = vpop.f32.mrb[19].mxu1 }
 0x397   : > { %v1620_v30 = vmul.f32 -1.442695, %v1148_v23  ;;  %v1621_v31 = vmul.f32 -1.442695, %v1150_v24 }
 0x398   : > { %1862 = vpow2.f32 %v1619_v27 }
 0x399   : > { %1864 = vpow2.f32 %v1620_v30 }
 0x39a   : > { %1866 = vpow2.f32 %v1621_v31 }
 0x39b   : > { %1868 = vtanh.f32 %v1149_v17 }
 0x3a2   : > { %v1863_v32 = vpop.eup %1862 }
 0x3a3   : > { %v1865_v33 = vpop.eup %1864  ;;  %v1154_v34 = vadd.f32 1.0, %v1863_v32 }
 0x3a4   : > { %v1160_v35 = vadd.f32 1.0, %v1865_v33  ;;  %v1867_v36 = vpop.eup %1866 }
 0x3a5   : > { %1870 = vrcp.f32 %v1154_v34  ;;  %v1869_v37 = vpop.eup %1868  ;;  %v1167_v42 = vadd.f32 1.0, %v1867_v36 }
 0x3a6   : > { %1872 = vrcp.f32 %v1160_v35 }
 0x3a7   : > { %1874 = vrcp.f32 %v1167_v42 }
 0x3af   : > { %v1871_v38 = vpop.eup %1870 }
 0x3b0   : > { %v1873_v40 = vpop.eup %1872  ;;  %v1171_v41 = vmul.f32 %v1871_v38, %v1869_v37 }
 0x3b1   : > { %v1170_v43 = vmul.f32 %v1873_v40, %v2656_v10  ;;  %v1875_v12 = vpop.eup %1874 }
 0x3b3   : > { %v1172_v2 = vadd.f32 %v1171_v41, %v1170_v43 }
 0x3b5   : > { %1876 = vtanh.f32 %v1172_v2  ;;  %v2710_v56 = vsel %vm1178_vm3, %v1172_v2, %v2656_v10 }
 0x3bf   : > { %v1877_v51 = vpop.eup %1876 }
 0x3c0   : > { %v1174_v52 = vmul.f32 %v1877_v51, %v1875_v12 }
 0x3c2   : > { %v2714_v57 = vsel %vm1178_vm3, %v1174_v52, %v2660_v48  ;;  %v1183_v58 = vsel %vm1178_vm3, %v1174_v52, 0.0 }
 0x3c3   : > { %v1184_v59 = vpack.c.bf16 %v1183_v58, %v1183_v58  ;;  %v1200_v60 = vpack.c.bf16 %v2714_v57, %v2714_v57 }
 0x3c5   : > { %1187 = vst [vmem:[%s1186_s21] sm:$0xf] %v1184_v59  ;;  %1234 = vmatmul.mubr.bf16.vlgmr.msra.gmra.mrb[20].mxu0 %v1200_v60  ;;  %1275 = vmatmul.mubr.bf16.vlgmr.msra.gmra.mrb[20].mxu1 %v1200_v60 }
 0x498   : > { %v1235_v62 = vpop.f32.mrb[20].mxu0  ;;  %v1276_v0 = vpop.f32.mrb[20].mxu1 }
 0x499   : > { %v1283_v1 = vadd.f32 %v1235_v62, %v1196_v61  ;;  %v1285_v53 = vadd.f32 %v1276_v0, %v1198_v63  ;;  %v1237_v4 = vpop.f32.mrb[21].mxu0  ;;  %v1278_v55 = vpop.f32.mrb[21].mxu1 }
 0x49a   : > { %v1284_v6 = vadd.f32 %v1237_v4, %v1197_v54  ;;  %v1286_v7 = vadd.f32 %v1278_v55, %v1199_v5  ;;  %v1239_v8 = vpop.f32.mrb[22].mxu0  ;;  %v1280_v44 = vpop.f32.mrb[22].mxu1 }
 0x49b   : > { %v1626_v9 = vmul.f32 -1.442695, %v1283_v1  ;;  %v1240_v10 = vpop.f32.mrb[23].mxu0  ;;  %v1281_v20 = vpop.f32.mrb[23].mxu1 }
 0x49c   : > { %v1627_v45 = vmul.f32 -1.442695, %v1284_v6  ;;  %v1628_v46 = vmul.f32 -1.442695, %v1286_v7 }
 0x49d   : > { %1878 = vpow2.f32 %v1626_v9 }
 0x49e   : > { %1880 = vpow2.f32 %v1627_v45 }
 0x49f   : > { %1882 = vpow2.f32 %v1628_v46 }
 0x4a0   : > { %1884 = vtanh.f32 %v1285_v53 }
 0x4a7   : > { %v1879_v48 = vpop.eup %1878 }
 0x4a8   : > { %v1881_v49 = vpop.eup %1880  ;;  %v1290_v11 = vadd.f32 1.0, %v1879_v48 }
 0x4a9   : > { %v1296_v50 = vadd.f32 1.0, %v1881_v49  ;;  %v1883_v3 = vpop.eup %1882 }
 0x4aa   : > { %1886 = vrcp.f32 %v1290_v11  ;;  %v1885_v13 = vpop.eup %1884  ;;  %v1303_v18 = vadd.f32 1.0, %v1883_v3 }
 0x4ab   : > { %1888 = vrcp.f32 %v1296_v50 }
 0x4ac   : > { %1890 = vrcp.f32 %v1303_v18 }
 0x4b4   : > { %v1887_v14 = vpop.eup %1886 }
 0x4b5   : > { %v1889_v16 = vpop.eup %1888  ;;  %v1307_v17 = vmul.f32 %v1887_v14, %v1885_v13 }
 0x4b6   : > { %v1306_v19 = vmul.f32 %v1889_v16, %v2710_v56  ;;  %v1891_v23 = vpop.eup %1890 }
 0x4b8   : > { %v1308_v21 = vadd.f32 %v1307_v17, %v1306_v19 }
 0x4ba   : > { %1892 = vtanh.f32 %v1308_v21  ;;  %v1317_v22 = vsel %vm1314_vm4, %v1308_v21, %v2710_v56 }
 0x4bb   : > { %1325 = vst [vmem:[#allocation4] sm:$0xff] %v1317_v22 }
 0x4c4   : > { %v1893_v24 = vpop.eup %1892  ;;  %1329 = sbr.rel (%p1630_p6) target bundleno = 1227 (0x4cb), region = 52 }
 0x4c5   : > { %v1310_v25 = vmul.f32 %v1893_v24, %v1891_v23 }
 0x4c7   : > { %v1318_v26 = vsel %vm1314_vm4, %v1310_v25, %v2714_v57  ;;  %v1319_v27 = vsel %vm1314_vm4, %v1310_v25, 0.0 }
 0x4c8   : > { %v1320_v28 = vpack.c.bf16 %v1319_v27, %v1319_v27  ;;  %1324 = vst [vmem:[#allocation3] sm:$0xff] %v1318_v26  ;;  %1330 = vst [vmem:[%s337_s3] sm:$0xff] (!%p1630_p6), %v1318_v26 }
 0x4ca   : > { %1323 = vst [vmem:[%s1322_s19] sm:$0xf] %v1320_v28 }
 0x4cb PF: > { %s1646_s12 = sshll.u32 %s2414_s15, 3  ;;  %s1356_s21 = sshll.u32 %s2431_s27, 4  ;;  %s2741_s21 = int_to_ptr.vmem [resolvable:$true] %s1356_s21 }
 0x4cc   : > { %s1353_s20 = sadd.s32 %s2114_s8, %s1646_s12  ;;  %s2887_s9 = sand.u32 1, %s2090_s26  }
 0x4cd   : > { %s1636_s17 = sshll.u32 %s1353_s20, 6  ;;  %s2750_s2 = scalar_lea.sflag [#allocation9], %s2887_s9 }
 0x4ce   : > { %s2746_s7 = scalar_lea.hbm %s2846_s5, %s1636_s17  ;;  %s1966_s24 = scalar_lea.vmem %s2741_s21, 256 }
 0x4cf   : > { %p1967_p11 = scmp.ne.s32.totalorder %s2741_s21, %s1966_s24  ;;  %p2888_p1 = scmp.ne.s32.totalorder %s2873_s10, 0 }
 0x4d0   : > { %s2135_s15 = smov [#allocation12]  }
 0x4d1   : > { %p1968_p8 = pnand %p1967_p11, %p2888_p1  ;;  %s1970_s27 = sshll.u32 %s2135_s15, 4  ;;  %s1971_s27 = int_to_ptr.vmem [resolvable:$false] %s1970_s27 }
 0x4d2   : > { %s1972_s23 = scalar_lea.vmem %s1971_s27, 512  ;;  %p1973_p3 = scmp.lt.s32.totalorder %s2741_s21, %s1971_s27 }
 0x4d3   : > { %p1969_p9 = pneg %p1968_p8  ;;  %p1974_p4 = scmp.lt.s32.totalorder %s1972_s23, %s1966_s24 }
 0x4d5   : > { %p1975_p10 = por %p1974_p4, %p1973_p3 }
 0x4d7   : > { %p1976_p12 = pnand %p1975_p10, %p1969_p9 }
 0x4d9   : > { %1979 = shalt.err (!%p1976_p12)
}
 0x4da   : > { %s1980_s30 = scalar_lea.hbm %s2746_s7, 256  ;;  %s1984_s12 = scalar_lea.hbm %s2846_s5, 1024 }
 0x4db   : > { %p1981_p5 = scmp.ne.s32.totalorder %s2746_s7, %s1980_s30  ;;  %p1985_p0 = scmp.lt.u32.totalorder %s2746_s7, %s2846_s5 }
 0x4dc   : > { %p1986_p2 = scmp.lt.u32.totalorder %s1984_s12, %s1980_s30  ;;  %p1988_p11 = scmp.lt.u32.totalorder %s1980_s30, %s2746_s7 }
 0x4dd   : > { %p1982_p13 = pnand %p1981_p5, %p2888_p1 }
 0x4de   : > { %p1987_p6 = por %p1986_p2, %p1985_p0 }
 0x4df   : > { %p1983_p7 = pneg %p1982_p13 }
 0x4e0   : > { %p1989_p8 = por %p1988_p11, %p1987_p6 }
 0x4e2   : > { %p1990_p9 = pnand %p1989_p8, %p1983_p7 }
 0x4e4   : > { %1993 = shalt.err (!%p1990_p9)
}
 0x4e5   : > { %s2136_s14 = smov 64   ;;  %s2137_s25 = smov 128  }
 0x4e6   : > { %s2138_s9 = smov 4   ;;  %s1637_s24 = sshll.u32 %s2114_s8, 7 }
 0x4e7   : > { %1651 = dma.vmem_to_hbm [thread:$0]  (%p2888_p1), %s2741_s21, 256, %s2746_s7, %s2750_s2, %s2136_s14, %s2137_s25, %s2138_s9  }
 0x4e8   : > { %s2778_s23 = scalar_lea.hbm %s2847_s6, %s1637_s24  ;;  %s1372_s30 = sshll.u32 %s337_s3, 4  ;;  %s1373_s30 = int_to_ptr.vmem [resolvable:$true] %s1372_s30 }
 0x4e9   : > { %s2889_s18 = sand.u32 1, %s2102_s29   ;;  %s1994_s12 = scalar_lea.vmem %s1373_s30, 128 }
 0x4ea   : > { %s1337_s19 = scalar_lea.sflag [#allocation14], %s2889_s18  ;;  %p1995_p3 = scmp.ne.s32.totalorder %s1373_s30, %s1994_s12 }
 0x4eb   : > { %p2890_p4 = scmp.ne.s32.totalorder %s2879_s13, 0  ;;  %s2139_s20 = smov [#allocation13]  }
 0x4ec   : > { %s1998_s17 = sshll.u32 %s2139_s20, 4  ;;  %s1999_s17 = int_to_ptr.vmem [resolvable:$false] %s1998_s17 }
 0x4ed   : > { %p1996_p10 = pnand %p1995_p3, %p2890_p4  ;;  %s2000_s10 = scalar_lea.vmem %s1999_s17, 256 }
 0x4ee   : > { %p2001_p1 = scmp.lt.s32.totalorder %s1373_s30, %s1999_s17  ;;  %p2002_p5 = scmp.lt.s32.totalorder %s2000_s10, %s1994_s12 }
 0x4ef   : > { %p1997_p12 = pneg %p1996_p10 }
 0x4f0   : > { %p2003_p13 = por %p2002_p5, %p2001_p1 }
 0x4f2   : > { %p2004_p7 = pnand %p2003_p13, %p1997_p12 }
 0x4f4   : > { %2007 = shalt.err (!%p2004_p7)
}
 0x4f5   : > { %s2008_s3 = scalar_lea.hbm %s2778_s23, 128  ;;  %s2012_s21 = scalar_lea.hbm %s2847_s6, 256 }
 0x4f6   : > { %p2009_p0 = scmp.ne.s32.totalorder %s2778_s23, %s2008_s3  ;;  %p2013_p11 = scmp.lt.u32.totalorder %s2778_s23, %s2847_s6 }
 0x4f7   : > { %p2014_p8 = scmp.lt.u32.totalorder %s2012_s21, %s2008_s3  ;;  %p2016_p3 = scmp.lt.u32.totalorder %s2008_s3, %s2778_s23 }
 0x4f8   : > { %p2010_p2 = pnand %p2009_p0, %p2890_p4 }
 0x4f9   : > { %p2015_p9 = por %p2014_p8, %p2013_p11 }
 0x4fa   : > { %p2011_p6 = pneg %p2010_p2 }
 0x4fb   : > { %p2017_p10 = por %p2016_p3, %p2015_p9 }
 0x4fd   : > { %p2018_p12 = pnand %p2017_p10, %p2011_p6 }
 0x4ff   : > { %2021 = shalt.err (!%p2018_p12)
}
 0x500   : > { %1652 = dma.vmem_to_hbm [thread:$0]  (%p2890_p4), %s1373_s30, 128, %s2778_s23, %s1337_s19  }
 0x501 PF: > { %p1669_p1 = scmp.ge.s32.totalorder %s2126_s11, 2  ;;  %s1384_s14 = sand.u32 1, %s2086_s0  }
 0x502   : > { %p2891_p5 = scmp.ne.s32.totalorder %s2875_s16, 0  ;;  %s1385_s25 = scalar_lea.sflag [#allocation9], %s1384_s14 }
 0x504   : > { %p1663_p13 = pnand %p1669_p1, %p2891_p5 }
 0x506   : > { %2077 = dma.done.wait (!%p1663_p13), %s1385_s25, 256  }
 0x507   : > { %2079 = vsyncadd (!%p1663_p13), %s1385_s25, 4294967040  ;;  %s2892_s9 = sld [smem:[#allocation27_spill]]  ;;  %s1393_s24 = sand.u32 1, %s2098_s28  }
 0x508   : > { %s1394_s15 = scalar_lea.sflag [#allocation14], %s1393_s24 }
 0x50d   : > { %p2893_p7 = scmp.ne.s32.totalorder %s2892_s9, 0 }
 0x50f   : > { %p1666_p0 = pnand %p1669_p1, %p2893_p7 }
 0x511   : > { %2081 = dma.done.wait (!%p1666_p0), %s1394_s15, 128  }
 0x512   : > { %2083 = vsyncadd (!%p1666_p0), %s1394_s15, 4294967168  ;;  %s31_s11 = sadd.s32 1, %s2126_s11   ;;  %s2894_s13 = sld [smem:[#allocation20_spill]] }
 0x513   : > { %p28_p4 = scmp.ge.s32.totalorder %s31_s11, 6   ;;  %s2895_s27 = sld [smem:[#allocation28_spill]] }
 0x514   : > { %s2896_s16 = sld [smem:[#allocation21_spill]]  ;;  %s2897_s30 = sld [smem:[#allocation26_spill]] }
 0x515   : > { %s2898_s7 = sld [smem:[#allocation22_spill]]  ;;  %s2899_s8 = sld [smem:[#allocation23_spill]] }
 0x516   : > { %s2900_s9 = sld [smem:[#allocation24_spill]]  ;;  %s2901_s10 = sld [smem:[#allocation25_spill]] }
 0x517   : > { %s2902_s0 = smov %s2090_s26  ;;  %s2904_s28 = smov %s2102_s29 }
 0x518   : > { %s2903_s26 = smov %s2894_s13  ;;  %30 = sbr.rel (!%p28_p4) target bundleno = 27 (0x1b), region = 118 }
 0x51a   : > { %s2905_s29 = smov %s2896_s16 }
 0x51f   :  { %1399 = vsyncpa [#allocation8], 1 }
 0x520   :  { %1401 = vsyncpa [#allocation8 + $0x1], 1 }
 0x521   :  { %1402 = vsyncpa [#allocation11], 1 }
 0x522   :  { %1403 = vsyncpa [#allocation9], 1 }
 0x523   :  { %1405 = vsyncpa [#allocation9 + $0x1], 1 }
 0x524   :  { %1406 = vsyncpa [#allocation14], 1 }
 0x525   :  { %1408 = vsyncpa [#allocation14 + $0x1], 1 }

// kernel: tpu_custom_call.1
= control target key start
LH: loop header
LB: loop body
LE: loop exit
PB: predicated region body
PF: predicated region fallthrough
CT: control target
= control target key end

     0   :  { %s2953_s0 = inlined_call_operand.vmem [shape: s32[8], index: 0, kind: input, shape index: {}]   ;;  %s2954_s1 = inlined_call_operand.vmem [shape: bf16[64,32], index: 1, kind: input, shape index: {}]   ;;  %s2955_s2 = inlined_call_operand.hbm [shape: bf16[2,32,512], index: 2, kind: input, shape index: {}]   ;;  %s2956_s3 = inlined_call_operand.hbm [shape: bf16[2,128,512], index: 3, kind: input, shape index: {}]   ;;  %s2957_s4 = inlined_call_operand.vmem [shape: f32[2,1,512], index: 4, kind: input, shape index: {}]   ;;  %s2958_s5 = inlined_call_operand.hbm [shape: bf16[64,256], index: 5, kind: output, shape index: {0}]   ;;  %s2959_s6 = inlined_call_operand.hbm [shape: f32[2,8,128], index: 6, kind: output, shape index: {1}]  }
   0x1   :  { %2975 = sst [smem:[#allocation30_spill]] %s2954_s1  ;;  %s12_s23 = sshll.u32 %s2953_s0, 4  ;;  %s13_s23 = int_to_ptr.vmem [resolvable:$true] %s12_s23 }
   0x2   :  { %2976 = sst [smem:[#allocation31_spill]] %s2955_s2  ;;  %s1948_s24 = scalar_lea.vmem %s13_s23, 16 }
   0x3   :  { %2977 = sst [smem:[#allocation32_spill]] %s2956_s3  ;;  %p1949_p0 = scmp.ne.s32.totalorder %s13_s23, %s1948_s24 }
   0x4   :  { %2978 = sst [smem:[#allocation33_spill]] %s2958_s5  ;;  %p1953_p1 = scmp.lt.s32.totalorder %s13_s23, %s13_s23 }
   0x5   :  { %2979 = sst [smem:[#allocation34_spill]] %s2959_s6  ;;  %p1954_p2 = scmp.lt.s32.totalorder %s1948_s24, %s1948_s24 }
   0x7   :  { %p1955_p3 = por %p1954_p2, %p1953_p1 }
   0x9   :  { %p1956_p4 = pnand %p1955_p3, %p1949_p0 }
   0xb   :  { %1959 = shalt.err (!%p1956_p4)  }
   0xc   :  { %s2182_s25 = smov [#allocation6]  }
   0xd   :  { %15 = dma.vmem_to_smem %s13_s23, 16, %s2182_s25, [#allocation5] }
   0xe   :  { %2120 = dma.done.wait [#allocation5], 16 }
   0xf   :  { %2121 = vsyncadd [#allocation5], 4294967280 }
  0x10   :  { %17 = sfence }
  0x11   :  { %18 = vsyncpa [#allocation8], 0 }
  0x12   :  { %20 = vsyncpa [#allocation8 + $0x1], 0 }
  0x13   :  { %21 = vsyncpa [#allocation11], 0 }
  0x14   :  { %23 = vsyncpa [#allocation11 + $0x1], 0 }
  0x15   :  { %24 = vsyncpa [#allocation9], 0 }
  0x16   :  { %26 = vsyncpa [#allocation9 + $0x1], 0 }
  0x17   :  { %27 = vsyncpa [#allocation14], 0 }
  0x18   :  { %29 = vsyncpa [#allocation14 + $0x1], 0  ;;  %s2232_s0 = smov 0   ;;  %s2234_s26 = smov 0  }
  0x19   :  { %s2236_s27 = smov 0   ;;  %s2238_s28 = smov 0  }
  0x1a   :  { %s2240_s29 = smov 0   ;;  %s2242_s30 = smov 0  }
  0x1b   :  { %s2244_s7 = smov 0   ;;  %s2246_s8 = smov 0  }
  0x1c   :  { %s2248_s9 = smov 0   ;;  %s2250_s10 = smov 0  }
  0x1d   :  { %s2252_s11 = smov 0  }
  0x1e LB: > { %2980 = sst [smem:[#allocation20_spill]] %s2148_s27  ;;  %s1585_s12 = sadd.s32 4294967295, %s2180_s11   ;;  %s2180_s11 = sphi %s2252_s11, %s35_s11   ;;  %s2176_s10 = sphi %s2250_s10, %s3023_s10   ;;  %s2172_s9 = sphi %s2248_s9, %s3022_s9   ;;  %s2168_s8 = sphi %s2246_s8, %s3021_s8   ;;  %s2164_s7 = sphi %s2244_s7, %s3020_s7   ;;  %s2160_s30 = sphi %s2242_s30, %s3019_s30   ;;  %s2156_s29 = sphi %s2240_s29, %s3018_s29   ;;  %s2152_s28 = sphi %s2238_s28, %s3017_s28   ;;  %s2148_s27 = sphi %s2236_s27, %s3016_s27   ;;  %s2144_s26 = sphi %s2234_s26, %s3025_s26   ;;  %s2140_s0 = sphi %s2232_s0, %s3024_s0  }
  0x1f   : > { %2981 = sst [smem:[#allocation21_spill]] %s2156_s29  ;;  %s44_s14 = sadd.s32 1, %s2172_s9 }
  0x20   : > { %2982 = sst [smem:[#allocation22_spill]] %s2160_s30  ;;  %s47_s15 = sadd.s32 1, %s2176_s10 }
  0x21   : > { %2983 = sst [smem:[#allocation23_spill]] %s2172_s9  ;;  %p45_p5 = scmp.ge.s32.totalorder %s44_s14, 2 }
  0x22   : > { %2984 = sst [smem:[#allocation24_spill]] %s2176_s10  ;;  %s88_s16 = sadd.s32 1, %s2160_s30 }
  0x23   : > { %p95_p6 = scmp.ne.s32.totalorder %s2160_s30, %s2156_s29  ;;  %p96_p7 = scmp.eq.s32.totalorder %s2180_s11, 0 }
  0x24   : > { %s3027_s14 = smov (%p45_p5, %s44_s14), 0  ;;  %s3029_s15 = smov (!%p45_p5, %s47_s15), %s2176_s10 }
  0x25   : > { %2985 = sst [smem:[#allocation25_spill]] %s3027_s14  ;;  %p2301_p8 = por %p96_p7, %p95_p6 }
  0x26   : > { %p101_p9 = scmp.ne.s32.totalorder %s2156_s29, %s2152_s28  ;;  %p49_p10 = scmp.ge.s32.totalorder %s3029_s15, 2 }
  0x27   : > { %p102_p11 = scmp.eq.s32.totalorder %s1585_s12, 0  ;;  %s1589_s18 = sshll.u32 %s2176_s10, 1 }
  0x28   : > { %s176_s19 = sadd.s32 1, %s2148_s27  ;;  %s3031_s15 = smov (%p49_p10, %s3029_s15), 0 }
  0x29   : > { %2987 = sst [smem:[#allocation26_spill]] %s3031_s15  ;;  %p2314_p12 = por %p102_p11, %p101_p9 }
  0x2a   : > { %s164_s21 = ssub.s32 1, %s1589_s18  ;;  %s85_s22 = ssub.s32 %s2176_s10, %s3031_s15 }
  0x2b   : > { %s2988_s20 = scalar_select %p2314_p12, 1, 0 }
  0x2c   : > { %s165_s23 = smul.u32 %s2172_s9, %s164_s21  ;;  %p86_p13 = scmp.eq.s32.totalorder %s85_s22, 0 }
  0x2d   : > { %s1590_s24 = sshll.u32 %s3031_s15, 1  ;;  %p186_p0 = scmp.ne.s32.totalorder %s2148_s27, %s2144_s26 }
  0x2e   : > { %s166_s25 = sadd.s32 %s2176_s10, %s165_s23  ;;  %s168_s13 = ssub.s32 1, %s1590_s24 }
  0x2f   : > { %s2324_s6 = scalar_select %p86_p13, %s2160_s30, %s88_s16  }
  0x30   : > { %s169_s5 = smul.u32 %s168_s13, %s3027_s14  ;;  %p187_p1 = scmp.eq.s32.totalorder %s1585_s12, 3 }
  0x31   : > { %2989 = sst [smem:[#allocation27_spill]] %s2324_s6  ;;  %p192_p2 = scmp.ne.s32.totalorder %s2144_s26, %s2140_s0 }
  0x32   : > { %s170_s18 = sadd.s32 %s169_s5, %s3031_s15  ;;  %s2990_s21 = sadd.s32 4294967294, %s2180_s11  }
  0x33   : > { %p193_p3 = scmp.eq.s32.totalorder %s2990_s21, 3  ;;  %s171_s9 = ssub.s32 %s166_s25, %s170_s18 }
  0x34   : > { %p2334_p4 = por %p187_p1, %p186_p0  ;;  %s173_s23 = sor.u32 %s171_s9, %s85_s22 }
  0x35   : > { %p2338_p5 = por %p193_p3, %p192_p2  ;;  %p174_p7 = scmp.eq.s32.totalorder %s173_s23, 0 }
  0x36   : > { %s2991_s1 = scalar_select %p2334_p4, 1, 0 }
  0x37   : > { %s2992_s16 = scalar_select %p2338_p5, 1, 0 }
  0x38   : > { %p2345_p10 = por %p187_p1, %p95_p6  ;;  %p2352_p11 = por %p193_p3, %p101_p9 }
  0x39   : > { %s2357_s13 = scalar_select %p174_p7, %s2148_s27, %s176_s19  }
  0x3a   : > { %s2993_s12 = scalar_select %p2345_p10, 1, 0 }
  0x3b   : > { %s2994_s5 = scalar_select %p2352_p11, 1, 0 }
  0x3c   : > { %2996 = sst [smem:[#allocation29_spill]] %s2357_s13  ;;  %p1724_p13 = scmp.lt.s32.totalorder %s2180_s11, 4 }
  0x3d   : > { %2995 = sst [smem:[#allocation28_spill]] %s2994_s5  ;;  %s2361_s24 = sand.u32 1, %s2160_s30  }
  0x3e   : > { %s1593_s9 = sshll.u32 %s2361_s24, 6  ;;  %s1695_s22 = sshll.u32 %s2176_s10, 10 }
  0x3f   : > { %s2997_s2 = sld [smem:[#allocation31_spill]]  ;;  %s260_s23 = scalar_lea.vmem [#allocation7], %s1593_s9 }
  0x40   : > { %s267_s15 = sshll.u32 %s260_s23, 4  ;;  %p2374_p6 = pnand %p1724_p13, %p2301_p8  ;;  %s2370_s15 = int_to_ptr.vmem [resolvable:$true] %s267_s15 }
  0x42   : > { %p1962_p1 = pneg %p2374_p6 }
  0x45   : > { %s2368_s21 = scalar_lea.hbm %s2997_s2, %s1695_s22  ;;  %s1965_s17 = scalar_lea.hbm %s2997_s2, 2048 }
  0x46   : > { %s1960_s25 = scalar_lea.hbm %s2368_s21, 1024  ;;  %p1966_p8 = scmp.lt.u32.totalorder %s2368_s21, %s2997_s2 }
  0x47   : > { %p1961_p0 = scmp.ne.s32.totalorder %s2368_s21, %s1960_s25  ;;  %p1967_p7 = scmp.lt.u32.totalorder %s1965_s17, %s1960_s25 }
  0x48   : > { %p1969_p9 = scmp.lt.u32.totalorder %s1960_s25, %s2368_s21 }
  0x49   : > { %p1963_p2 = pnand %p1962_p1, %p1961_p0  ;;  %p1968_p13 = por %p1967_p7, %p1966_p8 }
  0x4b   : > { %p1964_p3 = pneg %p1963_p2  ;;  %p1970_p11 = por %p1969_p9, %p1968_p13 }
  0x4d   : > { %p1971_p5 = pnand %p1970_p11, %p1964_p3 }
  0x4f   : > { %1974 = shalt.err (!%p1971_p5)
}
  0x50   : > { %s1975_s14 = scalar_lea.vmem %s2370_s15, 1024  ;;  %s2183_s9 = smov [#allocation7]  }
  0x51   : > { %p1976_p0 = scmp.ne.s32.totalorder %s2370_s15, %s1975_s14  ;;  %s1980_s22 = sshll.u32 %s2183_s9, 4  ;;  %s1981_s22 = int_to_ptr.vmem [resolvable:$false] %s1980_s22 }
  0x52   : > { %s1982_s18 = scalar_lea.vmem %s1981_s22, 2048  ;;  %p1983_p4 = scmp.lt.s32.totalorder %s2370_s15, %s1981_s22 }
  0x53   : > { %p1978_p2 = pnand %p1976_p0, %p1962_p1  ;;  %p1984_p8 = scmp.lt.s32.totalorder %s1982_s18, %s1975_s14 }
  0x55   : > { %p1979_p10 = pneg %p1978_p2  ;;  %p1985_p7 = por %p1984_p8, %p1983_p4 }
  0x57   : > { %p1986_p9 = pnand %p1985_p7, %p1979_p10 }
  0x59   : > { %1989 = shalt.err (!%p1986_p9)
}
  0x5a   : > { %s2968_s25 = smov 256   ;;  %s2185_s17 = smov 16  }
  0x5b   : > { %s2999_s14 = scalar_lea.sflag [#allocation8], %s2361_s24  ;;  %p303_p4 = scmp.lt.s32.totalorder %s2180_s11, 5 }
  0x5c   : > { %1713 = dma.hbm_to_vmem [thread:$0]  (!%p2374_p6), %s2368_s21, 1024, %s2370_s15, %s2999_s14, %s2968_s25, %s2968_s25, %s2185_s17  }
  0x5d   : > { %s1596_s23 = sshll.u32 %s2361_s24, 8  ;;  %s1696_s9 = sshll.u32 %s2176_s10, 12 }
  0x5e   : > { %p3000_p5 = scmp.ge.s32.totalorder %s2180_s11, 1  ;;  %s3002_s3 = sld [smem:[#allocation32_spill]] }
  0x5f   : > { %s281_s30 = scalar_lea.vmem [#allocation10], %s1596_s23  ;;  %s278_s15 = scalar_lea.sflag [#allocation11], %s2361_s24 }
  0x60   : > { %p2415_p10 = pnand %p3000_p5, %p303_p4  ;;  %s288_s13 = sshll.u32 %s281_s30, 4  ;;  %s2424_s13 = int_to_ptr.vmem [resolvable:$true] %s288_s13 }
  0x64   : > { %s2422_s6 = scalar_lea.hbm %s3002_s3, %s1696_s9  ;;  %s1995_s2 = scalar_lea.hbm %s3002_s3, 8192 }
  0x65   : > { %s1990_s21 = scalar_lea.hbm %s2422_s6, 4096  ;;  %p1996_p0 = scmp.lt.u32.totalorder %s2422_s6, %s3002_s3 }
  0x66   : > { %p1991_p11 = scmp.ne.s32.totalorder %s2422_s6, %s1990_s21  ;;  %p1997_p2 = scmp.lt.u32.totalorder %s1995_s2, %s1990_s21 }
  0x67   : > { %p1999_p7 = scmp.lt.u32.totalorder %s1990_s21, %s2422_s6 }
  0x68   : > { %p1993_p3 = pnand %p1991_p11, %p1962_p1  ;;  %p1998_p8 = por %p1997_p2, %p1996_p0 }
  0x6a   : > { %p1994_p13 = pneg %p1993_p3  ;;  %p2000_p9 = por %p1999_p7, %p1998_p8 }
  0x6c   : > { %p2001_p4 = pnand %p2000_p9, %p1994_p13 }
  0x6e   : > { %2004 = shalt.err (!%p2001_p4)
}
  0x6f   : > { %s2005_s30 = scalar_lea.vmem %s2424_s13, 4096  ;;  %s2186_s25 = smov [#allocation10]  }
  0x70   : > { %p2006_p5 = scmp.ne.s32.totalorder %s2424_s13, %s2005_s30  ;;  %s2010_s23 = sshll.u32 %s2186_s25, 4  ;;  %s2011_s23 = int_to_ptr.vmem [resolvable:$false] %s2010_s23 }
  0x71   : > { %s2012_s14 = scalar_lea.vmem %s2011_s23, 8192  ;;  %p2013_p12 = scmp.lt.s32.totalorder %s2424_s13, %s2011_s23 }
  0x72   : > { %p2008_p11 = pnand %p2006_p5, %p1962_p1  ;;  %p2014_p0 = scmp.lt.s32.totalorder %s2012_s14, %s2005_s30 }
  0x74   : > { %p2009_p3 = pneg %p2008_p11  ;;  %p2015_p2 = por %p2014_p0, %p2013_p12 }
  0x76   : > { %p2016_p8 = pnand %p2015_p2, %p2009_p3 }
  0x78   : > { %2019 = shalt.err (!%p2016_p8)
}
  0x79   : > { %s3003_s21 = smov 256   ;;  %307 = sbr.rel (%p2415_p10) target bundleno = 1292 (0x50c), region = 36 }
  0x7a   : > { %1716 = dma.hbm_to_vmem [thread:$0]  (!%p2374_p6), %s2422_s6, 4096, %s2424_s13, %s278_s15, %s3003_s21, %s3003_s21, %s2185_s17  }
  0x7b   : > { %s2458_s2 = sand.u32 (!%p2415_p10), 1, %s2156_s29   ;;  %p3004_p12 = scmp.ne.s32.totalorder (!%p2415_p10), %s2988_s20, 0 }
  0x7c   : > { %s1600_s9 = sshll.u32 (!%p2415_p10), %s2458_s2, 6  ;;  %s310_s18 = scalar_lea.sflag (!%p2415_p10), [#allocation8], %s2458_s2 }
  0x7d   : > { %s2462_s19 = scalar_lea.vmem (!%p2415_p10), [#allocation7], %s1600_s9 }
  0x80   : > { %2123 = dma.done.wait (%p3004_p12), %s310_s18, 1024  }
  0x81   : > { %2125 = vsyncadd (%p3004_p12), %s310_s18, 4294966272  ;;  %s1601_s6 = sshll.u32 %s2458_s2, 8  ;;  %s319_s13 = scalar_lea.sflag [#allocation11], %s2458_s2 }
  0x82   : > { %s2470_s24 = scalar_lea.vmem [#allocation10], %s1601_s6 }
  0x83   : > { %2127 = dma.done.wait (%p3004_p12), %s319_s13, 4096  }
  0x84   : > { %2129 = vsyncadd (%p3004_p12), %s319_s13, 4294963200  ;;  %s2970_s17 = sand.u32 1, %s2144_s26   ;;  %s1603_s22 = sshll.u32 %s2458_s2, 3 }
  0x85   : > { %s1602_s15 = sshll.u32 %s2970_s17, 4  ;;  %s1604_s30 = sshll.u32 %s2168_s8, 1 }
  0x86   : > { %s2481_s25 = ssub.s32 1, %s1604_s30  ;;  %p386_p6 = scmp.lt.s32.totalorder %s2168_s8, 1 }
  0x87   : > { %s374_s23 = smul.u32 %s2164_s7, %s2481_s25  ;;  %s3005_s29 = sld [smem:[#allocation30_spill]] }
  0x88   : > { %s387_s20 = scalar_select %p386_p6, %s2168_s8, 1 }
  0x89   : > { %s2488_s14 = sadd.s32 %s2168_s8, %s374_s23  ;;  %s2505_s23 = scalar_lea.vmem [#allocation12], %s1602_s15 }
  0x8a   : > { %s2491_s21 = sshll.u32 %s2488_s14, 2  ;;  %s1607_s9 = sshll.u32 %s387_s20, 2 }
  0x8b   : > { %p377_p1 = scmp.lt.s32.totalorder %s2491_s21, 7  ;;  %s2497_s13 = scalar_lea.vmem %s2957_s4, %s1607_s9 }
  0x8c   : > { %s2507_s5 = scalar_lea.vmem [#allocation13], %s1603_s22  ;;  %p1610_p10 = scmp.ne.s32.totalorder %s2164_s7, 0 }
  0x8d   : > { %s378_s30 = scalar_select %p377_p1, %s2491_s21, 7 }
  0x8e   : > { %404 = sbr.rel (%p1610_p10) target bundleno = 149 (0x95), region = 48  ;;  %v2187_v0 = vmov (!%p1610_p10), 0.0  }
  0x8f   : > { %s1606_s17 = sshll.u32 %s378_s30, 2  ;;  %405 = vst [vmem:[#allocation3] sm:$0xff] (!%p1610_p10), %v2187_v0  ;;  %406 = vst [vmem:[#allocation4] sm:$0xff] (!%p1610_p10), %v2187_v0 }
  0x90   : > { %s2503_s27 = scalar_lea.vmem %s3005_s29, %s1606_s17 }
  0x95 PF: > { %v1822_v1 = vld [vmem:[%s2462_s19 + $0x4] ss:$16 sps:$4 sm:$0xff]   ;;  %v1824_v2 = vld [vmem:[%s2462_s19 + $0xc] ss:$16 sps:$4 sm:$0xff]   ;;  %v2188_v3 = vmov 0   ;;  %vm491_vm0 = vcmask 261120   ;;  %v421_v46 = vlaneseq }
  0x96   : > { %530 = vmatprep.mubr.bf16.mxu0 %v2188_v3  ;;  %583 = vmatprep.mubr.bf16.mxu1 %v2188_v3  ;;  %v1826_v4 = vld [vmem:[%s2462_s19] ss:$16 sps:$4 sm:$0xff]   ;;  %v1827_v5 = vld [vmem:[%s2462_s19 + $0x8] ss:$16 sps:$4 sm:$0xff]   ;;  %v1828_v6 = vld [vmem:[%s2462_s19 + $0x24] ss:$16 sps:$4 sm:$0xff]  }
  0x97   : > { %498 = vmatprep.subr.bf16.mxu0 %v1822_v1  ;;  %551 = vmatprep.subr.bf16.mxu1 %v1824_v2  ;;  %v1830_v7 = vld [vmem:[%s2462_s19 + $0x2c] ss:$16 sps:$4 sm:$0xff]   ;;  %v1832_v8 = vld [vmem:[%s2462_s19 + $0x20] ss:$16 sps:$4 sm:$0xff]   ;;  %v1833_v9 = vld [vmem:[%s2462_s19 + $0x28] ss:$16 sps:$4 sm:$0xff]  }
  0x98   : > { %499 = vmatpush1.bf16.msra.mxu0 %v1826_v4  ;;  %552 = vmatpush1.bf16.msra.mxu1 %v1827_v5  ;;  %v1834_v10 = vld [vmem:[%s2503_s27] sm:$0xff]   ;;  %v2525_v12 = vld [vmem:[%s2470_s24 + $0xc] ss:$16 sps:$4 sm:$0xff]   ;;  %v2531_v14 = vld [vmem:[%s2470_s24 + $0x8] ss:$16 sps:$4 sm:$0xff]   ;;  %v2698_v47 = vshrl.u32 %v421_v46, 7 }
  0x99   : > { %500 = vmatprep.subr.bf16.mxu0 %v1828_v6  ;;  %553 = vmatprep.subr.bf16.mxu1 %v1830_v7  ;;  %v2522_v11 = vld [vmem:[%s2470_s24 + $0x4] ss:$16 sps:$4 sm:$0xff]   ;;  %v2528_v13 = vld [vmem:[%s2470_s24] ss:$16 sps:$4 sm:$0xff]   ;;  %v2539_v16 = vld [vmem:[%s2470_s24 + $0x2c] ss:$16 sps:$4 sm:$0xff]  }
  0x9a   : > { %v2535_v15 = vld [vmem:[%s2470_s24 + $0x24] ss:$16 sps:$4 sm:$0xff]   ;;  %v2544_v17 = vld [vmem:[%s2470_s24 + $0x20] ss:$16 sps:$4 sm:$0xff]   ;;  %v2549_v18 = vld [vmem:[%s2470_s24 + $0x28] ss:$16 sps:$4 sm:$0xff]  }
  0x9b   : > { %v2554_v19 = vld [vmem:[%s2470_s24 + $0x44] ss:$16 sps:$4 sm:$0xff]   ;;  %v1847_v20 = vld [vmem:[%s2503_s27 + $0x8] sm:$0xff]   ;;  %v2563_v22 = vld [vmem:[%s2470_s24 + $0x40] ss:$16 sps:$4 sm:$0xff]   ;;  %v423_v48 = vsub.s32 0, %v2698_v47 }
  0x9c   : > { %501 = vmatpush1.bf16.msra.mxu0 %v1832_v8  ;;  %554 = vmatpush1.bf16.msra.mxu1 %v1833_v9  ;;  %v2560_v21 = vld [vmem:[%s2470_s24 + $0x4c] ss:$16 sps:$4 sm:$0xff]   ;;  %v2568_v23 = vld [vmem:[%s2470_s24 + $0x48] ss:$16 sps:$4 sm:$0xff]   ;;  %v2573_v24 = vld [vmem:[%s2470_s24 + $0x64] ss:$16 sps:$4 sm:$0xff]  }
  0x9d   : > { %828 = vmatprep.subr.bf16.mxu0 %v2522_v11  ;;  %869 = vmatprep.subr.bf16.mxu1 %v2525_v12  ;;  %v2576_v25 = vld [vmem:[%s2470_s24 + $0x6c] ss:$16 sps:$4 sm:$0xff]   ;;  %v2581_v26 = vld [vmem:[%s2470_s24 + $0x60] ss:$16 sps:$4 sm:$0xff]   ;;  %v2586_v27 = vld [vmem:[%s2470_s24 + $0x68] ss:$16 sps:$4 sm:$0xff]  }
  0x9e   : > { %v2589_v28 = vld [vmem:[%s2470_s24 + $0x84] ss:$16 sps:$4 sm:$0xff]   ;;  %v2594_v29 = vld [vmem:[%s2470_s24 + $0x8c] ss:$16 sps:$4 sm:$0xff]   ;;  %v2599_v30 = vld [vmem:[%s2470_s24 + $0x80] ss:$16 sps:$4 sm:$0xff]  }
  0x9f   : > { %1621 = vmatmul.mubr.msk.bf16.vlgmr.msra.gmra.mrb[0].mxu0 %vm491_vm0, %v1834_v10  ;;  %1623 = vmatmul.mubr.msk.bf16.vlgmr.msra.gmra.mrb[0].mxu1 %vm491_vm0, %v1834_v10  ;;  %v2604_v31 = vld [vmem:[%s2470_s24 + $0x88] ss:$16 sps:$4 sm:$0xff]   ;;  %v2609_v32 = vld [vmem:[%s2470_s24 + $0xa4] ss:$16 sps:$4 sm:$0xff]   ;;  %v2612_v33 = vld [vmem:[%s2470_s24 + $0xac] ss:$16 sps:$4 sm:$0xff]  }
  0xa0   : > { %829 = vmatpush1.bf16.msra.mxu0 %v2528_v13  ;;  %870 = vmatpush1.bf16.msra.mxu1 %v2531_v14  ;;  %v2617_v34 = vld [vmem:[%s2470_s24 + $0xa0] ss:$16 sps:$4 sm:$0xff]   ;;  %v2620_v35 = vld [vmem:[%s2470_s24 + $0xa8] ss:$16 sps:$4 sm:$0xff]   ;;  %v2625_v36 = vld [vmem:[%s2470_s24 + $0xc4] ss:$16 sps:$4 sm:$0xff]  }
  0xa1   : > { %830 = vmatprep.subr.bf16.mxu0 %v2535_v15  ;;  %871 = vmatprep.subr.bf16.mxu1 %v2539_v16  ;;  %v2628_v37 = vld [vmem:[%s2470_s24 + $0xcc] ss:$16 sps:$4 sm:$0xff]   ;;  %v2633_v38 = vld [vmem:[%s2470_s24 + $0xc0] ss:$16 sps:$4 sm:$0xff]   ;;  %v2636_v39 = vld [vmem:[%s2470_s24 + $0xc8] ss:$16 sps:$4 sm:$0xff]  }
  0xa2   : > { %540 = vmatprep.mubr.bf16.mxu0 %v2188_v3  ;;  %593 = vmatprep.mubr.bf16.mxu1 %v2188_v3  ;;  %v2641_v40 = vld [vmem:[%s2470_s24 + $0xe4] ss:$16 sps:$4 sm:$0xff]   ;;  %v2644_v41 = vld [vmem:[%s2470_s24 + $0xec] ss:$16 sps:$4 sm:$0xff]   ;;  %v2649_v42 = vld [vmem:[%s2470_s24 + $0xe0] ss:$16 sps:$4 sm:$0xff]  }
  0xa3   : > { %v2652_v43 = vld [vmem:[%s2470_s24 + $0xe8] ss:$16 sps:$4 sm:$0xff]   ;;  %v2654_v44 = vld [vmem:[#allocation3] sm:$0xff]  ;;  %v431_v49 = vsub.s32 2, %v2698_v47  ;;  %v427_v51 = vsub.s32 1, %v2698_v47  ;;  %v435_v52 = vsub.s32 3, %v2698_v47 }
  0xa4   : > { %831 = vmatpush1.bf16.msra.mxu0 %v2544_v17  ;;  %872 = vmatpush1.bf16.msra.mxu1 %v2549_v18  ;;  %v667_v45 = vpack.c.bf16 %v2654_v44, %v2654_v44  ;;  %v419_v50 = vld [vmem:[%s2497_s13] sm:$0xf]  ;;  %s657_s3 = smul.u32 24, %s2168_s8  ;;  %p1685_p13 = scmp.ne.s32.totalorder %s2164_s7, 1 }
  0xa5   : > { %832 = vmatprep.subr.bf16.mxu0 %v2554_v19  ;;  %873 = vmatprep.subr.bf16.mxu1 %v2560_v21  ;;  %v424_v53 = vrot.slane %v419_v50, %v423_v48  ;;  %v432_v54 = vrot.slane %v419_v50, %v431_v49  ;;  %v428_v55 = vrot.slane %v419_v50, %v427_v51  ;;  %s2710_s19 = smul.u32 3, %s2168_s8 }
  0xa6   : > { %v436_v56 = vrot.slane %v419_v50, %v435_v52  ;;  %s2706_s27 = sshra.s32 %s657_s3, 3 }
  0xa7   : > { %1622 = vmatmul.mubr.msk.bf16.gmra.mrb[4].mxu0 %vm491_vm0, %v1847_v20  ;;  %1624 = vmatmul.mubr.msk.bf16.gmra.mrb[4].mxu1 %vm491_vm0, %v1847_v20  ;;  %s1697_s29 = sshll.u32 %s2706_s27, 5  ;;  %s938_s24 = sadd.s32 %s2491_s21, %s2710_s19 }
  0xa8   : > { %833 = vmatpush1.bf16.msra.mxu0 %v2563_v22  ;;  %874 = vmatpush1.bf16.msra.mxu1 %v2568_v23  ;;  %s662_s10 = scalar_lea.vmem [#allocation2], %s1697_s29  ;;  %s939_s17 = sld [smem:[#allocation6 + %s938_s24]] }
  0xa9   : > { %834 = vmatprep.subr.bf16.mxu0 %v2573_v24  ;;  %875 = vmatprep.subr.bf16.mxu1 %v2576_v25  ;;  %s1662_s22 = sshll.u32 %s2706_s27, 2  ;;  %s2760_s20 = sadd.s32 %s2710_s19, %s2481_s25 }
  0xaa   : > { %860 = vmatprep.mubr.bf16.mxu0 %v2188_v3  ;;  %901 = vmatprep.mubr.bf16.mxu1 %v2188_v3  ;;  %s949_s15 = scalar_lea.vmem %s2505_s23, %s1662_s22 [#allocation12]  ;;  %s1663_s9 = sshll.u32 %s2760_s20, 3 }
  0xab   : > { %s2763_s18 = sshra.s32 %s1663_s9, 3  ;;  %s1073_s30 = sadd.s32 %s2491_s21, %s2760_s20 }
  0xac   : > { %835 = vmatpush1.bf16.msra.mxu0 %v2581_v26  ;;  %876 = vmatpush1.bf16.msra.mxu1 %v2586_v27  ;;  %s1698_s6 = sshll.u32 %s2763_s18, 5  ;;  %s1074_s3 = sld [smem:[#allocation6 + %s1073_s30]] }
  0xad   : > { %836 = vmatprep.subr.bf16.mxu0 %v2589_v28  ;;  %877 = vmatprep.subr.bf16.mxu1 %v2594_v29  ;;  %s957_s13 = scalar_lea.vmem [#allocation2], %s1698_s6  ;;  %s1669_s27 = sshll.u32 %s2763_s18, 2 }
  0xae   : > { %s1084_s29 = scalar_lea.vmem %s2505_s23, %s1669_s27 [#allocation12]  ;;  %s1222_s30 = smul.u32 3, %s2481_s25 }
  0xb0   : > { %837 = vmatpush1.bf16.msra.mxu0 %v2599_v30  ;;  %878 = vmatpush1.bf16.msra.mxu1 %v2604_v31 }
  0xb1   : > { %838 = vmatprep.subr.bf16.mxu0 %v2609_v32  ;;  %879 = vmatprep.subr.bf16.mxu1 %v2612_v33 }
  0xb4   : > { %839 = vmatpush1.bf16.msra.mxu0 %v2617_v34  ;;  %880 = vmatpush1.bf16.msra.mxu1 %v2620_v35 }
  0xb5   : > { %840 = vmatprep.subr.bf16.mxu0 %v2625_v36  ;;  %881 = vmatprep.subr.bf16.mxu1 %v2628_v37 }
  0xb8   : > { %841 = vmatpush1.bf16.msra.mxu0 %v2633_v38  ;;  %882 = vmatpush1.bf16.msra.mxu1 %v2636_v39 }
  0xb9   : > { %842 = vmatprep.subr.bf16.mxu0 %v2641_v40  ;;  %883 = vmatprep.subr.bf16.mxu1 %v2644_v41 }
  0xbc   : > { %843 = vmatpush1.bf16.msra.mxu0 %v2649_v42  ;;  %884 = vmatpush1.bf16.msra.mxu1 %v2652_v43 }
  0xbd   : > { %963 = vmatprep.subr.bf16.mxu0 %v2522_v11  ;;  %1004 = vmatprep.subr.bf16.mxu1 %v2525_v12 }
  0xbf   : > { %861 = vmatmul.mubr.bf16.vlgmr.msra.gmra.mrb[8].mxu0 %v667_v45  ;;  %902 = vmatmul.mubr.bf16.vlgmr.msra.gmra.mrb[8].mxu1 %v667_v45 }
  0xc0   : > { %964 = vmatpush1.bf16.msra.mxu0 %v2528_v13  ;;  %1005 = vmatpush1.bf16.msra.mxu1 %v2531_v14 }
  0xc1   : > { %965 = vmatprep.subr.bf16.mxu0 %v2535_v15  ;;  %1006 = vmatprep.subr.bf16.mxu1 %v2539_v16 }
  0xc2   : > { %995 = vmatprep.mubr.bf16.mxu0 %v2188_v3  ;;  %1036 = vmatprep.mubr.bf16.mxu1 %v2188_v3 }
  0xc4   : > { %966 = vmatpush1.bf16.msra.mxu0 %v2544_v17  ;;  %1007 = vmatpush1.bf16.msra.mxu1 %v2549_v18 }
  0xc5   : > { %967 = vmatprep.subr.bf16.mxu0 %v2554_v19  ;;  %1008 = vmatprep.subr.bf16.mxu1 %v2560_v21 }
  0xc8   : > { %968 = vmatpush1.bf16.msra.mxu0 %v2563_v22  ;;  %1009 = vmatpush1.bf16.msra.mxu1 %v2568_v23 }
  0xc9   : > { %969 = vmatprep.subr.bf16.mxu0 %v2573_v24  ;;  %1010 = vmatprep.subr.bf16.mxu1 %v2576_v25 }
  0xcc   : > { %970 = vmatpush1.bf16.msra.mxu0 %v2581_v26  ;;  %1011 = vmatpush1.bf16.msra.mxu1 %v2586_v27 }
  0xcd   : > { %971 = vmatprep.subr.bf16.mxu0 %v2589_v28  ;;  %1012 = vmatprep.subr.bf16.mxu1 %v2594_v29 }
  0xd0   : > { %972 = vmatpush1.bf16.msra.mxu0 %v2599_v30  ;;  %1013 = vmatpush1.bf16.msra.mxu1 %v2604_v31 }
  0xd1   : > { %973 = vmatprep.subr.bf16.mxu0 %v2609_v32  ;;  %1014 = vmatprep.subr.bf16.mxu1 %v2612_v33 }
  0xd4   : > { %974 = vmatpush1.bf16.msra.mxu0 %v2617_v34  ;;  %1015 = vmatpush1.bf16.msra.mxu1 %v2620_v35 }
  0xd5   : > { %975 = vmatprep.subr.bf16.mxu0 %v2625_v36  ;;  %1016 = vmatprep.subr.bf16.mxu1 %v2628_v37 }
  0xd8   : > { %976 = vmatpush1.bf16.msra.mxu0 %v2633_v38  ;;  %1017 = vmatpush1.bf16.msra.mxu1 %v2636_v39 }
  0xd9   : > { %977 = vmatprep.subr.bf16.mxu0 %v2641_v40  ;;  %1018 = vmatprep.subr.bf16.mxu1 %v2644_v41 }
  0xdc   : > { %978 = vmatpush1.bf16.msra.mxu0 %v2649_v42  ;;  %1019 = vmatpush1.bf16.msra.mxu1 %v2652_v43 }
  0xdd   : > { %1099 = vmatprep.subr.bf16.mxu0 %v2522_v11  ;;  %1140 = vmatprep.subr.bf16.mxu1 %v2525_v12 }
 0x172   : > { %v532_v57 = vpop.f32.mrb[0].mxu0  ;;  %v585_v58 = vpop.f32.mrb[0].mxu1 }
 0x173   : > { %v533_v59 = vadd.f32 %v532_v57, %v424_v53  ;;  %v534_v60 = vpop.f32.mrb[1].mxu0  ;;  %v586_v61 = vadd.f32 %v585_v58, %v432_v54  ;;  %v587_v62 = vpop.f32.mrb[1].mxu1 }
 0x174   : > { %v535_v63 = vadd.f32 %v534_v60, %v428_v55  ;;  %v536_v0 = vpop.f32.mrb[2].mxu0  ;;  %v588_v1 = vadd.f32 %v587_v62, %v436_v56  ;;  %v589_v2 = vpop.f32.mrb[2].mxu1 }
 0x175   : > { %604 = vst [vmem:[#allocation2] sm:$0xff] %v533_v59  ;;  %v537_v4 = vadd.f32 %v536_v0, %v424_v53  ;;  %v538_v5 = vpop.f32.mrb[3].mxu0  ;;  %606 = vst [vmem:[#allocation2 + $0x10] sm:$0xff] %v586_v61  ;;  %v590_v6 = vadd.f32 %v589_v2, %v432_v54  ;;  %v591_v7 = vpop.f32.mrb[3].mxu1 }
 0x176   : > { %605 = vst [vmem:[#allocation2 + $0x8] sm:$0xff] %v535_v63  ;;  %v539_v8 = vadd.f32 %v538_v5, %v428_v55  ;;  %607 = vst [vmem:[#allocation2 + $0x18] sm:$0xff] %v588_v1  ;;  %v592_v9 = vadd.f32 %v591_v7, %v436_v56 }
 0x177   : > { %608 = vst [vmem:[#allocation2 + $0x20] sm:$0xff] %v537_v4  ;;  %610 = vst [vmem:[#allocation2 + $0x30] sm:$0xff] %v590_v6 }
 0x178   : > { %609 = vst [vmem:[#allocation2 + $0x28] sm:$0xff] %v539_v8  ;;  %611 = vst [vmem:[#allocation2 + $0x38] sm:$0xff] %v592_v9 }
 0x17a   : > { %v542_v10 = vpop.f32.mrb[4].mxu0  ;;  %v595_v20 = vpop.f32.mrb[4].mxu1 }
 0x17b   : > { %v543_v45 = vadd.f32 %v542_v10, %v424_v53  ;;  %v596_v46 = vadd.f32 %v595_v20, %v432_v54  ;;  %v544_v48 = vpop.f32.mrb[5].mxu0  ;;  %v597_v49 = vpop.f32.mrb[5].mxu1 }
 0x17c   : > { %v545_v50 = vadd.f32 %v544_v48, %v428_v55  ;;  %v598_v51 = vadd.f32 %v597_v49, %v436_v56  ;;  %v546_v52 = vpop.f32.mrb[6].mxu0  ;;  %v599_v57 = vpop.f32.mrb[6].mxu1 }
 0x17d   : > { %612 = vst [vmem:[#allocation2 + $0x40] sm:$0xff] %v543_v45  ;;  %614 = vst [vmem:[#allocation2 + $0x50] sm:$0xff] %v596_v46  ;;  %v547_v58 = vadd.f32 %v546_v52, %v424_v53  ;;  %v600_v59 = vadd.f32 %v599_v57, %v432_v54  ;;  %v548_v60 = vpop.f32.mrb[7].mxu0  ;;  %v601_v61 = vpop.f32.mrb[7].mxu1 }
 0x17e   : > { %613 = vst [vmem:[#allocation2 + $0x48] sm:$0xff] %v545_v50  ;;  %615 = vst [vmem:[#allocation2 + $0x58] sm:$0xff] %v598_v51  ;;  %v549_v62 = vadd.f32 %v548_v60, %v428_v55  ;;  %v602_v63 = vadd.f32 %v601_v61, %v436_v56  ;;  %v656_v60 = vld [vmem:[#allocation4] sm:$0xff] }
 0x17f   : > { %616 = vst [vmem:[#allocation2 + $0x60] sm:$0xff] %v547_v58  ;;  %618 = vst [vmem:[#allocation2 + $0x70] sm:$0xff] %v600_v59 }
 0x180   : > { %617 = vst [vmem:[#allocation2 + $0x68] sm:$0xff] %v549_v62  ;;  %619 = vst [vmem:[#allocation2 + $0x78] sm:$0xff] %v602_v63  ;;  %v940_v62 = vstv %s939_s17 }
 0x181   : > { %vm941_vm1 = vcmp.lt.s32.totalorder %v2698_v47, %v940_v62 }
 0x187   : > { %v663_v0 = vld [vmem:[%s662_s10] sm:$0xff]  ;;  %v664_v2 = vld [vmem:[%s662_s10 + $0x8] sm:$0xff]  ;;  %v666_v20 = vld [vmem:[%s662_s10 + $0x18] sm:$0xff] }
 0x188   : > { %v665_v46 = vld [vmem:[%s662_s10 + $0x10] sm:$0xff]  ;;  %s1670_s10 = sshll.u32 %s2481_s25, 1 }
 0x189   : > { %s2814_s24 = sadd.s32 %s1670_s10, %s2710_s19 }
 0x18a   : > { %s1671_s17 = sshll.u32 %s2814_s24, 3  ;;  %s1209_s9 = sadd.s32 %s2491_s21, %s2814_s24 }
 0x18b   : > { %s2817_s22 = sshra.s32 %s1671_s17, 3  ;;  %s1210_s18 = sld [smem:[#allocation6 + %s1209_s9]] }
 0x18c   : > { %s1677_s6 = sshll.u32 %s2817_s22, 2 }
 0x192   : > { %v862_v1 = vpop.f32.mrb[8].mxu0  ;;  %v903_v53 = vpop.f32.mrb[8].mxu1 }
 0x193   : > { %v910_v54 = vadd.f32 %v862_v1, %v663_v0  ;;  %v864_v4 = vpop.f32.mrb[9].mxu0  ;;  %v905_v5 = vpop.f32.mrb[9].mxu1  ;;  %v912_v49 = vadd.f32 %v903_v53, %v665_v46 }
 0x194   : > { %v911_v55 = vadd.f32 %v864_v4, %v664_v2  ;;  %v866_v56 = vpop.f32.mrb[10].mxu0  ;;  %v907_v6 = vpop.f32.mrb[10].mxu1  ;;  %v913_v45 = vadd.f32 %v905_v5, %v666_v20 }
 0x195   : > { %v1659_v7 = vmul.f32 -1.442695, %v910_v54  ;;  %v867_v8 = vpop.f32.mrb[11].mxu0  ;;  %v908_v9 = vpop.f32.mrb[11].mxu1 }
 0x196   : > { %v1660_v10 = vmul.f32 -1.442695, %v911_v55  ;;  %v1661_v48 = vmul.f32 -1.442695, %v913_v45 }
 0x197   : > { %1884 = vpow2.f32 %v1659_v7 }
 0x198   : > { %1886 = vpow2.f32 %v1660_v10  ;;  %v960_v10 = vld [vmem:[%s957_s13 + $0x10] sm:$0xff] }
 0x199   : > { %1888 = vpow2.f32 %v1661_v48  ;;  %v959_v48 = vld [vmem:[%s957_s13 + $0x8] sm:$0xff] }
 0x19a   : > { %1890 = vtanh.f32 %v912_v49 }
 0x1a1   : > { %v1885_v50 = vpop.eup %1884 }
 0x1a2   : > { %v1887_v51 = vpop.eup %1886  ;;  %v917_v52 = vadd.f32 1.0, %v1885_v50 }
 0x1a3   : > { %v923_v57 = vadd.f32 1.0, %v1887_v51  ;;  %v1889_v58 = vpop.eup %1888 }
 0x1a4   : > { %1892 = vrcp.f32 %v917_v52  ;;  %v1891_v59 = vpop.eup %1890  ;;  %v930_v1 = vadd.f32 1.0, %v1889_v58 }
 0x1a5   : > { %1894 = vrcp.f32 %v923_v57 }
 0x1a6   : > { %1896 = vrcp.f32 %v930_v1 }
 0x1ae   : > { %v1893_v61 = vpop.eup %1892 }
 0x1af   : > { %v1895_v63 = vpop.eup %1894  ;;  %v934_v0 = vmul.f32 %v1893_v61, %v1891_v59 }
 0x1b0   : > { %v933_v53 = vmul.f32 %v1895_v63, %v656_v60  ;;  %v1897_v4 = vpop.eup %1896 }
 0x1b2   : > { %v935_v54 = vadd.f32 %v934_v0, %v933_v53 }
 0x1b4   : > { %1898 = vtanh.f32 %v935_v54  ;;  %v2715_v2 = vsel %vm941_vm1, %v935_v54, %v656_v60 }
 0x1be   : > { %v1899_v5 = vpop.eup %1898 }
 0x1bf   : > { %v937_v55 = vmul.f32 %v1899_v5, %v1897_v4 }
 0x1c1   : > { %v2719_v56 = vsel %vm941_vm1, %v937_v55, %v2654_v44  ;;  %v946_v6 = vsel %vm941_vm1, %v937_v55, 0.0  ;;  %v958_v44 = vld [vmem:[%s957_s13] sm:$0xff]  ;;  %v1075_v55 = vstv %s1074_s3  ;;  %s2836_s3 = sadd.s32 %s1222_s30, %s2710_s19 }
 0x1c2   : > { %v947_v7 = vpack.c.bf16 %v946_v6, %v946_v6  ;;  %v962_v8 = vpack.c.bf16 %v2719_v56, %v2719_v56  ;;  %vm1076_vm2 = vcmp.lt.s32.totalorder %v2698_v47, %v1075_v55  ;;  %s1678_s27 = sshll.u32 %s2836_s3, 3  ;;  %s1345_s25 = sadd.s32 %s2491_s21, %s2836_s3 }
 0x1c3   : > { %s1346_s19 = sld [smem:[#allocation6 + %s1345_s25]] }
 0x1c4   : > { %950 = vst [vmem:[%s949_s15] sm:$0xf] %v947_v7  ;;  %996 = vmatmul.mubr.bf16.vlgmr.msra.gmra.mrb[12].mxu0 %v962_v8  ;;  %1037 = vmatmul.mubr.bf16.vlgmr.msra.gmra.mrb[12].mxu1 %v962_v8  ;;  %s1699_s15 = sshll.u32 %s2817_s22, 5 }
 0x1c5   : > { %1100 = vmatpush1.bf16.msra.mxu0 %v2528_v13  ;;  %1141 = vmatpush1.bf16.msra.mxu1 %v2531_v14  ;;  %s1093_s20 = scalar_lea.vmem [#allocation2], %s1699_s15 }
 0x1c6   : > { %1101 = vmatprep.subr.bf16.mxu0 %v2535_v15  ;;  %1142 = vmatprep.subr.bf16.mxu1 %v2539_v16 }
 0x1c7   : > { %1131 = vmatprep.mubr.bf16.mxu0 %v2188_v3  ;;  %1172 = vmatprep.mubr.bf16.mxu1 %v2188_v3 }
 0x1c9   : > { %1102 = vmatpush1.bf16.msra.mxu0 %v2544_v17  ;;  %1143 = vmatpush1.bf16.msra.mxu1 %v2549_v18 }
 0x1ca   : > { %1103 = vmatprep.subr.bf16.mxu0 %v2554_v19  ;;  %1144 = vmatprep.subr.bf16.mxu1 %v2560_v21 }
 0x1cd   : > { %1104 = vmatpush1.bf16.msra.mxu0 %v2563_v22  ;;  %1145 = vmatpush1.bf16.msra.mxu1 %v2568_v23 }
 0x1ce   : > { %1105 = vmatprep.subr.bf16.mxu0 %v2573_v24  ;;  %1146 = vmatprep.subr.bf16.mxu1 %v2576_v25 }
 0x1d1   : > { %1106 = vmatpush1.bf16.msra.mxu0 %v2581_v26  ;;  %1147 = vmatpush1.bf16.msra.mxu1 %v2586_v27 }
 0x1d2   : > { %1107 = vmatprep.subr.bf16.mxu0 %v2589_v28  ;;  %1148 = vmatprep.subr.bf16.mxu1 %v2594_v29 }
 0x1d5   : > { %1108 = vmatpush1.bf16.msra.mxu0 %v2599_v30  ;;  %1149 = vmatpush1.bf16.msra.mxu1 %v2604_v31 }
 0x1d6   : > { %1109 = vmatprep.subr.bf16.mxu0 %v2609_v32  ;;  %1150 = vmatprep.subr.bf16.mxu1 %v2612_v33 }
 0x1d9   : > { %1110 = vmatpush1.bf16.msra.mxu0 %v2617_v34  ;;  %1151 = vmatpush1.bf16.msra.mxu1 %v2620_v35 }
 0x1da   : > { %1111 = vmatprep.subr.bf16.mxu0 %v2625_v36  ;;  %1152 = vmatprep.subr.bf16.mxu1 %v2628_v37 }
 0x1dd   : > { %1112 = vmatpush1.bf16.msra.mxu0 %v2633_v38  ;;  %1153 = vmatpush1.bf16.msra.mxu1 %v2636_v39 }
 0x1de   : > { %1113 = vmatprep.subr.bf16.mxu0 %v2641_v40  ;;  %1154 = vmatprep.subr.bf16.mxu1 %v2644_v41 }
 0x1e1   : > { %1114 = vmatpush1.bf16.msra.mxu0 %v2649_v42  ;;  %1155 = vmatpush1.bf16.msra.mxu1 %v2652_v43 }
 0x1e2   : > { %1235 = vmatprep.subr.bf16.mxu0 %v2522_v11  ;;  %1276 = vmatprep.subr.bf16.mxu1 %v2525_v12  ;;  %v961_v11 = vld [vmem:[%s957_s13 + $0x18] sm:$0xff]  ;;  %s1220_s13 = scalar_lea.vmem %s2505_s23, %s1677_s6 [#allocation12] }
 0x297   : > { %v997_v9 = vpop.f32.mrb[12].mxu0  ;;  %v1038_v20 = vpop.f32.mrb[12].mxu1 }
 0x298   : > { %v1045_v45 = vadd.f32 %v997_v9, %v958_v44  ;;  %v1047_v46 = vadd.f32 %v1038_v20, %v960_v10  ;;  %v999_v49 = vpop.f32.mrb[13].mxu0  ;;  %v1040_v50 = vpop.f32.mrb[13].mxu1 }
 0x299   : > { %v1046_v12 = vadd.f32 %v999_v49, %v959_v48  ;;  %v1048_v51 = vadd.f32 %v1040_v50, %v961_v11  ;;  %v1001_v52 = vpop.f32.mrb[14].mxu0  ;;  %v1042_v57 = vpop.f32.mrb[14].mxu1 }
 0x29a   : > { %v1666_v58 = vmul.f32 -1.442695, %v1045_v45  ;;  %v1002_v59 = vpop.f32.mrb[15].mxu0  ;;  %v1043_v60 = vpop.f32.mrb[15].mxu1 }
 0x29b   : > { %v1667_v61 = vmul.f32 -1.442695, %v1046_v12  ;;  %v1668_v62 = vmul.f32 -1.442695, %v1048_v51 }
 0x29c   : > { %1900 = vpow2.f32 %v1666_v58 }
 0x29d   : > { %1902 = vpow2.f32 %v1667_v61 }
 0x29e   : > { %1904 = vpow2.f32 %v1668_v62 }
 0x29f   : > { %1906 = vtanh.f32 %v1047_v46 }
 0x2a6   : > { %v1901_v63 = vpop.eup %1900 }
 0x2a7   : > { %v1903_v0 = vpop.eup %1902  ;;  %v1052_v1 = vadd.f32 1.0, %v1901_v63 }
 0x2a8   : > { %v1058_v53 = vadd.f32 1.0, %v1903_v0  ;;  %v1905_v54 = vpop.eup %1904 }
 0x2a9   : > { %1908 = vrcp.f32 %v1052_v1  ;;  %v1907_v4 = vpop.eup %1906  ;;  %v1065_v8 = vadd.f32 1.0, %v1905_v54 }
 0x2aa   : > { %1910 = vrcp.f32 %v1058_v53 }
 0x2ab   : > { %1912 = vrcp.f32 %v1065_v8 }
 0x2b3   : > { %v1909_v5 = vpop.eup %1908 }
 0x2b4   : > { %v1911_v6 = vpop.eup %1910  ;;  %v1069_v7 = vmul.f32 %v1909_v5, %v1907_v4 }
 0x2b5   : > { %v1068_v44 = vmul.f32 %v1911_v6, %v2715_v2  ;;  %v1913_v20 = vpop.eup %1912 }
 0x2b7   : > { %v1070_v9 = vadd.f32 %v1069_v7, %v1068_v44 }
 0x2b9   : > { %1914 = vtanh.f32 %v1070_v9  ;;  %v2771_v10 = vsel %vm1076_vm2, %v1070_v9, %v2715_v2 }
 0x2c3   : > { %v1915_v45 = vpop.eup %1914 }
 0x2c4   : > { %v1072_v46 = vmul.f32 %v1915_v45, %v1913_v20 }
 0x2c6   : > { %v2775_v48 = vsel %vm1076_vm2, %v1072_v46, %v2719_v56  ;;  %v1081_v49 = vsel %vm1076_vm2, %v1072_v46, 0.0 }
 0x2c7   : > { %v1082_v11 = vpack.c.bf16 %v1081_v49, %v1081_v49  ;;  %v1098_v50 = vpack.c.bf16 %v2775_v48, %v2775_v48 }
 0x2c9   : > { %1085 = vst [vmem:[%s1084_s29] sm:$0xf] %v1082_v11  ;;  %1132 = vmatmul.mubr.bf16.vlgmr.msra.gmra.mrb[16].mxu0 %v1098_v50  ;;  %1173 = vmatmul.mubr.bf16.vlgmr.msra.gmra.mrb[16].mxu1 %v1098_v50  ;;  %s2839_s29 = sshra.s32 %s1678_s27, 3 }
 0x2ca   : > { %1236 = vmatpush1.bf16.msra.mxu0 %v2528_v13  ;;  %1277 = vmatpush1.bf16.msra.mxu1 %v2531_v14  ;;  %v1096_v14 = vld [vmem:[%s1093_s20 + $0x10] sm:$0xff]  ;;  %s1700_s10 = sshll.u32 %s2839_s29, 5  ;;  %s1684_s21 = sshll.u32 %s2839_s29, 2 }
 0x2cb   : > { %1237 = vmatprep.subr.bf16.mxu0 %v2535_v15  ;;  %1278 = vmatprep.subr.bf16.mxu1 %v2539_v16  ;;  %s1229_s24 = scalar_lea.vmem [#allocation2], %s1700_s10  ;;  %s1356_s17 = scalar_lea.vmem %s2505_s23, %s1684_s21 [#allocation12] }
 0x2cc   : > { %1267 = vmatprep.mubr.bf16.mxu0 %v2188_v3  ;;  %1308 = vmatprep.mubr.bf16.mxu1 %v2188_v3  ;;  %v1094_v3 = vld [vmem:[%s1093_s20] sm:$0xff]  ;;  %v1232_v63 = vld [vmem:[%s1229_s24 + $0x10] sm:$0xff]  ;;  %v1231_v54 = vld [vmem:[%s1229_s24 + $0x8] sm:$0xff] }
 0x2cd   : > { %v1230_v61 = vld [vmem:[%s1229_s24] sm:$0xff]  ;;  %v1233_v5 = vld [vmem:[%s1229_s24 + $0x18] sm:$0xff] }
 0x2ce   : > { %1238 = vmatpush1.bf16.msra.mxu0 %v2544_v17  ;;  %1279 = vmatpush1.bf16.msra.mxu1 %v2549_v18  ;;  %v1095_v18 = vld [vmem:[%s1093_s20 + $0x8] sm:$0xff] }
 0x2cf   : > { %1239 = vmatprep.subr.bf16.mxu0 %v2554_v19  ;;  %1280 = vmatprep.subr.bf16.mxu1 %v2560_v21  ;;  %v1097_v21 = vld [vmem:[%s1093_s20 + $0x18] sm:$0xff] }
 0x2d2   : > { %1240 = vmatpush1.bf16.msra.mxu0 %v2563_v22  ;;  %1281 = vmatpush1.bf16.msra.mxu1 %v2568_v23 }
 0x2d3   : > { %1241 = vmatprep.subr.bf16.mxu0 %v2573_v24  ;;  %1282 = vmatprep.subr.bf16.mxu1 %v2576_v25 }
 0x2d6   : > { %1242 = vmatpush1.bf16.msra.mxu0 %v2581_v26  ;;  %1283 = vmatpush1.bf16.msra.mxu1 %v2586_v27 }
 0x2d7   : > { %1243 = vmatprep.subr.bf16.mxu0 %v2589_v28  ;;  %1284 = vmatprep.subr.bf16.mxu1 %v2594_v29 }
 0x2da   : > { %1244 = vmatpush1.bf16.msra.mxu0 %v2599_v30  ;;  %1285 = vmatpush1.bf16.msra.mxu1 %v2604_v31 }
 0x2db   : > { %1245 = vmatprep.subr.bf16.mxu0 %v2609_v32  ;;  %1286 = vmatprep.subr.bf16.mxu1 %v2612_v33 }
 0x2de   : > { %1246 = vmatpush1.bf16.msra.mxu0 %v2617_v34  ;;  %1287 = vmatpush1.bf16.msra.mxu1 %v2620_v35 }
 0x2df   : > { %1247 = vmatprep.subr.bf16.mxu0 %v2625_v36  ;;  %1288 = vmatprep.subr.bf16.mxu1 %v2628_v37 }
 0x2e2   : > { %1248 = vmatpush1.bf16.msra.mxu0 %v2633_v38  ;;  %1289 = vmatpush1.bf16.msra.mxu1 %v2636_v39  ;;  %v1211_v39 = vstv %s1210_s18 }
 0x2e3   : > { %1249 = vmatprep.subr.bf16.mxu0 %v2641_v40  ;;  %1290 = vmatprep.subr.bf16.mxu1 %v2644_v41  ;;  %vm1212_vm3 = vcmp.lt.s32.totalorder %v2698_v47, %v1211_v39 }
 0x2e6   : > { %1250 = vmatpush1.bf16.msra.mxu0 %v2649_v42  ;;  %1291 = vmatpush1.bf16.msra.mxu1 %v2652_v43 }
 0x39c   : > { %v1133_v13 = vpop.f32.mrb[16].mxu0  ;;  %v1174_v15 = vpop.f32.mrb[16].mxu1 }
 0x39d   : > { %v1181_v16 = vadd.f32 %v1133_v13, %v1094_v3  ;;  %v1183_v17 = vadd.f32 %v1174_v15, %v1096_v14  ;;  %v1135_v19 = vpop.f32.mrb[17].mxu0  ;;  %v1176_v22 = vpop.f32.mrb[17].mxu1  ;;  %v1347_v15 = vstv %s1346_s19 }
 0x39e   : > { %v1182_v23 = vadd.f32 %v1135_v19, %v1095_v18  ;;  %v1184_v24 = vadd.f32 %v1176_v22, %v1097_v21  ;;  %v1137_v25 = vpop.f32.mrb[18].mxu0  ;;  %v1178_v26 = vpop.f32.mrb[18].mxu1  ;;  %vm1348_vm4 = vcmp.lt.s32.totalorder %v2698_v47, %v1347_v15 }
 0x39f   : > { %v1674_v27 = vmul.f32 -1.442695, %v1181_v16  ;;  %v1138_v28 = vpop.f32.mrb[19].mxu0  ;;  %v1179_v29 = vpop.f32.mrb[19].mxu1 }
 0x3a0   : > { %v1675_v30 = vmul.f32 -1.442695, %v1182_v23  ;;  %v1676_v31 = vmul.f32 -1.442695, %v1184_v24 }
 0x3a1   : > { %1916 = vpow2.f32 %v1674_v27 }
 0x3a2   : > { %1918 = vpow2.f32 %v1675_v30 }
 0x3a3   : > { %1920 = vpow2.f32 %v1676_v31 }
 0x3a4   : > { %1922 = vtanh.f32 %v1183_v17 }
 0x3ab   : > { %v1917_v32 = vpop.eup %1916 }
 0x3ac   : > { %v1919_v33 = vpop.eup %1918  ;;  %v1188_v34 = vadd.f32 1.0, %v1917_v32 }
 0x3ad   : > { %v1194_v35 = vadd.f32 1.0, %v1919_v33  ;;  %v1921_v36 = vpop.eup %1920 }
 0x3ae   : > { %1924 = vrcp.f32 %v1188_v34  ;;  %v1923_v37 = vpop.eup %1922  ;;  %v1201_v42 = vadd.f32 1.0, %v1921_v36 }
 0x3af   : > { %1926 = vrcp.f32 %v1194_v35 }
 0x3b0   : > { %1928 = vrcp.f32 %v1201_v42 }
 0x3b8   : > { %v1925_v38 = vpop.eup %1924 }
 0x3b9   : > { %v1927_v40 = vpop.eup %1926  ;;  %v1205_v41 = vmul.f32 %v1925_v38, %v1923_v37 }
 0x3ba   : > { %v1204_v43 = vmul.f32 %v1927_v40, %v2771_v10  ;;  %v1929_v12 = vpop.eup %1928 }
 0x3bc   : > { %v1206_v2 = vadd.f32 %v1205_v41, %v1204_v43 }
 0x3be   : > { %1930 = vtanh.f32 %v1206_v2  ;;  %v2825_v56 = vsel %vm1212_vm3, %v1206_v2, %v2771_v10 }
 0x3c8   : > { %v1931_v51 = vpop.eup %1930 }
 0x3c9   : > { %v1208_v52 = vmul.f32 %v1931_v51, %v1929_v12 }
 0x3cb   : > { %v2829_v57 = vsel %vm1212_vm3, %v1208_v52, %v2775_v48  ;;  %v1217_v58 = vsel %vm1212_vm3, %v1208_v52, 0.0 }
 0x3cc   : > { %v1218_v59 = vpack.c.bf16 %v1217_v58, %v1217_v58  ;;  %v1234_v60 = vpack.c.bf16 %v2829_v57, %v2829_v57 }
 0x3ce   : > { %1221 = vst [vmem:[%s1220_s13] sm:$0xf] %v1218_v59  ;;  %1268 = vmatmul.mubr.bf16.vlgmr.msra.gmra.mrb[20].mxu0 %v1234_v60  ;;  %1309 = vmatmul.mubr.bf16.vlgmr.msra.gmra.mrb[20].mxu1 %v1234_v60 }
 0x4a1   : > { %v1269_v62 = vpop.f32.mrb[20].mxu0  ;;  %v1310_v0 = vpop.f32.mrb[20].mxu1 }
 0x4a2   : > { %v1317_v1 = vadd.f32 %v1269_v62, %v1230_v61  ;;  %v1319_v53 = vadd.f32 %v1310_v0, %v1232_v63  ;;  %v1271_v4 = vpop.f32.mrb[21].mxu0  ;;  %v1312_v55 = vpop.f32.mrb[21].mxu1 }
 0x4a3   : > { %v1318_v6 = vadd.f32 %v1271_v4, %v1231_v54  ;;  %v1320_v7 = vadd.f32 %v1312_v55, %v1233_v5  ;;  %v1273_v8 = vpop.f32.mrb[22].mxu0  ;;  %v1314_v44 = vpop.f32.mrb[22].mxu1 }
 0x4a4   : > { %v1681_v9 = vmul.f32 -1.442695, %v1317_v1  ;;  %v1274_v10 = vpop.f32.mrb[23].mxu0  ;;  %v1315_v20 = vpop.f32.mrb[23].mxu1 }
 0x4a5   : > { %v1682_v45 = vmul.f32 -1.442695, %v1318_v6  ;;  %v1683_v46 = vmul.f32 -1.442695, %v1320_v7 }
 0x4a6   : > { %1932 = vpow2.f32 %v1681_v9 }
 0x4a7   : > { %1934 = vpow2.f32 %v1682_v45 }
 0x4a8   : > { %1936 = vpow2.f32 %v1683_v46 }
 0x4a9   : > { %1938 = vtanh.f32 %v1319_v53 }
 0x4b0   : > { %v1933_v48 = vpop.eup %1932 }
 0x4b1   : > { %v1935_v49 = vpop.eup %1934  ;;  %v1324_v11 = vadd.f32 1.0, %v1933_v48 }
 0x4b2   : > { %v1330_v50 = vadd.f32 1.0, %v1935_v49  ;;  %v1937_v3 = vpop.eup %1936 }
 0x4b3   : > { %1940 = vrcp.f32 %v1324_v11  ;;  %v1939_v13 = vpop.eup %1938  ;;  %v1337_v18 = vadd.f32 1.0, %v1937_v3 }
 0x4b4   : > { %1942 = vrcp.f32 %v1330_v50 }
 0x4b5   : > { %1944 = vrcp.f32 %v1337_v18 }
 0x4bd   : > { %v1941_v14 = vpop.eup %1940 }
 0x4be   : > { %v1943_v16 = vpop.eup %1942  ;;  %v1341_v17 = vmul.f32 %v1941_v14, %v1939_v13 }
 0x4bf   : > { %v1340_v19 = vmul.f32 %v1943_v16, %v2825_v56  ;;  %v1945_v23 = vpop.eup %1944 }
 0x4c1   : > { %v1342_v21 = vadd.f32 %v1341_v17, %v1340_v19 }
 0x4c3   : > { %1946 = vtanh.f32 %v1342_v21  ;;  %v1351_v22 = vsel %vm1348_vm4, %v1342_v21, %v2825_v56 }
 0x4c4   : > { %1359 = vst [vmem:[#allocation4] sm:$0xff] %v1351_v22 }
 0x4cd   : > { %v1947_v24 = vpop.eup %1946  ;;  %1363 = sbr.rel (%p1685_p13) target bundleno = 1236 (0x4d4), region = 52 }
 0x4ce   : > { %v1344_v25 = vmul.f32 %v1947_v24, %v1945_v23 }
 0x4d0   : > { %v1352_v26 = vsel %vm1348_vm4, %v1344_v25, %v2829_v57  ;;  %v1353_v27 = vsel %vm1348_vm4, %v1344_v25, 0.0 }
 0x4d1   : > { %v1354_v28 = vpack.c.bf16 %v1353_v27, %v1353_v27  ;;  %1358 = vst [vmem:[#allocation3] sm:$0xff] %v1352_v26  ;;  %1364 = vst [vmem:[%s2507_s5] sm:$0xff] (!%p1685_p13), %v1352_v26 }
 0x4d3   : > { %1357 = vst [vmem:[%s1356_s17] sm:$0xf] %v1354_v28 }
 0x4d4 PF: > { %s1701_s22 = sshll.u32 %s2488_s14, 3  ;;  %s1390_s20 = sshll.u32 %s2505_s23, 4  ;;  %s2855_s20 = int_to_ptr.vmem [resolvable:$true] %s1390_s20 }
 0x4d5   : > { %s1387_s15 = sadd.s32 %s2168_s8, %s1701_s22  ;;  %s3006_s13 = sld [smem:[#allocation33_spill]] }
 0x4d6   : > { %s1691_s9 = sshll.u32 %s1387_s15, 6  ;;  %s3007_s30 = sand.u32 1, %s2144_s26  }
 0x4d7   : > { %s2864_s3 = scalar_lea.sflag [#allocation9], %s3007_s30  ;;  %s2020_s27 = scalar_lea.vmem %s2855_s20, 256 }
 0x4d8   : > { %p2021_p7 = scmp.ne.s32.totalorder %s2855_s20, %s2020_s27  ;;  %p3008_p9 = scmp.ne.s32.totalorder %s2991_s1, 0 }
 0x4d9   : > { %s2189_s14 = smov [#allocation12]  }
 0x4da   : > { %p2022_p4 = pnand %p2021_p7, %p3008_p9  ;;  %s2024_s23 = sshll.u32 %s2189_s14, 4  ;;  %s2025_s23 = int_to_ptr.vmem [resolvable:$false] %s2024_s23 }
 0x4db   : > { %s2860_s7 = scalar_lea.hbm %s3006_s13, %s1691_s9  ;;  %s2026_s29 = scalar_lea.vmem %s2025_s23, 512 }
 0x4dc   : > { %p2023_p5 = pneg %p2022_p4  ;;  %p2027_p11 = scmp.lt.s32.totalorder %s2855_s20, %s2025_s23 }
 0x4dd   : > { %p2028_p3 = scmp.lt.s32.totalorder %s2026_s29, %s2020_s27 }
 0x4df   : > { %p2029_p0 = por %p2028_p3, %p2027_p11 }
 0x4e1   : > { %p2030_p2 = pnand %p2029_p0, %p2023_p5 }
 0x4e3   : > { %2033 = shalt.err (!%p2030_p2)
}
 0x4e4   : > { %s2034_s10 = scalar_lea.hbm %s2860_s7, 256  ;;  %s2038_s19 = scalar_lea.hbm %s3006_s13, 1024 }
 0x4e5   : > { %p2035_p8 = scmp.ne.s32.totalorder %s2860_s7, %s2034_s10  ;;  %p2039_p1 = scmp.lt.u32.totalorder %s2860_s7, %s3006_s13 }
 0x4e6   : > { %p2040_p10 = scmp.lt.u32.totalorder %s2038_s19, %s2034_s10  ;;  %p2042_p7 = scmp.lt.u32.totalorder %s2034_s10, %s2860_s7 }
 0x4e7   : > { %p2036_p12 = pnand %p2035_p8, %p3008_p9 }
 0x4e8   : > { %p2041_p13 = por %p2040_p10, %p2039_p1 }
 0x4e9   : > { %p2037_p6 = pneg %p2036_p12 }
 0x4ea   : > { %p2043_p4 = por %p2042_p7, %p2041_p13 }
 0x4ec   : > { %p2044_p5 = pnand %p2043_p4, %p2037_p6 }
 0x4ee   : > { %2047 = shalt.err (!%p2044_p5)
}
 0x4ef   : > { %s2190_s22 = smov 64   ;;  %s2191_s15 = smov 128  }
 0x4f0   : > { %s2192_s9 = smov 4   ;;  %s1692_s18 = sshll.u32 %s2168_s8, 7 }
 0x4f1   : > { %1706 = dma.vmem_to_hbm [thread:$0]  (%p3008_p9), %s2855_s20, 256, %s2860_s7, %s2864_s3, %s2190_s22, %s2191_s15, %s2192_s9  }
 0x4f2   : > { %s3009_s27 = sld [smem:[#allocation34_spill]]  ;;  %s1406_s29 = sshll.u32 %s2507_s5, 4  ;;  %s1407_s29 = int_to_ptr.vmem [resolvable:$true] %s1406_s29 }
 0x4f3   : > { %s1371_s10 = scalar_lea.sflag [#allocation14], %s2458_s2  ;;  %s2048_s24 = scalar_lea.vmem %s1407_s29, 128 }
 0x4f4   : > { %p2049_p11 = scmp.ne.s32.totalorder %s1407_s29, %s2048_s24  ;;  %p3011_p3 = scmp.ne.s32.totalorder %s2993_s12, 0 }
 0x4f5   : > { %s2193_s25 = smov [#allocation13]  }
 0x4f6   : > { %p2050_p0 = pnand %p2049_p11, %p3011_p3  ;;  %s2052_s19 = sshll.u32 %s2193_s25, 4  ;;  %s2053_s19 = int_to_ptr.vmem [resolvable:$false] %s2052_s19 }
 0x4f7   : > { %s2054_s21 = scalar_lea.vmem %s2053_s19, 256  ;;  %p2055_p8 = scmp.lt.s32.totalorder %s1407_s29, %s2053_s19 }
 0x4f8   : > { %s3010_s14 = smov %s3009_s27  ;;  %s2892_s23 = scalar_lea.hbm %s3009_s27, %s1692_s18 }
 0x4f9   : > { %p2051_p2 = pneg %p2050_p0  ;;  %p2056_p9 = scmp.lt.s32.totalorder %s2054_s21, %s2048_s24 }
 0x4fb   : > { %p2057_p12 = por %p2056_p9, %p2055_p8 }
 0x4fd   : > { %p2058_p6 = pnand %p2057_p12, %p2051_p2 }
 0x4ff   : > { %2061 = shalt.err (!%p2058_p6)
}
 0x500   : > { %s2062_s1 = scalar_lea.hbm %s2892_s23, 128  ;;  %s2066_s2 = scalar_lea.hbm %s3010_s14, 256 }
 0x501   : > { %p2063_p1 = scmp.ne.s32.totalorder %s2892_s23, %s2062_s1  ;;  %p2067_p7 = scmp.lt.u32.totalorder %s2892_s23, %s3010_s14 }
 0x502   : > { %p2068_p4 = scmp.lt.u32.totalorder %s2066_s2, %s2062_s1  ;;  %p2070_p11 = scmp.lt.u32.totalorder %s2062_s1, %s2892_s23 }
 0x503   : > { %p2064_p10 = pnand %p2063_p1, %p3011_p3 }
 0x504   : > { %p2069_p5 = por %p2068_p4, %p2067_p7 }
 0x505   : > { %p2065_p13 = pneg %p2064_p10 }
 0x506   : > { %p2071_p0 = por %p2070_p11, %p2069_p5 }
 0x508   : > { %p2072_p2 = pnand %p2071_p0, %p2065_p13 }
 0x50a   : > { %2075 = shalt.err (!%p2072_p2)
}
 0x50b   : > { %1707 = dma.vmem_to_hbm [thread:$0]  (%p3011_p3), %s1407_s29, 128, %s2892_s23, %s1371_s10  }
 0x50c PF: > { %p1725_p8 = scmp.ge.s32.totalorder %s2180_s11, 2  ;;  %s1418_s3 = sand.u32 1, %s2140_s0  }
 0x50d   : > { %p3012_p9 = scmp.ne.s32.totalorder %s2992_s16, 0  ;;  %s1419_s17 = scalar_lea.sflag [#allocation9], %s1418_s3 }
 0x50f   : > { %p1718_p12 = pnand %p1725_p8, %p3012_p9 }
 0x511   : > { %2131 = dma.done.wait (!%p1718_p12), %s1419_s17, 256  }
 0x512   : > { %2133 = vsyncadd (!%p1718_p12), %s1419_s17, 4294967040  ;;  %s3013_s22 = sld [smem:[#allocation28_spill]]  ;;  %s1427_s15 = sand.u32 1, %s2152_s28  }
 0x513   : > { %s1428_s9 = scalar_lea.sflag [#allocation14], %s1427_s15 }
 0x518   : > { %p3014_p6 = scmp.ne.s32.totalorder %s3013_s22, 0 }
 0x51a   : > { %p1721_p1 = pnand %p1725_p8, %p3014_p6 }
 0x51c   : > { %2135 = dma.done.wait (!%p1721_p1), %s1428_s9, 128  }
 0x51d   : > { %2137 = vsyncadd (!%p1721_p1), %s1428_s9, 4294967168  ;;  %s35_s11 = sadd.s32 1, %s2180_s11   ;;  %s3015_s12 = sld [smem:[#allocation20_spill]] }
 0x51e   : > { %p32_p3 = scmp.ge.s32.totalorder %s35_s11, 6   ;;  %s3016_s27 = sld [smem:[#allocation29_spill]] }
 0x51f   : > { %s3017_s28 = sld [smem:[#allocation21_spill]]  ;;  %s3018_s29 = sld [smem:[#allocation22_spill]] }
 0x520   : > { %s3019_s30 = sld [smem:[#allocation27_spill]]  ;;  %s3020_s7 = sld [smem:[#allocation23_spill]] }
 0x521   : > { %s3021_s8 = sld [smem:[#allocation24_spill]]  ;;  %s3022_s9 = sld [smem:[#allocation25_spill]] }
 0x522   : > { %s3023_s10 = sld [smem:[#allocation26_spill]]  ;;  %s3024_s0 = smov %s2144_s26 }
 0x523   : > { %s3025_s26 = smov %s3015_s12  ;;  %34 = sbr.rel (!%p32_p3) target bundleno = 30 (0x1e), region = 133 }
 0x52a   :  { %1433 = vsyncpa [#allocation8], 1 }
 0x52b   :  { %1435 = vsyncpa [#allocation8 + $0x1], 1 }
 0x52c   :  { %1436 = vsyncpa [#allocation11], 1 }
 0x52d   :  { %1438 = vsyncpa [#allocation11 + $0x1], 1 }
 0x52e   :  { %1439 = vsyncpa [#allocation9], 1 }
 0x52f   :  { %1441 = vsyncpa [#allocation9 + $0x1], 1 }
 0x530   :  { %1442 = vsyncpa [#allocation14], 1 }
 0x531   :  { %1444 = vsyncpa [#allocation14 + $0x1], 1 }

</bundles_post_ra>
